<compile_context>
chip_gen: v6e
topology: v6e:2x2x1
jax: 0.10.0
libtpu: 0.0.40
codegen_flags: <defaults>
</compile_context>

<pallas_src>
import functools
import math

import jax
import jax.numpy as jnp
from jax import lax
from jax.experimental import pallas as pl
from jax.experimental.pallas import tpu as pltpu


# ----------------------------------------------------------------------------
# helpers
# ----------------------------------------------------------------------------
def _layernorm(x, gamma, beta, eps=1e-5):
    mu = jnp.mean(x, axis=-1, keepdims=True)
    var = jnp.mean(jnp.square(x - mu), axis=-1, keepdims=True)
    return (x - mu) * lax.rsqrt(var + eps) * gamma + beta


@functools.lru_cache(maxsize=1)
def _vmem_limit_bytes():
    """Physical VMEM minus headroom for compiler-internal scratch."""
    cap = None
    try:
        cap = pltpu.get_tpu_info().vmem_capacity_bytes
    except Exception:
        cap = None
    if not cap:
        cap = 64 * 1024 * 1024  # conservative: v7x per-TC physical VMEM
    return max(int(cap) - 16 * 1024 * 1024, 32 * 1024 * 1024)


def _padded_seq_len(S):
    """Pad S so tiles stay sublane/lane dense (no ragged TQ fallback)."""
    if S > 512:
        return ((S + 127) // 128) * 128
    return ((S + 7) // 8) * 8


def _choose_tq(S, D, Fdim, weight_bytes, vmem_limit_bytes):
    """Query-tile size: whole sequence when small, else the largest 128-multiple
    tile that fits the VMEM budget (full-seq src/pos/KV scratch + per-tile temps)."""
    if S <= 512:
        return S
    f32, bf16 = 4, 2
    fixed = (2 * S * D * f32        # src block, double-buffered, f32
             + 2 * S * D * bf16     # pos block, double-buffered, bf16
             + 2 * S * f32          # key-padding bias block
             + 3 * S * D * bf16     # q/k/v persistent scratch
             + weight_bytes)        # single-buffered weights / biases / norms
    per_row = (2 * S + Fdim + 4 * D) * f32   # scores+probs, FFN intermediate, out/residual temps
    for tq in (512, 256, 128):               # prefer 256-multiples (v6e/v7x MXU tile)
        if S % tq == 0 and fixed + tq * per_row <= vmem_limit_bytes:
            return tq
    return 128


# ----------------------------------------------------------------------------
# Pallas kernel: one fused encoder layer (optionally + final LayerNorm)
# ----------------------------------------------------------------------------
def encoder_layer_kernel(src_ref, pos_ref, mask_ref,
                         wqk_ref, bqk_ref, wv_ref, bv_ref, wo_ref, bo_ref,
                         w1_ref, b1_ref, w2_ref, b2_ref,
                         g1_ref, beta1_ref, g2_ref, beta2_ref,
                         gf_ref, betaf_ref,
                         out_ref,
                         q_sc, k_sc, v_sc,
                         *, nhead, apply_final_norm, compute_dtype):
    S, D = src_ref.shape[1], src_ref.shape[2]
    TQ = out_ref.shape[1]
    dh = D // nhead
    scale = 1.0 / math.sqrt(dh)
    cdt = compute_dtype

    # ---- full-sequence Q/K/V projections, once per batch element (j == 0) ---
    @pl.when(pl.program_id(1) == 0)
    def _():
        src_full = src_ref[0]                                     # (S, D) f32
        qk_in = (src_full + pos_ref[0].astype(jnp.float32)).astype(cdt)
        qk = jnp.dot(qk_in, wqk_ref[...],
                     preferred_element_type=jnp.float32) + bqk_ref[0]   # (S, 2D) f32
        q_sc[...] = (qk[:, :D] * scale).astype(cdt)               # fold 1/sqrt(dh) into q
        k_sc[...] = qk[:, D:].astype(cdt)
        v_sc[...] = (jnp.dot(src_full.astype(cdt), wv_ref[...],
                             preferred_element_type=jnp.float32)
                     + bv_ref[0]).astype(cdt)

    qoff = pl.multiple_of(pl.program_id(1) * TQ, TQ)
    src_tile = src_ref[0, pl.ds(qoff, TQ), :]                     # (TQ, D) f32
    q = q_sc[pl.ds(qoff, TQ), :]                                  # (TQ, D) bf16 (pre-scaled)
    k = k_sc[...]                                                 # (S, D)  bf16
    v = v_sc[...]                                                 # (S, D)  bf16

    # key-padding additive bias, broadcast once (hoisted out of the head loop)
    bias_tile = jnp.broadcast_to(mask_ref[0], (TQ, S)).astype(jnp.float32)

    # ---- multi-head attention ------------------------------------------------
    heads = []
    for h in range(nhead):                                        # static offsets only
        lo = h * dh
        s = lax.dot_general(q[:, lo:lo + dh], k[:, lo:lo + dh],
                            (((1,), (1,)), ((), ())),
                            preferred_element_type=jnp.float32)   # (TQ, S)
        s = s + bias_tile
        s = s - jnp.max(s, axis=-1, keepdims=True)
        p = jnp.exp(s)
        p = p * pl.reciprocal(jnp.sum(p, axis=-1, keepdims=True))  # exact reciprocal
        heads.append(jnp.dot(p.astype(cdt), v[:, lo:lo + dh],
                             preferred_element_type=jnp.float32))  # (TQ, dh)
    # heads are lane-adjacent: one contiguous (TQ, D) slab, single D-deep W_o matmul
    o_cat = jnp.concatenate(heads, axis=-1).astype(cdt)            # (TQ, D)
    attn = jnp.dot(o_cat, wo_ref[...],
                   preferred_element_type=jnp.float32) + bo_ref[0]

    # ---- residual + LayerNorm1 (f32) ----------------------------------------
    x = _layernorm(src_tile + attn, g1_ref[0], beta1_ref[0])

    # ---- feed-forward: Linear -> ReLU -> Linear ------------------------------
    h1 = jnp.dot(x.astype(cdt), w1_ref[...],
                 preferred_element_type=jnp.float32) + b1_ref[0]
    h1 = jnp.maximum(h1, 0.0)
    ff = jnp.dot(h1.astype(cdt), w2_ref[...],
                 preferred_element_type=jnp.float32) + b2_ref[0]

    # ---- residual + LayerNorm2 (+ fused final encoder norm on last layer) ---
    y = _layernorm(x + ff, g2_ref[0], beta2_ref[0])
    if apply_final_norm:
        y = _layernorm(y, gf_ref[0], betaf_ref[0])

    out_ref[0] = y.astype(out_ref.dtype)


# ----------------------------------------------------------------------------
# wrapper around pallas_call
# ----------------------------------------------------------------------------
_SINGLE_BUFFER_WEIGHTS = [hasattr(pl, "Buffered")]   # fall back gracefully if unsupported


def _make_layer_call(B, S, D, Fdim, TQ, NQ, nhead, apply_final,
                     compute_dtype, vmem_limit, single_buffer_weights):
    kernel = functools.partial(encoder_layer_kernel, nhead=nhead,
                               apply_final_norm=apply_final,
                               compute_dtype=compute_dtype)

    weight_kw = (dict(pipeline_mode=pl.Buffered(1))
                 if single_buffer_weights else {})

    def fixed(shape):
        # weights / biases / norm params: same block every grid step -> single buffer
        zeros = (0,) * len(shape)
        return pl.BlockSpec(shape, lambda b, j: zeros, **weight_kw)

    in_specs = [
        pl.BlockSpec((1, S, D), lambda b, j: (b, 0, 0)),     # src (full seq, f32)
        pl.BlockSpec((1, S, D), lambda b, j: (b, 0, 0)),     # pos (full seq, bf16)
        pl.BlockSpec((1, 1, S), lambda b, j: (b, 0, 0)),     # key-padding additive bias
        fixed((D, 2 * D)), fixed((1, 2 * D)),                # fused wq||wk, bq||bk
        fixed((D, D)), fixed((1, D)),                        # wv, bv
        fixed((D, D)), fixed((1, D)),                        # wo, bo
        fixed((D, Fdim)), fixed((1, Fdim)),                  # w1, b1
        fixed((Fdim, D)), fixed((1, D)),                     # w2, b2
        fixed((1, D)), fixed((1, D)),                        # ln1 gamma / beta
        fixed((1, D)), fixed((1, D)),                        # ln2 gamma / beta
        fixed((1, D)), fixed((1, D)),                        # final-norm gamma / beta
    ]

    return pl.pallas_call(
        kernel,
        out_shape=jax.ShapeDtypeStruct((B, S, D), jnp.float32),
        grid_spec=pltpu.PrefetchScalarGridSpec(
            num_scalar_prefetch=0,
            grid=(B, NQ),
            in_specs=in_specs,
            out_specs=pl.BlockSpec((1, TQ, D), lambda b, j: (b, j, 0)),
            scratch_shapes=[
                pltpu.VMEM((S, D), compute_dtype),   # q scratch (pre-scaled)
                pltpu.VMEM((S, D), compute_dtype),   # k scratch
                pltpu.VMEM((S, D), compute_dtype),   # v scratch
            ],
        ),
        compiler_params=pltpu.CompilerParams(
            # batch axis is parallel (megacore / v7x 2-TC); query-tile axis must be
            # arbitrary because K/V scratch persists across it.
            dimension_semantics=("parallel", "arbitrary"),
            vmem_limit_bytes=vmem_limit,
        ),
    )


def run_encoder_layer(src_bsd, pos_bsd, key_bias_b1s, p, nhead, *,
                      final_norm=None, compute_dtype=jnp.bfloat16):
    B, S, D = src_bsd.shape
    Fdim = p["w1"].shape[1]
    vmem_limit = _vmem_limit_bytes()
    weight_bytes = sum(int(a.size) * a.dtype.itemsize for a in p.values())
    TQ = _choose_tq(S, D, Fdim, weight_bytes, vmem_limit)
    NQ = S // TQ

    apply_final = final_norm is not None
    gf = final_norm["gamma"] if apply_final else jnp.ones((1, D), jnp.float32)
    betaf = final_norm["beta"] if apply_final else jnp.zeros((1, D), jnp.float32)

    args = (src_bsd, pos_bsd, key_bias_b1s,
            p["wqk"], p["bqk"], p["wv"], p["bv"], p["wo"], p["bo"],
            p["w1"], p["b1"], p["w2"], p["b2"],
            p["g1"], p["beta1"], p["g2"], p["beta2"],
            gf, betaf)

    if _SINGLE_BUFFER_WEIGHTS[0]:
        try:
            call = _make_layer_call(B, S, D, Fdim, TQ, NQ, nhead, apply_final,
                                    compute_dtype, vmem_limit, True)
            return call(*args)
        except Exception:
            _SINGLE_BUFFER_WEIGHTS[0] = False   # retry once without Buffered(1)
    call = _make_layer_call(B, S, D, Fdim, TQ, NQ, nhead, apply_final,
                            compute_dtype, vmem_limit, False)
    return call(*args)


def transformer_encoder(src_sbd, layer_params, norm_params=None,
                        src_key_padding_mask=None, pos_sbd=None, nhead=4,
                        compute_dtype=jnp.bfloat16):
    """Mirrors TransformerEncoder.forward (inference).

    src_sbd / pos_sbd: (S, B, D) float32 (PyTorch layout).
    src_key_padding_mask: (B, S) bool, True = ignore that key (optional).
    """
    S, B, D = src_sbd.shape
    assert D % nhead == 0, "d_model must be divisible by nhead"

    src = jnp.transpose(src_sbd, (1, 0, 2)).astype(jnp.float32)        # (B, S, D) f32
    # pos is only ever consumed after a bf16 cast -> store bf16 in HBM (halves its DMA)
    pos = (jnp.zeros((B, S, D), compute_dtype) if pos_sbd is None
           else jnp.transpose(pos_sbd, (1, 0, 2)).astype(compute_dtype))
    if src_key_padding_mask is None:
        key_bias = jnp.zeros((B, 1, S), jnp.float32)
    else:
        # NOTE: a fully-padded row yields a uniform distribution over masked keys
        # here, whereas PyTorch would produce NaN.
        key_bias = jnp.where(src_key_padding_mask, -1e9, 0.0)
        key_bias = key_bias.astype(jnp.float32).reshape(B, 1, S)

    # pad S so every tile / store stays lane & sublane dense; padding is masked out
    S_pad = _padded_seq_len(S)
    if S_pad != S:
        dp = S_pad - S
        src = jnp.pad(src, ((0, 0), (0, dp), (0, 0)))
        pos = jnp.pad(pos, ((0, 0), (0, dp), (0, 0)))
        key_bias = jnp.pad(key_bias, ((0, 0), (0, 0), (0, dp)), constant_values=-1e9)

    out = src
    n_layers = len(layer_params)
    # TODO(synk): fold the layer stack into one pallas_call (layer grid axis) so the
    #             residual stream stays resident in VMEM between layers.
    for i, p in enumerate(layer_params):
        is_last = i == n_layers - 1
        out = run_encoder_layer(
            out, pos, key_bias, p, nhead,
            final_norm=norm_params if (is_last and norm_params is not None) else None,
            compute_dtype=compute_dtype)
    out = out[:, :S, :]
    return jnp.transpose(out, (1, 0, 2))                               # back to (S, B, D)


# ----------------------------------------------------------------------------
# pure-JAX reference (f32 weights-as-stored) for correctness check
# ----------------------------------------------------------------------------
def reference_encoder(src_sbd, layer_params, norm_params, key_padding, pos_sbd, nhead):
    src = jnp.transpose(src_sbd, (1, 0, 2)).astype(jnp.float32)
    pos = jnp.transpose(pos_sbd, (1, 0, 2)).astype(jnp.float32)
    B, S, D = src.shape
    dh = D // nhead
    bias = jnp.where(key_padding, -1e9, 0.0).astype(jnp.float32)[:, None, None, :]
    x = src
    for p in layer_params:
        f32 = lambda a: a.astype(jnp.float32)
        qk = (x + pos) @ f32(p["wqk"]) + p["bqk"]
        q, k = qk[..., :D], qk[..., D:]
        v = x @ f32(p["wv"]) + p["bv"]
        qh = q.reshape(B, S, nhead, dh).transpose(0, 2, 1, 3)
        kh = k.reshape(B, S, nhead, dh).transpose(0, 2, 1, 3)
        vh = v.reshape(B, S, nhead, dh).transpose(0, 2, 1, 3)
        s = jnp.einsum("bhqd,bhkd->bhqk", qh, kh) / math.sqrt(dh) + bias
        a = jax.nn.softmax(s, axis=-1)
        o = jnp.einsum("bhqk,bhkd->bhqd", a, vh).transpose(0, 2, 1, 3).reshape(B, S, D)
        attn = o @ f32(p["wo"]) + p["bo"]
        x = _layernorm(x + attn, p["g1"], p["beta1"])
        h1 = jax.nn.relu(x @ f32(p["w1"]) + p["b1"])
        ff = h1 @ f32(p["w2"]) + p["b2"]
        x = _layernorm(x + ff, p["g2"], p["beta2"])
    if norm_params is not None:
        x = _layernorm(x, norm_params["gamma"], norm_params["beta"])
    return jnp.transpose(x, (1, 0, 2))


# ----------------------------------------------------------------------------
# deterministic synthetic parameters (bf16 weights in HBM, f32 biases/norms)
# ----------------------------------------------------------------------------
def init_layer_params(key, d_model, dim_ff, weight_dtype=jnp.bfloat16):
    ks = jax.random.split(key, 6)
    scale = 1.0 / math.sqrt(d_model)
    wq = jax.random.normal(ks[0], (d_model, d_model), jnp.float32) * scale
    wk = jax.random.normal(ks[1], (d_model, d_model), jnp.float32) * scale
    wv = jax.random.normal(ks[2], (d_model, d_model), jnp.float32) * scale
    wo = jax.random.normal(ks[3], (d_model, d_model), jnp.float32) * scale
    w1 = jax.random.normal(ks[4], (d_model, dim_ff), jnp.float32) * scale
    w2 = jax.random.normal(ks[5], (dim_ff, d_model), jnp.float32) * (1.0 / math.sqrt(dim_ff))
    return dict(
        wqk=jnp.concatenate([wq, wk], axis=1).astype(weight_dtype),
        bqk=jnp.zeros((1, 2 * d_model), jnp.float32),
        wv=wv.astype(weight_dtype), bv=jnp.zeros((1, d_model), jnp.float32),
        wo=wo.astype(weight_dtype), bo=jnp.zeros((1, d_model), jnp.float32),
        w1=w1.astype(weight_dtype), b1=jnp.zeros((1, dim_ff), jnp.float32),
        w2=w2.astype(weight_dtype), b2=jnp.zeros((1, d_model), jnp.float32),
        g1=jnp.ones((1, d_model), jnp.float32), beta1=jnp.zeros((1, d_model), jnp.float32),
        g2=jnp.ones((1, d_model), jnp.float32), beta2=jnp.zeros((1, d_model), jnp.float32),
    )


if __name__ == "__main__":
    S, B, D = 8, 2, 32
    NHEAD, DIM_FF, NUM_LAYERS = 4, 64, 2

    root = jax.random.PRNGKey(0)
    k_src, k_pos, k_layers = jax.random.split(root, 3)

    src = jax.random.normal(k_src, (S, B, D), jnp.float32)
    pos = jax.random.normal(k_pos, (S, B, D), jnp.float32) * 0.1

    layer_keys = jax.random.split(k_layers, NUM_LAYERS)
    layer_params = [init_layer_params(k, D, DIM_FF) for k in layer_keys]
    norm_params = dict(gamma=jnp.ones((1, D), jnp.float32),
                       beta=jnp.zeros((1, D), jnp.float32))

    # mask the last two keys of batch element 1 (True = padding / ignore)
    key_padding = jnp.zeros((B, S), jnp.bool_).at[1, S - 2:].set(True)

    out = transformer_encoder(src, layer_params, norm_params=norm_params,
                              src_key_padding_mask=key_padding,
                              pos_sbd=pos, nhead=NHEAD)
    out = jax.block_until_ready(out)

    assert out.shape == (S, B, D), out.shape
    assert bool(jnp.all(jnp.isfinite(out)))

    ref = reference_encoder(src, layer_params, norm_params, key_padding, pos, NHEAD)
    max_err = float(jnp.max(jnp.abs(out - ref)))
    assert max_err < 0.25, f"max abs err vs reference: {max_err}"

    print("KERNEL_OK")
</pallas_src>

<mosaic_0001>
module attributes {stable_mosaic.version = 11 : i64} {
  func.func @encoder_layer_kernel(%arg0: i32, %arg1: i32, %arg2: memref<1x8x32xf32, #tpu.memory_space<vmem>>, %arg3: memref<1x8x32xbf16, #tpu.memory_space<vmem>>, %arg4: memref<1x1x8xf32, #tpu.memory_space<vmem>>, %arg5: memref<32x64xbf16, #tpu.memory_space<vmem>>, %arg6: memref<1x64xf32, #tpu.memory_space<vmem>>, %arg7: memref<32x32xbf16, #tpu.memory_space<vmem>>, %arg8: memref<1x32xf32, #tpu.memory_space<vmem>>, %arg9: memref<32x32xbf16, #tpu.memory_space<vmem>>, %arg10: memref<1x32xf32, #tpu.memory_space<vmem>>, %arg11: memref<32x64xbf16, #tpu.memory_space<vmem>>, %arg12: memref<1x64xf32, #tpu.memory_space<vmem>>, %arg13: memref<64x32xbf16, #tpu.memory_space<vmem>>, %arg14: memref<1x32xf32, #tpu.memory_space<vmem>>, %arg15: memref<1x32xf32, #tpu.memory_space<vmem>>, %arg16: memref<1x32xf32, #tpu.memory_space<vmem>>, %arg17: memref<1x32xf32, #tpu.memory_space<vmem>>, %arg18: memref<1x32xf32, #tpu.memory_space<vmem>>, %arg19: memref<1x32xf32, #tpu.memory_space<vmem>>, %arg20: memref<1x32xf32, #tpu.memory_space<vmem>>, %arg21: memref<1x8x32xf32, #tpu.memory_space<vmem>>, %arg22: memref<8x32xbf16, #tpu.memory_space<vmem>>, %arg23: memref<8x32xbf16, #tpu.memory_space<vmem>>, %arg24: memref<8x32xbf16, #tpu.memory_space<vmem>>) attributes {dimension_semantics = [#tpu.dimension_semantics<parallel>, #tpu.dimension_semantics<arbitrary>], iteration_bounds = array<i64: 2, 1>, scalar_prefetch = 0 : i64, scratch_operands = 3 : i64, tpu.core_type = #tpu.core_type<tc>, window_params = [{transform_indices = @transform_0, window_bounds = array<i64: 1, 8, 32>}, {transform_indices = @transform_1, window_bounds = array<i64: 1, 8, 32>}, {transform_indices = @transform_2, window_bounds = array<i64: 1, 1, 8>}, {pipeline_mode = #tpu.pipeline_mode<synchronous>, transform_indices = @transform_3, window_bounds = array<i64: 32, 64>}, {pipeline_mode = #tpu.pipeline_mode<synchronous>, transform_indices = @transform_4, window_bounds = array<i64: 1, 64>}, {pipeline_mode = #tpu.pipeline_mode<synchronous>, transform_indices = @transform_5, window_bounds = array<i64: 32, 32>}, {pipeline_mode = #tpu.pipeline_mode<synchronous>, transform_indices = @transform_6, window_bounds = array<i64: 1, 32>}, {pipeline_mode = #tpu.pipeline_mode<synchronous>, transform_indices = @transform_7, window_bounds = array<i64: 32, 32>}, {pipeline_mode = #tpu.pipeline_mode<synchronous>, transform_indices = @transform_8, window_bounds = array<i64: 1, 32>}, {pipeline_mode = #tpu.pipeline_mode<synchronous>, transform_indices = @transform_9, window_bounds = array<i64: 32, 64>}, {pipeline_mode = #tpu.pipeline_mode<synchronous>, transform_indices = @transform_10, window_bounds = array<i64: 1, 64>}, {pipeline_mode = #tpu.pipeline_mode<synchronous>, transform_indices = @transform_11, window_bounds = array<i64: 64, 32>}, {pipeline_mode = #tpu.pipeline_mode<synchronous>, transform_indices = @transform_12, window_bounds = array<i64: 1, 32>}, {pipeline_mode = #tpu.pipeline_mode<synchronous>, transform_indices = @transform_13, window_bounds = array<i64: 1, 32>}, {pipeline_mode = #tpu.pipeline_mode<synchronous>, transform_indices = @transform_14, window_bounds = array<i64: 1, 32>}, {pipeline_mode = #tpu.pipeline_mode<synchronous>, transform_indices = @transform_15, window_bounds = array<i64: 1, 32>}, {pipeline_mode = #tpu.pipeline_mode<synchronous>, transform_indices = @transform_16, window_bounds = array<i64: 1, 32>}, {pipeline_mode = #tpu.pipeline_mode<synchronous>, transform_indices = @transform_17, window_bounds = array<i64: 1, 32>}, {pipeline_mode = #tpu.pipeline_mode<synchronous>, transform_indices = @transform_18, window_bounds = array<i64: 1, 32>}, {transform_indices = @transform_19, window_bounds = array<i64: 1, 8, 32>}]} {
    %c0_i32 = arith.constant 0 : i32
    %0 = arith.cmpi eq, %arg1, %c0_i32 : i32
    %1 = arith.extui %0 : i1 to i32
    %c0_i32_0 = arith.constant 0 : i32
    %2 = arith.cmpi ne, %1, %c0_i32_0 : i32
    scf.if %2 {
      %c0_62 = arith.constant 0 : index
      %c0_63 = arith.constant 0 : index
      %c0_64 = arith.constant 0 : index
      %172 = vector.load %arg2[%c0_62, %c0_63, %c0_64] : memref<1x8x32xf32, #tpu.memory_space<vmem>>, vector<1x8x32xf32>
      %173 = vector.shape_cast %172 : vector<1x8x32xf32> to vector<8x32xf32>
      %c0_65 = arith.constant 0 : index
      %c0_66 = arith.constant 0 : index
      %c0_67 = arith.constant 0 : index
      %174 = vector.load %arg3[%c0_65, %c0_66, %c0_67] : memref<1x8x32xbf16, #tpu.memory_space<vmem>>, vector<1x8x32xbf16>
      %175 = vector.shape_cast %174 : vector<1x8x32xbf16> to vector<8x32xbf16>
      %176 = arith.extf %175 : vector<8x32xbf16> to vector<8x32xf32>
      %177 = arith.addf %173, %176 : vector<8x32xf32>
      %178 = arith.truncf %177 : vector<8x32xf32> to vector<8x32xbf16>
      %c0_68 = arith.constant 0 : index
      %c0_69 = arith.constant 0 : index
      %179 = vector.load %arg5[%c0_68, %c0_69] : memref<32x64xbf16, #tpu.memory_space<vmem>>, vector<32x64xbf16>
      %cst_70 = arith.constant dense<0.000000e+00> : vector<8x64xf32>
      %180 = tpu.matmul %178, %179, %cst_70 {dimension_numbers = #tpu.dot_dimension_numbers<[1], [0], [0], [1], [0, 0, 1, 1], [], []>} : vector<8x32xbf16>, vector<32x64xbf16>, vector<8x64xf32> -> vector<8x64xf32>
      %c0_71 = arith.constant 0 : index
      %c0_72 = arith.constant 0 : index
      %181 = vector.load %arg6[%c0_71, %c0_72] : memref<1x64xf32, #tpu.memory_space<vmem>>, vector<1x64xf32>
      %182 = vector.shape_cast %181 : vector<1x64xf32> to vector<64xf32>
      %183 = vector.shape_cast %182 : vector<64xf32> to vector<1x64xf32>
      %184 = vector.broadcast %183 : vector<1x64xf32> to vector<8x64xf32>
      %185 = arith.addf %180, %184 : vector<8x64xf32>
      %186 = vector.extract_strided_slice %185 {offsets = [0, 0], sizes = [8, 32], strides = [1, 1]} : vector<8x64xf32> to vector<8x32xf32>
      %cst_73 = arith.constant 0.353553385 : f32
      %187 = vector.broadcast %cst_73 : f32 to vector<8x32xf32>
      %188 = arith.mulf %186, %187 : vector<8x32xf32>
      %189 = arith.truncf %188 : vector<8x32xf32> to vector<8x32xbf16>
      %c0_74 = arith.constant 0 : index
      %c0_75 = arith.constant 0 : index
      %190 = vector.load %arg22[%c0_74, %c0_75] : memref<8x32xbf16, #tpu.memory_space<vmem>>, vector<8x32xbf16>
      tpu.vector_store %arg22[%c0_74, %c0_75], %189 {strides = array<i32>} : memref<8x32xbf16, #tpu.memory_space<vmem>>, vector<8x32xbf16>,
      %191 = vector.extract_strided_slice %185 {offsets = [0, 32], sizes = [8, 32], strides = [1, 1]} : vector<8x64xf32> to vector<8x32xf32>
      %192 = arith.truncf %191 : vector<8x32xf32> to vector<8x32xbf16>
      %c0_76 = arith.constant 0 : index
      %c0_77 = arith.constant 0 : index
      %193 = vector.load %arg23[%c0_76, %c0_77] : memref<8x32xbf16, #tpu.memory_space<vmem>>, vector<8x32xbf16>
      tpu.vector_store %arg23[%c0_76, %c0_77], %192 {strides = array<i32>} : memref<8x32xbf16, #tpu.memory_space<vmem>>, vector<8x32xbf16>,
      %194 = arith.truncf %173 : vector<8x32xf32> to vector<8x32xbf16>
      %c0_78 = arith.constant 0 : index
      %c0_79 = arith.constant 0 : index
      %195 = vector.load %arg7[%c0_78, %c0_79] : memref<32x32xbf16, #tpu.memory_space<vmem>>, vector<32x32xbf16>
      %cst_80 = arith.constant dense<0.000000e+00> : vector<8x32xf32>
      %196 = tpu.matmul %194, %195, %cst_80 {dimension_numbers = #tpu.dot_dimension_numbers<[1], [0], [0], [1], [0, 0, 1, 1], [], []>} : vector<8x32xbf16>, vector<32x32xbf16>, vector<8x32xf32> -> vector<8x32xf32>
      %c0_81 = arith.constant 0 : index
      %c0_82 = arith.constant 0 : index
      %197 = vector.load %arg8[%c0_81, %c0_82] : memref<1x32xf32, #tpu.memory_space<vmem>>, vector<1x32xf32>
      %198 = vector.shape_cast %197 : vector<1x32xf32> to vector<32xf32>
      %199 = vector.shape_cast %198 : vector<32xf32> to vector<1x32xf32>
      %200 = vector.broadcast %199 : vector<1x32xf32> to vector<8x32xf32>
      %201 = arith.addf %196, %200 : vector<8x32xf32>
      %202 = arith.truncf %201 : vector<8x32xf32> to vector<8x32xbf16>
      %c0_83 = arith.constant 0 : index
      %c0_84 = arith.constant 0 : index
      %203 = vector.load %arg24[%c0_83, %c0_84] : memref<8x32xbf16, #tpu.memory_space<vmem>>, vector<8x32xbf16>
      tpu.vector_store %arg24[%c0_83, %c0_84], %202 {strides = array<i32>} : memref<8x32xbf16, #tpu.memory_space<vmem>>, vector<8x32xbf16>,
    } else {
    }
    %c8_i32 = arith.constant 8 : i32
    %3 = arith.muli %arg1, %c8_i32 : i32
    %4 = tpu.assume_multiple %3, 8 : i32
    %c0 = arith.constant 0 : index
    %5 = arith.index_cast %4 : i32 to index
    %c0_1 = arith.constant 0 : index
    %6 = vector.load %arg2[%c0, %5, %c0_1] : memref<1x8x32xf32, #tpu.memory_space<vmem>>, vector<1x8x32xf32>
    %7 = vector.shape_cast %6 : vector<1x8x32xf32> to vector<8x32xf32>
    %8 = arith.index_cast %4 : i32 to index
    %c0_2 = arith.constant 0 : index
    %9 = vector.load %arg22[%8, %c0_2] : memref<8x32xbf16, #tpu.memory_space<vmem>>, vector<8x32xbf16>
    %c0_3 = arith.constant 0 : index
    %c0_4 = arith.constant 0 : index
    %10 = vector.load %arg23[%c0_3, %c0_4] : memref<8x32xbf16, #tpu.memory_space<vmem>>, vector<8x32xbf16>
    %c0_5 = arith.constant 0 : index
    %c0_6 = arith.constant 0 : index
    %11 = vector.load %arg24[%c0_5, %c0_6] : memref<8x32xbf16, #tpu.memory_space<vmem>>, vector<8x32xbf16>
    %c0_7 = arith.constant 0 : index
    %c0_8 = arith.constant 0 : index
    %c0_9 = arith.constant 0 : index
    %12 = vector.load %arg4[%c0_7, %c0_8, %c0_9] : memref<1x1x8xf32, #tpu.memory_space<vmem>>, vector<1x1x8xf32>
    %13 = vector.shape_cast %12 : vector<1x1x8xf32> to vector<1x8xf32>
    %14 = vector.shape_cast %13 : vector<1x8xf32> to vector<1x8xf32>
    %15 = vector.broadcast %14 : vector<1x8xf32> to vector<8x8xf32>
    %16 = vector.extract_strided_slice %9 {offsets = [0, 0], sizes = [8, 8], strides = [1, 1]} : vector<8x32xbf16> to vector<8x8xbf16>
    %17 = vector.extract_strided_slice %10 {offsets = [0, 0], sizes = [8, 8], strides = [1, 1]} : vector<8x32xbf16> to vector<8x8xbf16>
    %cst = arith.constant dense<0.000000e+00> : vector<8x8xf32>
    %18 = tpu.matmul %16, %17, %cst {dimension_numbers = #tpu.dot_dimension_numbers<[1], [1], [0], [0], [0, 0, 1, 0], [], []>} : vector<8x8xbf16>, vector<8x8xbf16>, vector<8x8xf32> -> vector<8x8xf32>
    %19 = arith.addf %18, %15 : vector<8x8xf32>
    %cst_10 = arith.constant dense<0xFF800000> : vector<8xf32>
    %20 = vector.multi_reduction <maximumf>, %19, %cst_10 [1] : vector<8x8xf32> to vector<8xf32>
    %21 = vector.shape_cast %20 : vector<8xf32> to vector<8x1xf32>
    %22 = vector.broadcast %21 : vector<8x1xf32> to vector<8x8xf32>
    %23 = arith.subf %19, %22 : vector<8x8xf32>
    %24 = math.exp %23 : vector<8x8xf32>
    %cst_11 = arith.constant dense<0.000000e+00> : vector<8xf32>
    %25 = vector.multi_reduction <add>, %24, %cst_11 [1] : vector<8x8xf32> to vector<8xf32>
    %26 = vector.shape_cast %25 : vector<8xf32> to vector<8x1xf32>
    %27 = tpu.reciprocal %26 : vector<8x1xf32> -> vector<8x1xf32>
    %28 = vector.broadcast %27 : vector<8x1xf32> to vector<8x8xf32>
    %29 = arith.mulf %24, %28 : vector<8x8xf32>
    %30 = arith.truncf %29 : vector<8x8xf32> to vector<8x8xbf16>
    %31 = vector.extract_strided_slice %11 {offsets = [0, 0], sizes = [8, 8], strides = [1, 1]} : vector<8x32xbf16> to vector<8x8xbf16>
    %cst_12 = arith.constant dense<0.000000e+00> : vector<8x8xf32>
    %32 = tpu.matmul %30, %31, %cst_12 {dimension_numbers = #tpu.dot_dimension_numbers<[1], [0], [0], [1], [0, 0, 1, 1], [], []>} : vector<8x8xbf16>, vector<8x8xbf16>, vector<8x8xf32> -> vector<8x8xf32>
    %33 = vector.extract_strided_slice %9 {offsets = [0, 8], sizes = [8, 8], strides = [1, 1]} : vector<8x32xbf16> to vector<8x8xbf16>
    %34 = vector.extract_strided_slice %10 {offsets = [0, 8], sizes = [8, 8], strides = [1, 1]} : vector<8x32xbf16> to vector<8x8xbf16>
    %cst_13 = arith.constant dense<0.000000e+00> : vector<8x8xf32>
    %35 = tpu.matmul %33, %34, %cst_13 {dimension_numbers = #tpu.dot_dimension_numbers<[1], [1], [0], [0], [0, 0, 1, 0], [], []>} : vector<8x8xbf16>, vector<8x8xbf16>, vector<8x8xf32> -> vector<8x8xf32>
    %36 = arith.addf %35, %15 : vector<8x8xf32>
    %cst_14 = arith.constant dense<0xFF800000> : vector<8xf32>
    %37 = vector.multi_reduction <maximumf>, %36, %cst_14 [1] : vector<8x8xf32> to vector<8xf32>
    %38 = vector.shape_cast %37 : vector<8xf32> to vector<8x1xf32>
    %39 = vector.broadcast %38 : vector<8x1xf32> to vector<8x8xf32>
    %40 = arith.subf %36, %39 : vector<8x8xf32>
    %41 = math.exp %40 : vector<8x8xf32>
    %cst_15 = arith.constant dense<0.000000e+00> : vector<8xf32>
    %42 = vector.multi_reduction <add>, %41, %cst_15 [1] : vector<8x8xf32> to vector<8xf32>
    %43 = vector.shape_cast %42 : vector<8xf32> to vector<8x1xf32>
    %44 = tpu.reciprocal %43 : vector<8x1xf32> -> vector<8x1xf32>
    %45 = vector.broadcast %44 : vector<8x1xf32> to vector<8x8xf32>
    %46 = arith.mulf %41, %45 : vector<8x8xf32>
    %47 = arith.truncf %46 : vector<8x8xf32> to vector<8x8xbf16>
    %48 = vector.extract_strided_slice %11 {offsets = [0, 8], sizes = [8, 8], strides = [1, 1]} : vector<8x32xbf16> to vector<8x8xbf16>
    %cst_16 = arith.constant dense<0.000000e+00> : vector<8x8xf32>
    %49 = tpu.matmul %47, %48, %cst_16 {dimension_numbers = #tpu.dot_dimension_numbers<[1], [0], [0], [1], [0, 0, 1, 1], [], []>} : vector<8x8xbf16>, vector<8x8xbf16>, vector<8x8xf32> -> vector<8x8xf32>
    %50 = vector.extract_strided_slice %9 {offsets = [0, 16], sizes = [8, 8], strides = [1, 1]} : vector<8x32xbf16> to vector<8x8xbf16>
    %51 = vector.extract_strided_slice %10 {offsets = [0, 16], sizes = [8, 8], strides = [1, 1]} : vector<8x32xbf16> to vector<8x8xbf16>
    %cst_17 = arith.constant dense<0.000000e+00> : vector<8x8xf32>
    %52 = tpu.matmul %50, %51, %cst_17 {dimension_numbers = #tpu.dot_dimension_numbers<[1], [1], [0], [0], [0, 0, 1, 0], [], []>} : vector<8x8xbf16>, vector<8x8xbf16>, vector<8x8xf32> -> vector<8x8xf32>
    %53 = arith.addf %52, %15 : vector<8x8xf32>
    %cst_18 = arith.constant dense<0xFF800000> : vector<8xf32>
    %54 = vector.multi_reduction <maximumf>, %53, %cst_18 [1] : vector<8x8xf32> to vector<8xf32>
    %55 = vector.shape_cast %54 : vector<8xf32> to vector<8x1xf32>
    %56 = vector.broadcast %55 : vector<8x1xf32> to vector<8x8xf32>
    %57 = arith.subf %53, %56 : vector<8x8xf32>
    %58 = math.exp %57 : vector<8x8xf32>
    %cst_19 = arith.constant dense<0.000000e+00> : vector<8xf32>
    %59 = vector.multi_reduction <add>, %58, %cst_19 [1] : vector<8x8xf32> to vector<8xf32>
    %60 = vector.shape_cast %59 : vector<8xf32> to vector<8x1xf32>
    %61 = tpu.reciprocal %60 : vector<8x1xf32> -> vector<8x1xf32>
    %62 = vector.broadcast %61 : vector<8x1xf32> to vector<8x8xf32>
    %63 = arith.mulf %58, %62 : vector<8x8xf32>
    %64 = arith.truncf %63 : vector<8x8xf32> to vector<8x8xbf16>
    %65 = vector.extract_strided_slice %11 {offsets = [0, 16], sizes = [8, 8], strides = [1, 1]} : vector<8x32xbf16> to vector<8x8xbf16>
    %cst_20 = arith.constant dense<0.000000e+00> : vector<8x8xf32>
    %66 = tpu.matmul %64, %65, %cst_20 {dimension_numbers = #tpu.dot_dimension_numbers<[1], [0], [0], [1], [0, 0, 1, 1], [], []>} : vector<8x8xbf16>, vector<8x8xbf16>, vector<8x8xf32> -> vector<8x8xf32>
    %67 = vector.extract_strided_slice %9 {offsets = [0, 24], sizes = [8, 8], strides = [1, 1]} : vector<8x32xbf16> to vector<8x8xbf16>
    %68 = vector.extract_strided_slice %10 {offsets = [0, 24], sizes = [8, 8], strides = [1, 1]} : vector<8x32xbf16> to vector<8x8xbf16>
    %cst_21 = arith.constant dense<0.000000e+00> : vector<8x8xf32>
    %69 = tpu.matmul %67, %68, %cst_21 {dimension_numbers = #tpu.dot_dimension_numbers<[1], [1], [0], [0], [0, 0, 1, 0], [], []>} : vector<8x8xbf16>, vector<8x8xbf16>, vector<8x8xf32> -> vector<8x8xf32>
    %70 = arith.addf %69, %15 : vector<8x8xf32>
    %cst_22 = arith.constant dense<0xFF800000> : vector<8xf32>
    %71 = vector.multi_reduction <maximumf>, %70, %cst_22 [1] : vector<8x8xf32> to vector<8xf32>
    %72 = vector.shape_cast %71 : vector<8xf32> to vector<8x1xf32>
    %73 = vector.broadcast %72 : vector<8x1xf32> to vector<8x8xf32>
    %74 = arith.subf %70, %73 : vector<8x8xf32>
    %75 = math.exp %74 : vector<8x8xf32>
    %cst_23 = arith.constant dense<0.000000e+00> : vector<8xf32>
    %76 = vector.multi_reduction <add>, %75, %cst_23 [1] : vector<8x8xf32> to vector<8xf32>
    %77 = vector.shape_cast %76 : vector<8xf32> to vector<8x1xf32>
    %78 = tpu.reciprocal %77 : vector<8x1xf32> -> vector<8x1xf32>
    %79 = vector.broadcast %78 : vector<8x1xf32> to vector<8x8xf32>
    %80 = arith.mulf %75, %79 : vector<8x8xf32>
    %81 = arith.truncf %80 : vector<8x8xf32> to vector<8x8xbf16>
    %82 = vector.extract_strided_slice %11 {offsets = [0, 24], sizes = [8, 8], strides = [1, 1]} : vector<8x32xbf16> to vector<8x8xbf16>
    %cst_24 = arith.constant dense<0.000000e+00> : vector<8x8xf32>
    %83 = tpu.matmul %81, %82, %cst_24 {dimension_numbers = #tpu.dot_dimension_numbers<[1], [0], [0], [1], [0, 0, 1, 1], [], []>} : vector<8x8xbf16>, vector<8x8xbf16>, vector<8x8xf32> -> vector<8x8xf32>
    %84 = tpu.concatenate %32, %49, %66, %83 in 1 : vector<8x8xf32>, vector<8x8xf32>, vector<8x8xf32>, vector<8x8xf32> -> vector<8x32xf32>
    %85 = arith.truncf %84 : vector<8x32xf32> to vector<8x32xbf16>
    %c0_25 = arith.constant 0 : index
    %c0_26 = arith.constant 0 : index
    %86 = vector.load %arg9[%c0_25, %c0_26] : memref<32x32xbf16, #tpu.memory_space<vmem>>, vector<32x32xbf16>
    %cst_27 = arith.constant dense<0.000000e+00> : vector<8x32xf32>
    %87 = tpu.matmul %85, %86, %cst_27 {dimension_numbers = #tpu.dot_dimension_numbers<[1], [0], [0], [1], [0, 0, 1, 1], [], []>} : vector<8x32xbf16>, vector<32x32xbf16>, vector<8x32xf32> -> vector<8x32xf32>
    %c0_28 = arith.constant 0 : index
    %c0_29 = arith.constant 0 : index
    %88 = vector.load %arg10[%c0_28, %c0_29] : memref<1x32xf32, #tpu.memory_space<vmem>>, vector<1x32xf32>
    %89 = vector.shape_cast %88 : vector<1x32xf32> to vector<32xf32>
    %90 = vector.shape_cast %89 : vector<32xf32> to vector<1x32xf32>
    %91 = vector.broadcast %90 : vector<1x32xf32> to vector<8x32xf32>
    %92 = arith.addf %87, %91 : vector<8x32xf32>
    %93 = arith.addf %7, %92 : vector<8x32xf32>
    %c0_30 = arith.constant 0 : index
    %c0_31 = arith.constant 0 : index
    %94 = vector.load %arg15[%c0_30, %c0_31] : memref<1x32xf32, #tpu.memory_space<vmem>>, vector<1x32xf32>
    %95 = vector.shape_cast %94 : vector<1x32xf32> to vector<32xf32>
    %c0_32 = arith.constant 0 : index
    %c0_33 = arith.constant 0 : index
    %96 = vector.load %arg16[%c0_32, %c0_33] : memref<1x32xf32, #tpu.memory_space<vmem>>, vector<1x32xf32>
    %97 = vector.shape_cast %96 : vector<1x32xf32> to vector<32xf32>
    %cst_34 = arith.constant dense<0.000000e+00> : vector<8xf32>
    %98 = vector.multi_reduction <add>, %93, %cst_34 [1] : vector<8x32xf32> to vector<8xf32>
    %99 = vector.shape_cast %98 : vector<8xf32> to vector<8x1xf32>
    %cst_35 = arith.constant 3.200000e+01 : f32
    %100 = vector.broadcast %cst_35 : f32 to vector<8x1xf32>
    %101 = arith.divf %99, %100 : vector<8x1xf32>
    %102 = vector.broadcast %101 : vector<8x1xf32> to vector<8x32xf32>
    %103 = arith.subf %93, %102 : vector<8x32xf32>
    %104 = arith.mulf %103, %103 : vector<8x32xf32>
    %cst_36 = arith.constant dense<0.000000e+00> : vector<8xf32>
    %105 = vector.multi_reduction <add>, %104, %cst_36 [1] : vector<8x32xf32> to vector<8xf32>
    %106 = vector.shape_cast %105 : vector<8xf32> to vector<8x1xf32>
    %cst_37 = arith.constant 3.200000e+01 : f32
    %107 = vector.broadcast %cst_37 : f32 to vector<8x1xf32>
    %108 = arith.divf %106, %107 : vector<8x1xf32>
    %109 = vector.broadcast %101 : vector<8x1xf32> to vector<8x32xf32>
    %110 = arith.subf %93, %109 : vector<8x32xf32>
    %cst_38 = arith.constant 9.99999974E-6 : f32
    %111 = vector.broadcast %cst_38 : f32 to vector<8x1xf32>
    %112 = arith.addf %108, %111 : vector<8x1xf32>
    %113 = math.rsqrt %112 : vector<8x1xf32>
    %114 = vector.broadcast %113 : vector<8x1xf32> to vector<8x32xf32>
    %115 = arith.mulf %110, %114 : vector<8x32xf32>
    %116 = vector.shape_cast %95 : vector<32xf32> to vector<1x32xf32>
    %117 = vector.broadcast %116 : vector<1x32xf32> to vector<8x32xf32>
    %118 = arith.mulf %115, %117 : vector<8x32xf32>
    %119 = vector.shape_cast %97 : vector<32xf32> to vector<1x32xf32>
    %120 = vector.broadcast %119 : vector<1x32xf32> to vector<8x32xf32>
    %121 = arith.addf %118, %120 : vector<8x32xf32>
    %122 = arith.truncf %121 : vector<8x32xf32> to vector<8x32xbf16>
    %c0_39 = arith.constant 0 : index
    %c0_40 = arith.constant 0 : index
    %123 = vector.load %arg11[%c0_39, %c0_40] : memref<32x64xbf16, #tpu.memory_space<vmem>>, vector<32x64xbf16>
    %cst_41 = arith.constant dense<0.000000e+00> : vector<8x64xf32>
    %124 = tpu.matmul %122, %123, %cst_41 {dimension_numbers = #tpu.dot_dimension_numbers<[1], [0], [0], [1], [0, 0, 1, 1], [], []>} : vector<8x32xbf16>, vector<32x64xbf16>, vector<8x64xf32> -> vector<8x64xf32>
    %c0_42 = arith.constant 0 : index
    %c0_43 = arith.constant 0 : index
    %125 = vector.load %arg12[%c0_42, %c0_43] : memref<1x64xf32, #tpu.memory_space<vmem>>, vector<1x64xf32>
    %126 = vector.shape_cast %125 : vector<1x64xf32> to vector<64xf32>
    %127 = vector.shape_cast %126 : vector<64xf32> to vector<1x64xf32>
    %128 = vector.broadcast %127 : vector<1x64xf32> to vector<8x64xf32>
    %129 = arith.addf %124, %128 : vector<8x64xf32>
    %cst_44 = arith.constant 0.000000e+00 : f32
    %130 = vector.broadcast %cst_44 : f32 to vector<8x64xf32>
    %131 = arith.maximumf %129, %130 : vector<8x64xf32>
    %132 = arith.truncf %131 : vector<8x64xf32> to vector<8x64xbf16>
    %c0_45 = arith.constant 0 : index
    %c0_46 = arith.constant 0 : index
    %133 = vector.load %arg13[%c0_45, %c0_46] : memref<64x32xbf16, #tpu.memory_space<vmem>>, vector<64x32xbf16>
    %cst_47 = arith.constant dense<0.000000e+00> : vector<8x32xf32>
    %134 = tpu.matmul %132, %133, %cst_47 {dimension_numbers = #tpu.dot_dimension_numbers<[1], [0], [0], [1], [0, 0, 1, 1], [], []>} : vector<8x64xbf16>, vector<64x32xbf16>, vector<8x32xf32> -> vector<8x32xf32>
    %c0_48 = arith.constant 0 : index
    %c0_49 = arith.constant 0 : index
    %135 = vector.load %arg14[%c0_48, %c0_49] : memref<1x32xf32, #tpu.memory_space<vmem>>, vector<1x32xf32>
    %136 = vector.shape_cast %135 : vector<1x32xf32> to vector<32xf32>
    %137 = vector.shape_cast %136 : vector<32xf32> to vector<1x32xf32>
    %138 = vector.broadcast %137 : vector<1x32xf32> to vector<8x32xf32>
    %139 = arith.addf %134, %138 : vector<8x32xf32>
    %140 = arith.addf %121, %139 : vector<8x32xf32>
    %c0_50 = arith.constant 0 : index
    %c0_51 = arith.constant 0 : index
    %141 = vector.load %arg17[%c0_50, %c0_51] : memref<1x32xf32, #tpu.memory_space<vmem>>, vector<1x32xf32>
    %142 = vector.shape_cast %141 : vector<1x32xf32> to vector<32xf32>
    %c0_52 = arith.constant 0 : index
    %c0_53 = arith.constant 0 : index
    %143 = vector.load %arg18[%c0_52, %c0_53] : memref<1x32xf32, #tpu.memory_space<vmem>>, vector<1x32xf32>
    %144 = vector.shape_cast %143 : vector<1x32xf32> to vector<32xf32>
    %cst_54 = arith.constant dense<0.000000e+00> : vector<8xf32>
    %145 = vector.multi_reduction <add>, %140, %cst_54 [1] : vector<8x32xf32> to vector<8xf32>
    %146 = vector.shape_cast %145 : vector<8xf32> to vector<8x1xf32>
    %cst_55 = arith.constant 3.200000e+01 : f32
    %147 = vector.broadcast %cst_55 : f32 to vector<8x1xf32>
    %148 = arith.divf %146, %147 : vector<8x1xf32>
    %149 = vector.broadcast %148 : vector<8x1xf32> to vector<8x32xf32>
    %150 = arith.subf %140, %149 : vector<8x32xf32>
    %151 = arith.mulf %150, %150 : vector<8x32xf32>
    %cst_56 = arith.constant dense<0.000000e+00> : vector<8xf32>
    %152 = vector.multi_reduction <add>, %151, %cst_56 [1] : vector<8x32xf32> to vector<8xf32>
    %153 = vector.shape_cast %152 : vector<8xf32> to vector<8x1xf32>
    %cst_57 = arith.constant 3.200000e+01 : f32
    %154 = vector.broadcast %cst_57 : f32 to vector<8x1xf32>
    %155 = arith.divf %153, %154 : vector<8x1xf32>
    %156 = vector.broadcast %148 : vector<8x1xf32> to vector<8x32xf32>
    %157 = arith.subf %140, %156 : vector<8x32xf32>
    %cst_58 = arith.constant 9.99999974E-6 : f32
    %158 = vector.broadcast %cst_58 : f32 to vector<8x1xf32>
    %159 = arith.addf %155, %158 : vector<8x1xf32>
    %160 = math.rsqrt %159 : vector<8x1xf32>
    %161 = vector.broadcast %160 : vector<8x1xf32> to vector<8x32xf32>
    %162 = arith.mulf %157, %161 : vector<8x32xf32>
    %163 = vector.shape_cast %142 : vector<32xf32> to vector<1x32xf32>
    %164 = vector.broadcast %163 : vector<1x32xf32> to vector<8x32xf32>
    %165 = arith.mulf %162, %164 : vector<8x32xf32>
    %166 = vector.shape_cast %144 : vector<32xf32> to vector<1x32xf32>
    %167 = vector.broadcast %166 : vector<1x32xf32> to vector<8x32xf32>
    %168 = arith.addf %165, %167 : vector<8x32xf32>
    %c0_59 = arith.constant 0 : index
    %c0_60 = arith.constant 0 : index
    %c0_61 = arith.constant 0 : index
    %169 = vector.load %arg21[%c0_59, %c0_60, %c0_61] : memref<1x8x32xf32, #tpu.memory_space<vmem>>, vector<1x8x32xf32>
    %170 = vector.shape_cast %169 : vector<1x8x32xf32> to vector<8x32xf32>
    %171 = vector.shape_cast %168 : vector<8x32xf32> to vector<1x8x32xf32>
    tpu.vector_store %arg21[%c0_59, %c0_60, %c0_61], %171 {strides = array<i32>} : memref<1x8x32xf32, #tpu.memory_space<vmem>>, vector<1x8x32xf32>,
    return
  }
  func.func @transform_0(%arg0: i32, %arg1: i32) -> (i32, i32, i32) {
    %c0_i32 = arith.constant 0 : i32
    %c0_i32_0 = arith.constant 0 : i32
    %c0_i32_1 = arith.constant 0 : i32
    return %arg0, %c0_i32, %c0_i32_0 : i32, i32, i32
  }
  func.func @transform_1(%arg0: i32, %arg1: i32) -> (i32, i32, i32) {
    %c0_i32 = arith.constant 0 : i32
    %c0_i32_0 = arith.constant 0 : i32
    %c0_i32_1 = arith.constant 0 : i32
    return %arg0, %c0_i32, %c0_i32_0 : i32, i32, i32
  }
  func.func @transform_2(%arg0: i32, %arg1: i32) -> (i32, i32, i32) {
    %c0_i32 = arith.constant 0 : i32
    %c0_i32_0 = arith.constant 0 : i32
    %c0_i32_1 = arith.constant 0 : i32
    return %arg0, %c0_i32, %c0_i32_0 : i32, i32, i32
  }
  func.func @transform_3(%arg0: i32, %arg1: i32) -> (i32, i32) {
    %c0_i32 = arith.constant 0 : i32
    %c0_i32_0 = arith.constant 0 : i32
    %c0_i32_1 = arith.constant 0 : i32
    return %c0_i32, %c0_i32_0 : i32, i32
  }
  func.func @transform_4(%arg0: i32, %arg1: i32) -> (i32, i32) {
    %c0_i32 = arith.constant 0 : i32
    %c0_i32_0 = arith.constant 0 : i32
    %c0_i32_1 = arith.constant 0 : i32
    return %c0_i32, %c0_i32_0 : i32, i32
  }
  func.func @transform_5(%arg0: i32, %arg1: i32) -> (i32, i32) {
    %c0_i32 = arith.constant 0 : i32
    %c0_i32_0 = arith.constant 0 : i32
    %c0_i32_1 = arith.constant 0 : i32
    return %c0_i32, %c0_i32_0 : i32, i32
  }
  func.func @transform_6(%arg0: i32, %arg1: i32) -> (i32, i32) {
    %c0_i32 = arith.constant 0 : i32
    %c0_i32_0 = arith.constant 0 : i32
    %c0_i32_1 = arith.constant 0 : i32
    return %c0_i32, %c0_i32_0 : i32, i32
  }
  func.func @transform_7(%arg0: i32, %arg1: i32) -> (i32, i32) {
    %c0_i32 = arith.constant 0 : i32
    %c0_i32_0 = arith.constant 0 : i32
    %c0_i32_1 = arith.constant 0 : i32
    return %c0_i32, %c0_i32_0 : i32, i32
  }
  func.func @transform_8(%arg0: i32, %arg1: i32) -> (i32, i32) {
    %c0_i32 = arith.constant 0 : i32
    %c0_i32_0 = arith.constant 0 : i32
    %c0_i32_1 = arith.constant 0 : i32
    return %c0_i32, %c0_i32_0 : i32, i32
  }
  func.func @transform_9(%arg0: i32, %arg1: i32) -> (i32, i32) {
    %c0_i32 = arith.constant 0 : i32
    %c0_i32_0 = arith.constant 0 : i32
    %c0_i32_1 = arith.constant 0 : i32
    return %c0_i32, %c0_i32_0 : i32, i32
  }
  func.func @transform_10(%arg0: i32, %arg1: i32) -> (i32, i32) {
    %c0_i32 = arith.constant 0 : i32
    %c0_i32_0 = arith.constant 0 : i32
    %c0_i32_1 = arith.constant 0 : i32
    return %c0_i32, %c0_i32_0 : i32, i32
  }
  func.func @transform_11(%arg0: i32, %arg1: i32) -> (i32, i32) {
    %c0_i32 = arith.constant 0 : i32
    %c0_i32_0 = arith.constant 0 : i32
    %c0_i32_1 = arith.constant 0 : i32
    return %c0_i32, %c0_i32_0 : i32, i32
  }
  func.func @transform_12(%arg0: i32, %arg1: i32) -> (i32, i32) {
    %c0_i32 = arith.constant 0 : i32
    %c0_i32_0 = arith.constant 0 : i32
    %c0_i32_1 = arith.constant 0 : i32
    return %c0_i32, %c0_i32_0 : i32, i32
  }
  func.func @transform_13(%arg0: i32, %arg1: i32) -> (i32, i32) {
    %c0_i32 = arith.constant 0 : i32
    %c0_i32_0 = arith.constant 0 : i32
    %c0_i32_1 = arith.constant 0 : i32
    return %c0_i32, %c0_i32_0 : i32, i32
  }
  func.func @transform_14(%arg0: i32, %arg1: i32) -> (i32, i32) {
    %c0_i32 = arith.constant 0 : i32
    %c0_i32_0 = arith.constant 0 : i32
    %c0_i32_1 = arith.constant 0 : i32
    return %c0_i32, %c0_i32_0 : i32, i32
  }
  func.func @transform_15(%arg0: i32, %arg1: i32) -> (i32, i32) {
    %c0_i32 = arith.constant 0 : i32
    %c0_i32_0 = arith.constant 0 : i32
    %c0_i32_1 = arith.constant 0 : i32
    return %c0_i32, %c0_i32_0 : i32, i32
  }
  func.func @transform_16(%arg0: i32, %arg1: i32) -> (i32, i32) {
    %c0_i32 = arith.constant 0 : i32
    %c0_i32_0 = arith.constant 0 : i32
    %c0_i32_1 = arith.constant 0 : i32
    return %c0_i32, %c0_i32_0 : i32, i32
  }
  func.func @transform_17(%arg0: i32, %arg1: i32) -> (i32, i32) {
    %c0_i32 = arith.constant 0 : i32
    %c0_i32_0 = arith.constant 0 : i32
    %c0_i32_1 = arith.constant 0 : i32
    return %c0_i32, %c0_i32_0 : i32, i32
  }
  func.func @transform_18(%arg0: i32, %arg1: i32) -> (i32, i32) {
    %c0_i32 = arith.constant 0 : i32
    %c0_i32_0 = arith.constant 0 : i32
    %c0_i32_1 = arith.constant 0 : i32
    return %c0_i32, %c0_i32_0 : i32, i32
  }
  func.func @transform_19(%arg0: i32, %arg1: i32) -> (i32, i32, i32) {
    %c0_i32 = arith.constant 0 : i32
    %c0_i32_0 = arith.constant 0 : i32
    return %arg0, %arg1, %c0_i32 : i32, i32, i32
  }
}

module attributes {stable_mosaic.version = 11 : i64} {
  func.func @encoder_layer_kernel(%arg0: i32, %arg1: i32, %arg2: memref<1x8x32xf32, #tpu.memory_space<vmem>>, %arg3: memref<1x8x32xbf16, #tpu.memory_space<vmem>>, %arg4: memref<1x1x8xf32, #tpu.memory_space<vmem>>, %arg5: memref<32x64xbf16, #tpu.memory_space<vmem>>, %arg6: memref<1x64xf32, #tpu.memory_space<vmem>>, %arg7: memref<32x32xbf16, #tpu.memory_space<vmem>>, %arg8: memref<1x32xf32, #tpu.memory_space<vmem>>, %arg9: memref<32x32xbf16, #tpu.memory_space<vmem>>, %arg10: memref<1x32xf32, #tpu.memory_space<vmem>>, %arg11: memref<32x64xbf16, #tpu.memory_space<vmem>>, %arg12: memref<1x64xf32, #tpu.memory_space<vmem>>, %arg13: memref<64x32xbf16, #tpu.memory_space<vmem>>, %arg14: memref<1x32xf32, #tpu.memory_space<vmem>>, %arg15: memref<1x32xf32, #tpu.memory_space<vmem>>, %arg16: memref<1x32xf32, #tpu.memory_space<vmem>>, %arg17: memref<1x32xf32, #tpu.memory_space<vmem>>, %arg18: memref<1x32xf32, #tpu.memory_space<vmem>>, %arg19: memref<1x32xf32, #tpu.memory_space<vmem>>, %arg20: memref<1x32xf32, #tpu.memory_space<vmem>>, %arg21: memref<1x8x32xf32, #tpu.memory_space<vmem>>, %arg22: memref<8x32xbf16, #tpu.memory_space<vmem>>, %arg23: memref<8x32xbf16, #tpu.memory_space<vmem>>, %arg24: memref<8x32xbf16, #tpu.memory_space<vmem>>) attributes {dimension_semantics = [#tpu.dimension_semantics<parallel>, #tpu.dimension_semantics<arbitrary>], iteration_bounds = array<i64: 2, 1>, scalar_prefetch = 0 : i64, scratch_operands = 3 : i64, tpu.core_type = #tpu.core_type<tc>, window_params = [{transform_indices = @transform_0, window_bounds = array<i64: 1, 8, 32>}, {transform_indices = @transform_1, window_bounds = array<i64: 1, 8, 32>}, {transform_indices = @transform_2, window_bounds = array<i64: 1, 1, 8>}, {pipeline_mode = #tpu.pipeline_mode<synchronous>, transform_indices = @transform_3, window_bounds = array<i64: 32, 64>}, {pipeline_mode = #tpu.pipeline_mode<synchronous>, transform_indices = @transform_4, window_bounds = array<i64: 1, 64>}, {pipeline_mode = #tpu.pipeline_mode<synchronous>, transform_indices = @transform_5, window_bounds = array<i64: 32, 32>}, {pipeline_mode = #tpu.pipeline_mode<synchronous>, transform_indices = @transform_6, window_bounds = array<i64: 1, 32>}, {pipeline_mode = #tpu.pipeline_mode<synchronous>, transform_indices = @transform_7, window_bounds = array<i64: 32, 32>}, {pipeline_mode = #tpu.pipeline_mode<synchronous>, transform_indices = @transform_8, window_bounds = array<i64: 1, 32>}, {pipeline_mode = #tpu.pipeline_mode<synchronous>, transform_indices = @transform_9, window_bounds = array<i64: 32, 64>}, {pipeline_mode = #tpu.pipeline_mode<synchronous>, transform_indices = @transform_10, window_bounds = array<i64: 1, 64>}, {pipeline_mode = #tpu.pipeline_mode<synchronous>, transform_indices = @transform_11, window_bounds = array<i64: 64, 32>}, {pipeline_mode = #tpu.pipeline_mode<synchronous>, transform_indices = @transform_12, window_bounds = array<i64: 1, 32>}, {pipeline_mode = #tpu.pipeline_mode<synchronous>, transform_indices = @transform_13, window_bounds = array<i64: 1, 32>}, {pipeline_mode = #tpu.pipeline_mode<synchronous>, transform_indices = @transform_14, window_bounds = array<i64: 1, 32>}, {pipeline_mode = #tpu.pipeline_mode<synchronous>, transform_indices = @transform_15, window_bounds = array<i64: 1, 32>}, {pipeline_mode = #tpu.pipeline_mode<synchronous>, transform_indices = @transform_16, window_bounds = array<i64: 1, 32>}, {pipeline_mode = #tpu.pipeline_mode<synchronous>, transform_indices = @transform_17, window_bounds = array<i64: 1, 32>}, {pipeline_mode = #tpu.pipeline_mode<synchronous>, transform_indices = @transform_18, window_bounds = array<i64: 1, 32>}, {transform_indices = @transform_19, window_bounds = array<i64: 1, 8, 32>}]} {
    %c0_i32 = arith.constant 0 : i32
    %0 = arith.cmpi eq, %arg1, %c0_i32 : i32
    %1 = arith.extui %0 : i1 to i32
    %c0_i32_0 = arith.constant 0 : i32
    %2 = arith.cmpi ne, %1, %c0_i32_0 : i32
    scf.if %2 {
      %c0_62 = arith.constant 0 : index
      %c0_63 = arith.constant 0 : index
      %c0_64 = arith.constant 0 : index
      %172 = vector.load %arg2[%c0_62, %c0_63, %c0_64] : memref<1x8x32xf32, #tpu.memory_space<vmem>>, vector<1x8x32xf32>
      %173 = vector.shape_cast %172 : vector<1x8x32xf32> to vector<8x32xf32>
      %c0_65 = arith.constant 0 : index
      %c0_66 = arith.constant 0 : index
      %c0_67 = arith.constant 0 : index
      %174 = vector.load %arg3[%c0_65, %c0_66, %c0_67] : memref<1x8x32xbf16, #tpu.memory_space<vmem>>, vector<1x8x32xbf16>
      %175 = vector.shape_cast %174 : vector<1x8x32xbf16> to vector<8x32xbf16>
      %176 = arith.extf %175 : vector<8x32xbf16> to vector<8x32xf32>
      %177 = arith.addf %173, %176 : vector<8x32xf32>
      %178 = arith.truncf %177 : vector<8x32xf32> to vector<8x32xbf16>
      %c0_68 = arith.constant 0 : index
      %c0_69 = arith.constant 0 : index
      %179 = vector.load %arg5[%c0_68, %c0_69] : memref<32x64xbf16, #tpu.memory_space<vmem>>, vector<32x64xbf16>
      %cst_70 = arith.constant dense<0.000000e+00> : vector<8x64xf32>
      %180 = tpu.matmul %178, %179, %cst_70 {dimension_numbers = #tpu.dot_dimension_numbers<[1], [0], [0], [1], [0, 0, 1, 1], [], []>} : vector<8x32xbf16>, vector<32x64xbf16>, vector<8x64xf32> -> vector<8x64xf32>
      %c0_71 = arith.constant 0 : index
      %c0_72 = arith.constant 0 : index
      %181 = vector.load %arg6[%c0_71, %c0_72] : memref<1x64xf32, #tpu.memory_space<vmem>>, vector<1x64xf32>
      %182 = vector.shape_cast %181 : vector<1x64xf32> to vector<64xf32>
      %183 = vector.shape_cast %182 : vector<64xf32> to vector<1x64xf32>
      %184 = vector.broadcast %183 : vector<1x64xf32> to vector<8x64xf32>
      %185 = arith.addf %180, %184 : vector<8x64xf32>
      %186 = vector.extract_strided_slice %185 {offsets = [0, 0], sizes = [8, 32], strides = [1, 1]} : vector<8x64xf32> to vector<8x32xf32>
      %cst_73 = arith.constant 0.353553385 : f32
      %187 = vector.broadcast %cst_73 : f32 to vector<8x32xf32>
      %188 = arith.mulf %186, %187 : vector<8x32xf32>
      %189 = arith.truncf %188 : vector<8x32xf32> to vector<8x32xbf16>
      %c0_74 = arith.constant 0 : index
      %c0_75 = arith.constant 0 : index
      %190 = vector.load %arg22[%c0_74, %c0_75] : memref<8x32xbf16, #tpu.memory_space<vmem>>, vector<8x32xbf16>
      tpu.vector_store %arg22[%c0_74, %c0_75], %189 {strides = array<i32>} : memref<8x32xbf16, #tpu.memory_space<vmem>>, vector<8x32xbf16>,
      %191 = vector.extract_strided_slice %185 {offsets = [0, 32], sizes = [8, 32], strides = [1, 1]} : vector<8x64xf32> to vector<8x32xf32>
      %192 = arith.truncf %191 : vector<8x32xf32> to vector<8x32xbf16>
      %c0_76 = arith.constant 0 : index
      %c0_77 = arith.constant 0 : index
      %193 = vector.load %arg23[%c0_76, %c0_77] : memref<8x32xbf16, #tpu.memory_space<vmem>>, vector<8x32xbf16>
      tpu.vector_store %arg23[%c0_76, %c0_77], %192 {strides = array<i32>} : memref<8x32xbf16, #tpu.memory_space<vmem>>, vector<8x32xbf16>,
      %194 = arith.truncf %173 : vector<8x32xf32> to vector<8x32xbf16>
      %c0_78 = arith.constant 0 : index
      %c0_79 = arith.constant 0 : index
      %195 = vector.load %arg7[%c0_78, %c0_79] : memref<32x32xbf16, #tpu.memory_space<vmem>>, vector<32x32xbf16>
      %cst_80 = arith.constant dense<0.000000e+00> : vector<8x32xf32>
      %196 = tpu.matmul %194, %195, %cst_80 {dimension_numbers = #tpu.dot_dimension_numbers<[1], [0], [0], [1], [0, 0, 1, 1], [], []>} : vector<8x32xbf16>, vector<32x32xbf16>, vector<8x32xf32> -> vector<8x32xf32>
      %c0_81 = arith.constant 0 : index
      %c0_82 = arith.constant 0 : index
      %197 = vector.load %arg8[%c0_81, %c0_82] : memref<1x32xf32, #tpu.memory_space<vmem>>, vector<1x32xf32>
      %198 = vector.shape_cast %197 : vector<1x32xf32> to vector<32xf32>
      %199 = vector.shape_cast %198 : vector<32xf32> to vector<1x32xf32>
      %200 = vector.broadcast %199 : vector<1x32xf32> to vector<8x32xf32>
      %201 = arith.addf %196, %200 : vector<8x32xf32>
      %202 = arith.truncf %201 : vector<8x32xf32> to vector<8x32xbf16>
      %c0_83 = arith.constant 0 : index
      %c0_84 = arith.constant 0 : index
      %203 = vector.load %arg24[%c0_83, %c0_84] : memref<8x32xbf16, #tpu.memory_space<vmem>>, vector<8x32xbf16>
      tpu.vector_store %arg24[%c0_83, %c0_84], %202 {strides = array<i32>} : memref<8x32xbf16, #tpu.memory_space<vmem>>, vector<8x32xbf16>,
    } else {
    }
    %c8_i32 = arith.constant 8 : i32
    %3 = arith.muli %arg1, %c8_i32 : i32
    %4 = tpu.assume_multiple %3, 8 : i32
    %c0 = arith.constant 0 : index
    %5 = arith.index_cast %4 : i32 to index
    %c0_1 = arith.constant 0 : index
    %6 = vector.load %arg2[%c0, %5, %c0_1] : memref<1x8x32xf32, #tpu.memory_space<vmem>>, vector<1x8x32xf32>
    %7 = vector.shape_cast %6 : vector<1x8x32xf32> to vector<8x32xf32>
    %8 = arith.index_cast %4 : i32 to index
    %c0_2 = arith.constant 0 : index
    %9 = vector.load %arg22[%8, %c0_2] : memref<8x32xbf16, #tpu.memory_space<vmem>>, vector<8x32xbf16>
    %c0_3 = arith.constant 0 : index
    %c0_4 = arith.constant 0 : index
    %10 = vector.load %arg23[%c0_3, %c0_4] : memref<8x32xbf16, #tpu.memory_space<vmem>>, vector<8x32xbf16>
    %c0_5 = arith.constant 0 : index
    %c0_6 = arith.constant 0 : index
    %11 = vector.load %arg24[%c0_5, %c0_6] : memref<8x32xbf16, #tpu.memory_space<vmem>>, vector<8x32xbf16>
    %c0_7 = arith.constant 0 : index
    %c0_8 = arith.constant 0 : index
    %c0_9 = arith.constant 0 : index
    %12 = vector.load %arg4[%c0_7, %c0_8, %c0_9] : memref<1x1x8xf32, #tpu.memory_space<vmem>>, vector<1x1x8xf32>
    %13 = vector.shape_cast %12 : vector<1x1x8xf32> to vector<1x8xf32>
    %14 = vector.shape_cast %13 : vector<1x8xf32> to vector<1x8xf32>
    %15 = vector.broadcast %14 : vector<1x8xf32> to vector<8x8xf32>
    %16 = vector.extract_strided_slice %9 {offsets = [0, 0], sizes = [8, 8], strides = [1, 1]} : vector<8x32xbf16> to vector<8x8xbf16>
    %17 = vector.extract_strided_slice %10 {offsets = [0, 0], sizes = [8, 8], strides = [1, 1]} : vector<8x32xbf16> to vector<8x8xbf16>
    %cst = arith.constant dense<0.000000e+00> : vector<8x8xf32>
    %18 = tpu.matmul %16, %17, %cst {dimension_numbers = #tpu.dot_dimension_numbers<[1], [1], [0], [0], [0, 0, 1, 0], [], []>} : vector<8x8xbf16>, vector<8x8xbf16>, vector<8x8xf32> -> vector<8x8xf32>
    %19 = arith.addf %18, %15 : vector<8x8xf32>
    %cst_10 = arith.constant dense<0xFF800000> : vector<8xf32>
    %20 = vector.multi_reduction <maximumf>, %19, %cst_10 [1] : vector<8x8xf32> to vector<8xf32>
    %21 = vector.shape_cast %20 : vector<8xf32> to vector<8x1xf32>
    %22 = vector.broadcast %21 : vector<8x1xf32> to vector<8x8xf32>
    %23 = arith.subf %19, %22 : vector<8x8xf32>
    %24 = math.exp %23 : vector<8x8xf32>
    %cst_11 = arith.constant dense<0.000000e+00> : vector<8xf32>
    %25 = vector.multi_reduction <add>, %24, %cst_11 [1] : vector<8x8xf32> to vector<8xf32>
    %26 = vector.shape_cast %25 : vector<8xf32> to vector<8x1xf32>
    %27 = tpu.reciprocal %26 : vector<8x1xf32> -> vector<8x1xf32>
    %28 = vector.broadcast %27 : vector<8x1xf32> to vector<8x8xf32>
    %29 = arith.mulf %24, %28 : vector<8x8xf32>
    %30 = arith.truncf %29 : vector<8x8xf32> to vector<8x8xbf16>
    %31 = vector.extract_strided_slice %11 {offsets = [0, 0], sizes = [8, 8], strides = [1, 1]} : vector<8x32xbf16> to vector<8x8xbf16>
    %cst_12 = arith.constant dense<0.000000e+00> : vector<8x8xf32>
    %32 = tpu.matmul %30, %31, %cst_12 {dimension_numbers = #tpu.dot_dimension_numbers<[1], [0], [0], [1], [0, 0, 1, 1], [], []>} : vector<8x8xbf16>, vector<8x8xbf16>, vector<8x8xf32> -> vector<8x8xf32>
    %33 = vector.extract_strided_slice %9 {offsets = [0, 8], sizes = [8, 8], strides = [1, 1]} : vector<8x32xbf16> to vector<8x8xbf16>
    %34 = vector.extract_strided_slice %10 {offsets = [0, 8], sizes = [8, 8], strides = [1, 1]} : vector<8x32xbf16> to vector<8x8xbf16>
    %cst_13 = arith.constant dense<0.000000e+00> : vector<8x8xf32>
    %35 = tpu.matmul %33, %34, %cst_13 {dimension_numbers = #tpu.dot_dimension_numbers<[1], [1], [0], [0], [0, 0, 1, 0], [], []>} : vector<8x8xbf16>, vector<8x8xbf16>, vector<8x8xf32> -> vector<8x8xf32>
    %36 = arith.addf %35, %15 : vector<8x8xf32>
    %cst_14 = arith.constant dense<0xFF800000> : vector<8xf32>
    %37 = vector.multi_reduction <maximumf>, %36, %cst_14 [1] : vector<8x8xf32> to vector<8xf32>
    %38 = vector.shape_cast %37 : vector<8xf32> to vector<8x1xf32>
    %39 = vector.broadcast %38 : vector<8x1xf32> to vector<8x8xf32>
    %40 = arith.subf %36, %39 : vector<8x8xf32>
    %41 = math.exp %40 : vector<8x8xf32>
    %cst_15 = arith.constant dense<0.000000e+00> : vector<8xf32>
    %42 = vector.multi_reduction <add>, %41, %cst_15 [1] : vector<8x8xf32> to vector<8xf32>
    %43 = vector.shape_cast %42 : vector<8xf32> to vector<8x1xf32>
    %44 = tpu.reciprocal %43 : vector<8x1xf32> -> vector<8x1xf32>
    %45 = vector.broadcast %44 : vector<8x1xf32> to vector<8x8xf32>
    %46 = arith.mulf %41, %45 : vector<8x8xf32>
    %47 = arith.truncf %46 : vector<8x8xf32> to vector<8x8xbf16>
    %48 = vector.extract_strided_slice %11 {offsets = [0, 8], sizes = [8, 8], strides = [1, 1]} : vector<8x32xbf16> to vector<8x8xbf16>
    %cst_16 = arith.constant dense<0.000000e+00> : vector<8x8xf32>
    %49 = tpu.matmul %47, %48, %cst_16 {dimension_numbers = #tpu.dot_dimension_numbers<[1], [0], [0], [1], [0, 0, 1, 1], [], []>} : vector<8x8xbf16>, vector<8x8xbf16>, vector<8x8xf32> -> vector<8x8xf32>
    %50 = vector.extract_strided_slice %9 {offsets = [0, 16], sizes = [8, 8], strides = [1, 1]} : vector<8x32xbf16> to vector<8x8xbf16>
    %51 = vector.extract_strided_slice %10 {offsets = [0, 16], sizes = [8, 8], strides = [1, 1]} : vector<8x32xbf16> to vector<8x8xbf16>
    %cst_17 = arith.constant dense<0.000000e+00> : vector<8x8xf32>
    %52 = tpu.matmul %50, %51, %cst_17 {dimension_numbers = #tpu.dot_dimension_numbers<[1], [1], [0], [0], [0, 0, 1, 0], [], []>} : vector<8x8xbf16>, vector<8x8xbf16>, vector<8x8xf32> -> vector<8x8xf32>
    %53 = arith.addf %52, %15 : vector<8x8xf32>
    %cst_18 = arith.constant dense<0xFF800000> : vector<8xf32>
    %54 = vector.multi_reduction <maximumf>, %53, %cst_18 [1] : vector<8x8xf32> to vector<8xf32>
    %55 = vector.shape_cast %54 : vector<8xf32> to vector<8x1xf32>
    %56 = vector.broadcast %55 : vector<8x1xf32> to vector<8x8xf32>
    %57 = arith.subf %53, %56 : vector<8x8xf32>
    %58 = math.exp %57 : vector<8x8xf32>
    %cst_19 = arith.constant dense<0.000000e+00> : vector<8xf32>
    %59 = vector.multi_reduction <add>, %58, %cst_19 [1] : vector<8x8xf32> to vector<8xf32>
    %60 = vector.shape_cast %59 : vector<8xf32> to vector<8x1xf32>
    %61 = tpu.reciprocal %60 : vector<8x1xf32> -> vector<8x1xf32>
    %62 = vector.broadcast %61 : vector<8x1xf32> to vector<8x8xf32>
    %63 = arith.mulf %58, %62 : vector<8x8xf32>
    %64 = arith.truncf %63 : vector<8x8xf32> to vector<8x8xbf16>
    %65 = vector.extract_strided_slice %11 {offsets = [0, 16], sizes = [8, 8], strides = [1, 1]} : vector<8x32xbf16> to vector<8x8xbf16>
    %cst_20 = arith.constant dense<0.000000e+00> : vector<8x8xf32>
    %66 = tpu.matmul %64, %65, %cst_20 {dimension_numbers = #tpu.dot_dimension_numbers<[1], [0], [0], [1], [0, 0, 1, 1], [], []>} : vector<8x8xbf16>, vector<8x8xbf16>, vector<8x8xf32> -> vector<8x8xf32>
    %67 = vector.extract_strided_slice %9 {offsets = [0, 24], sizes = [8, 8], strides = [1, 1]} : vector<8x32xbf16> to vector<8x8xbf16>
    %68 = vector.extract_strided_slice %10 {offsets = [0, 24], sizes = [8, 8], strides = [1, 1]} : vector<8x32xbf16> to vector<8x8xbf16>
    %cst_21 = arith.constant dense<0.000000e+00> : vector<8x8xf32>
    %69 = tpu.matmul %67, %68, %cst_21 {dimension_numbers = #tpu.dot_dimension_numbers<[1], [1], [0], [0], [0, 0, 1, 0], [], []>} : vector<8x8xbf16>, vector<8x8xbf16>, vector<8x8xf32> -> vector<8x8xf32>
    %70 = arith.addf %69, %15 : vector<8x8xf32>
    %cst_22 = arith.constant dense<0xFF800000> : vector<8xf32>
    %71 = vector.multi_reduction <maximumf>, %70, %cst_22 [1] : vector<8x8xf32> to vector<8xf32>
    %72 = vector.shape_cast %71 : vector<8xf32> to vector<8x1xf32>
    %73 = vector.broadcast %72 : vector<8x1xf32> to vector<8x8xf32>
    %74 = arith.subf %70, %73 : vector<8x8xf32>
    %75 = math.exp %74 : vector<8x8xf32>
    %cst_23 = arith.constant dense<0.000000e+00> : vector<8xf32>
    %76 = vector.multi_reduction <add>, %75, %cst_23 [1] : vector<8x8xf32> to vector<8xf32>
    %77 = vector.shape_cast %76 : vector<8xf32> to vector<8x1xf32>
    %78 = tpu.reciprocal %77 : vector<8x1xf32> -> vector<8x1xf32>
    %79 = vector.broadcast %78 : vector<8x1xf32> to vector<8x8xf32>
    %80 = arith.mulf %75, %79 : vector<8x8xf32>
    %81 = arith.truncf %80 : vector<8x8xf32> to vector<8x8xbf16>
    %82 = vector.extract_strided_slice %11 {offsets = [0, 24], sizes = [8, 8], strides = [1, 1]} : vector<8x32xbf16> to vector<8x8xbf16>
    %cst_24 = arith.constant dense<0.000000e+00> : vector<8x8xf32>
    %83 = tpu.matmul %81, %82, %cst_24 {dimension_numbers = #tpu.dot_dimension_numbers<[1], [0], [0], [1], [0, 0, 1, 1], [], []>} : vector<8x8xbf16>, vector<8x8xbf16>, vector<8x8xf32> -> vector<8x8xf32>
    %84 = tpu.concatenate %32, %49, %66, %83 in 1 : vector<8x8xf32>, vector<8x8xf32>, vector<8x8xf32>, vector<8x8xf32> -> vector<8x32xf32>
    %85 = arith.truncf %84 : vector<8x32xf32> to vector<8x32xbf16>
    %c0_25 = arith.constant 0 : index
    %c0_26 = arith.constant 0 : index
    %86 = vector.load %arg9[%c0_25, %c0_26] : memref<32x32xbf16, #tpu.memory_space<vmem>>, vector<32x32xbf16>
    %cst_27 = arith.constant dense<0.000000e+00> : vector<8x32xf32>
    %87 = tpu.matmul %85, %86, %cst_27 {dimension_numbers = #tpu.dot_dimension_numbers<[1], [0], [0], [1], [0, 0, 1, 1], [], []>} : vector<8x32xbf16>, vector<32x32xbf16>, vector<8x32xf32> -> vector<8x32xf32>
    %c0_28 = arith.constant 0 : index
    %c0_29 = arith.constant 0 : index
    %88 = vector.load %arg10[%c0_28, %c0_29] : memref<1x32xf32, #tpu.memory_space<vmem>>, vector<1x32xf32>
    %89 = vector.shape_cast %88 : vector<1x32xf32> to vector<32xf32>
    %90 = vector.shape_cast %89 : vector<32xf32> to vector<1x32xf32>
    %91 = vector.broadcast %90 : vector<1x32xf32> to vector<8x32xf32>
    %92 = arith.addf %87, %91 : vector<8x32xf32>
    %93 = arith.addf %7, %92 : vector<8x32xf32>
    %c0_30 = arith.constant 0 : index
    %c0_31 = arith.constant 0 : index
    %94 = vector.load %arg15[%c0_30, %c0_31] : memref<1x32xf32, #tpu.memory_space<vmem>>, vector<1x32xf32>
    %95 = vector.shape_cast %94 : vector<1x32xf32> to vector<32xf32>
    %c0_32 = arith.constant 0 : index
    %c0_33 = arith.constant 0 : index
    %96 = vector.load %arg16[%c0_32, %c0_33] : memref<1x32xf32, #tpu.memory_space<vmem>>, vector<1x32xf32>
    %97 = vector.shape_cast %96 : vector<1x32xf32> to vector<32xf32>
    %cst_34 = arith.constant dense<0.000000e+00> : vector<8xf32>
    %98 = vector.multi_reduction <add>, %93, %cst_34 [1] : vector<8x32xf32> to vector<8xf32>
    %99 = vector.shape_cast %98 : vector<8xf32> to vector<8x1xf32>
    %cst_35 = arith.constant 3.200000e+01 : f32
    %100 = vector.broadcast %cst_35 : f32 to vector<8x1xf32>
    %101 = arith.divf %99, %100 : vector<8x1xf32>
    %102 = vector.broadcast %101 : vector<8x1xf32> to vector<8x32xf32>
    %103 = arith.subf %93, %102 : vector<8x32xf32>
    %104 = arith.mulf %103, %103 : vector<8x32xf32>
    %cst_36 = arith.constant dense<0.000000e+00> : vector<8xf32>
    %105 = vector.multi_reduction <add>, %104, %cst_36 [1] : vector<8x32xf32> to vector<8xf32>
    %106 = vector.shape_cast %105 : vector<8xf32> to vector<8x1xf32>
    %cst_37 = arith.constant 3.200000e+01 : f32
    %107 = vector.broadcast %cst_37 : f32 to vector<8x1xf32>
    %108 = arith.divf %106, %107 : vector<8x1xf32>
    %109 = vector.broadcast %101 : vector<8x1xf32> to vector<8x32xf32>
    %110 = arith.subf %93, %109 : vector<8x32xf32>
    %cst_38 = arith.constant 9.99999974E-6 : f32
    %111 = vector.broadcast %cst_38 : f32 to vector<8x1xf32>
    %112 = arith.addf %108, %111 : vector<8x1xf32>
    %113 = math.rsqrt %112 : vector<8x1xf32>
    %114 = vector.broadcast %113 : vector<8x1xf32> to vector<8x32xf32>
    %115 = arith.mulf %110, %114 : vector<8x32xf32>
    %116 = vector.shape_cast %95 : vector<32xf32> to vector<1x32xf32>
    %117 = vector.broadcast %116 : vector<1x32xf32> to vector<8x32xf32>
    %118 = arith.mulf %115, %117 : vector<8x32xf32>
    %119 = vector.shape_cast %97 : vector<32xf32> to vector<1x32xf32>
    %120 = vector.broadcast %119 : vector<1x32xf32> to vector<8x32xf32>
    %121 = arith.addf %118, %120 : vector<8x32xf32>
    %122 = arith.truncf %121 : vector<8x32xf32> to vector<8x32xbf16>
    %c0_39 = arith.constant 0 : index
    %c0_40 = arith.constant 0 : index
    %123 = vector.load %arg11[%c0_39, %c0_40] : memref<32x64xbf16, #tpu.memory_space<vmem>>, vector<32x64xbf16>
    %cst_41 = arith.constant dense<0.000000e+00> : vector<8x64xf32>
    %124 = tpu.matmul %122, %123, %cst_41 {dimension_numbers = #tpu.dot_dimension_numbers<[1], [0], [0], [1], [0, 0, 1, 1], [], []>} : vector<8x32xbf16>, vector<32x64xbf16>, vector<8x64xf32> -> vector<8x64xf32>
    %c0_42 = arith.constant 0 : index
    %c0_43 = arith.constant 0 : index
    %125 = vector.load %arg12[%c0_42, %c0_43] : memref<1x64xf32, #tpu.memory_space<vmem>>, vector<1x64xf32>
    %126 = vector.shape_cast %125 : vector<1x64xf32> to vector<64xf32>
    %127 = vector.shape_cast %126 : vector<64xf32> to vector<1x64xf32>
    %128 = vector.broadcast %127 : vector<1x64xf32> to vector<8x64xf32>
    %129 = arith.addf %124, %128 : vector<8x64xf32>
    %cst_44 = arith.constant 0.000000e+00 : f32
    %130 = vector.broadcast %cst_44 : f32 to vector<8x64xf32>
    %131 = arith.maximumf %129, %130 : vector<8x64xf32>
    %132 = arith.truncf %131 : vector<8x64xf32> to vector<8x64xbf16>
    %c0_45 = arith.constant 0 : index
    %c0_46 = arith.constant 0 : index
    %133 = vector.load %arg13[%c0_45, %c0_46] : memref<64x32xbf16, #tpu.memory_space<vmem>>, vector<64x32xbf16>
    %cst_47 = arith.constant dense<0.000000e+00> : vector<8x32xf32>
    %134 = tpu.matmul %132, %133, %cst_47 {dimension_numbers = #tpu.dot_dimension_numbers<[1], [0], [0], [1], [0, 0, 1, 1], [], []>} : vector<8x64xbf16>, vector<64x32xbf16>, vector<8x32xf32> -> vector<8x32xf32>
    %c0_48 = arith.constant 0 : index
    %c0_49 = arith.constant 0 : index
    %135 = vector.load %arg14[%c0_48, %c0_49] : memref<1x32xf32, #tpu.memory_space<vmem>>, vector<1x32xf32>
    %136 = vector.shape_cast %135 : vector<1x32xf32> to vector<32xf32>
    %137 = vector.shape_cast %136 : vector<32xf32> to vector<1x32xf32>
    %138 = vector.broadcast %137 : vector<1x32xf32> to vector<8x32xf32>
    %139 = arith.addf %134, %138 : vector<8x32xf32>
    %140 = arith.addf %121, %139 : vector<8x32xf32>
    %c0_50 = arith.constant 0 : index
    %c0_51 = arith.constant 0 : index
    %141 = vector.load %arg17[%c0_50, %c0_51] : memref<1x32xf32, #tpu.memory_space<vmem>>, vector<1x32xf32>
    %142 = vector.shape_cast %141 : vector<1x32xf32> to vector<32xf32>
    %c0_52 = arith.constant 0 : index
    %c0_53 = arith.constant 0 : index
    %143 = vector.load %arg18[%c0_52, %c0_53] : memref<1x32xf32, #tpu.memory_space<vmem>>, vector<1x32xf32>
    %144 = vector.shape_cast %143 : vector<1x32xf32> to vector<32xf32>
    %cst_54 = arith.constant dense<0.000000e+00> : vector<8xf32>
    %145 = vector.multi_reduction <add>, %140, %cst_54 [1] : vector<8x32xf32> to vector<8xf32>
    %146 = vector.shape_cast %145 : vector<8xf32> to vector<8x1xf32>
    %cst_55 = arith.constant 3.200000e+01 : f32
    %147 = vector.broadcast %cst_55 : f32 to vector<8x1xf32>
    %148 = arith.divf %146, %147 : vector<8x1xf32>
    %149 = vector.broadcast %148 : vector<8x1xf32> to vector<8x32xf32>
    %150 = arith.subf %140, %149 : vector<8x32xf32>
    %151 = arith.mulf %150, %150 : vector<8x32xf32>
    %cst_56 = arith.constant dense<0.000000e+00> : vector<8xf32>
    %152 = vector.multi_reduction <add>, %151, %cst_56 [1] : vector<8x32xf32> to vector<8xf32>
    %153 = vector.shape_cast %152 : vector<8xf32> to vector<8x1xf32>
    %cst_57 = arith.constant 3.200000e+01 : f32
    %154 = vector.broadcast %cst_57 : f32 to vector<8x1xf32>
    %155 = arith.divf %153, %154 : vector<8x1xf32>
    %156 = vector.broadcast %148 : vector<8x1xf32> to vector<8x32xf32>
    %157 = arith.subf %140, %156 : vector<8x32xf32>
    %cst_58 = arith.constant 9.99999974E-6 : f32
    %158 = vector.broadcast %cst_58 : f32 to vector<8x1xf32>
    %159 = arith.addf %155, %158 : vector<8x1xf32>
    %160 = math.rsqrt %159 : vector<8x1xf32>
    %161 = vector.broadcast %160 : vector<8x1xf32> to vector<8x32xf32>
    %162 = arith.mulf %157, %161 : vector<8x32xf32>
    %163 = vector.shape_cast %142 : vector<32xf32> to vector<1x32xf32>
    %164 = vector.broadcast %163 : vector<1x32xf32> to vector<8x32xf32>
    %165 = arith.mulf %162, %164 : vector<8x32xf32>
    %166 = vector.shape_cast %144 : vector<32xf32> to vector<1x32xf32>
    %167 = vector.broadcast %166 : vector<1x32xf32> to vector<8x32xf32>
    %168 = arith.addf %165, %167 : vector<8x32xf32>
    %c0_59 = arith.constant 0 : index
    %c0_60 = arith.constant 0 : index
    %c0_61 = arith.constant 0 : index
    %169 = vector.load %arg21[%c0_59, %c0_60, %c0_61] : memref<1x8x32xf32, #tpu.memory_space<vmem>>, vector<1x8x32xf32>
    %170 = vector.shape_cast %169 : vector<1x8x32xf32> to vector<8x32xf32>
    %171 = vector.shape_cast %168 : vector<8x32xf32> to vector<1x8x32xf32>
    tpu.vector_store %arg21[%c0_59, %c0_60, %c0_61], %171 {strides = array<i32>} : memref<1x8x32xf32, #tpu.memory_space<vmem>>, vector<1x8x32xf32>,
    return
  }
  func.func @transform_0(%arg0: i32, %arg1: i32) -> (i32, i32, i32) {
    %c0_i32 = arith.constant 0 : i32
    %c0_i32_0 = arith.constant 0 : i32
    %c0_i32_1 = arith.constant 0 : i32
    return %arg0, %c0_i32, %c0_i32_0 : i32, i32, i32
  }
  func.func @transform_1(%arg0: i32, %arg1: i32) -> (i32, i32, i32) {
    %c0_i32 = arith.constant 0 : i32
    %c0_i32_0 = arith.constant 0 : i32
    %c0_i32_1 = arith.constant 0 : i32
    return %arg0, %c0_i32, %c0_i32_0 : i32, i32, i32
  }
  func.func @transform_2(%arg0: i32, %arg1: i32) -> (i32, i32, i32) {
    %c0_i32 = arith.constant 0 : i32
    %c0_i32_0 = arith.constant 0 : i32
    %c0_i32_1 = arith.constant 0 : i32
    return %arg0, %c0_i32, %c0_i32_0 : i32, i32, i32
  }
  func.func @transform_3(%arg0: i32, %arg1: i32) -> (i32, i32) {
    %c0_i32 = arith.constant 0 : i32
    %c0_i32_0 = arith.constant 0 : i32
    %c0_i32_1 = arith.constant 0 : i32
    return %c0_i32, %c0_i32_0 : i32, i32
  }
  func.func @transform_4(%arg0: i32, %arg1: i32) -> (i32, i32) {
    %c0_i32 = arith.constant 0 : i32
    %c0_i32_0 = arith.constant 0 : i32
    %c0_i32_1 = arith.constant 0 : i32
    return %c0_i32, %c0_i32_0 : i32, i32
  }
  func.func @transform_5(%arg0: i32, %arg1: i32) -> (i32, i32) {
    %c0_i32 = arith.constant 0 : i32
    %c0_i32_0 = arith.constant 0 : i32
    %c0_i32_1 = arith.constant 0 : i32
    return %c0_i32, %c0_i32_0 : i32, i32
  }
  func.func @transform_6(%arg0: i32, %arg1: i32) -> (i32, i32) {
    %c0_i32 = arith.constant 0 : i32
    %c0_i32_0 = arith.constant 0 : i32
    %c0_i32_1 = arith.constant 0 : i32
    return %c0_i32, %c0_i32_0 : i32, i32
  }
  func.func @transform_7(%arg0: i32, %arg1: i32) -> (i32, i32) {
    %c0_i32 = arith.constant 0 : i32
    %c0_i32_0 = arith.constant 0 : i32
    %c0_i32_1 = arith.constant 0 : i32
    return %c0_i32, %c0_i32_0 : i32, i32
  }
  func.func @transform_8(%arg0: i32, %arg1: i32) -> (i32, i32) {
    %c0_i32 = arith.constant 0 : i32
    %c0_i32_0 = arith.constant 0 : i32
    %c0_i32_1 = arith.constant 0 : i32
    return %c0_i32, %c0_i32_0 : i32, i32
  }
  func.func @transform_9(%arg0: i32, %arg1: i32) -> (i32, i32) {
    %c0_i32 = arith.constant 0 : i32
    %c0_i32_0 = arith.constant 0 : i32
    %c0_i32_1 = arith.constant 0 : i32
    return %c0_i32, %c0_i32_0 : i32, i32
  }
  func.func @transform_10(%arg0: i32, %arg1: i32) -> (i32, i32) {
    %c0_i32 = arith.constant 0 : i32
    %c0_i32_0 = arith.constant 0 : i32
    %c0_i32_1 = arith.constant 0 : i32
    return %c0_i32, %c0_i32_0 : i32, i32
  }
  func.func @transform_11(%arg0: i32, %arg1: i32) -> (i32, i32) {
    %c0_i32 = arith.constant 0 : i32
    %c0_i32_0 = arith.constant 0 : i32
    %c0_i32_1 = arith.constant 0 : i32
    return %c0_i32, %c0_i32_0 : i32, i32
  }
  func.func @transform_12(%arg0: i32, %arg1: i32) -> (i32, i32) {
    %c0_i32 = arith.constant 0 : i32
    %c0_i32_0 = arith.constant 0 : i32
    %c0_i32_1 = arith.constant 0 : i32
    return %c0_i32, %c0_i32_0 : i32, i32
  }
  func.func @transform_13(%arg0: i32, %arg1: i32) -> (i32, i32) {
    %c0_i32 = arith.constant 0 : i32
    %c0_i32_0 = arith.constant 0 : i32
    %c0_i32_1 = arith.constant 0 : i32
    return %c0_i32, %c0_i32_0 : i32, i32
  }
  func.func @transform_14(%arg0: i32, %arg1: i32) -> (i32, i32) {
    %c0_i32 = arith.constant 0 : i32
    %c0_i32_0 = arith.constant 0 : i32
    %c0_i32_1 = arith.constant 0 : i32
    return %c0_i32, %c0_i32_0 : i32, i32
  }
  func.func @transform_15(%arg0: i32, %arg1: i32) -> (i32, i32) {
    %c0_i32 = arith.constant 0 : i32
    %c0_i32_0 = arith.constant 0 : i32
    %c0_i32_1 = arith.constant 0 : i32
    return %c0_i32, %c0_i32_0 : i32, i32
  }
  func.func @transform_16(%arg0: i32, %arg1: i32) -> (i32, i32) {
    %c0_i32 = arith.constant 0 : i32
    %c0_i32_0 = arith.constant 0 : i32
    %c0_i32_1 = arith.constant 0 : i32
    return %c0_i32, %c0_i32_0 : i32, i32
  }
  func.func @transform_17(%arg0: i32, %arg1: i32) -> (i32, i32) {
    %c0_i32 = arith.constant 0 : i32
    %c0_i32_0 = arith.constant 0 : i32
    %c0_i32_1 = arith.constant 0 : i32
    return %c0_i32, %c0_i32_0 : i32, i32
  }
  func.func @transform_18(%arg0: i32, %arg1: i32) -> (i32, i32) {
    %c0_i32 = arith.constant 0 : i32
    %c0_i32_0 = arith.constant 0 : i32
    %c0_i32_1 = arith.constant 0 : i32
    return %c0_i32, %c0_i32_0 : i32, i32
  }
  func.func @transform_19(%arg0: i32, %arg1: i32) -> (i32, i32, i32) {
    %c0_i32 = arith.constant 0 : i32
    %c0_i32_0 = arith.constant 0 : i32
    return %arg0, %arg1, %c0_i32 : i32, i32, i32
  }
}

</mosaic_0001>

<bundles_post_ra>
// kernel: tpu_custom_call.1
= control target key start
LH: loop header
LB: loop body
LE: loop exit
PB: predicated region body
PF: predicated region fallthrough
CT: control target
= control target key end

     0   :  { %s2820_s0 = inlined_call_operand.vmem [shape: f32[2,8,32], index: 0, kind: input, shape index: {}]   ;;  %s2821_s1 = inlined_call_operand.hbm [shape: bf16[2,8,32], index: 1, kind: input, shape index: {}]   ;;  %s2822_s2 = inlined_call_operand.vmem [shape: f32[2,1,8], index: 2, kind: input, shape index: {}]   ;;  %s2823_s3 = inlined_call_operand.vmem [shape: bf16[32,64], index: 3, kind: input, shape index: {}]   ;;  %s2824_s4 = inlined_call_operand.vmem [shape: f32[1,64], index: 4, kind: input, shape index: {}]   ;;  %s2825_s5 = inlined_call_operand.vmem [shape: bf16[32,32], index: 5, kind: input, shape index: {}]   ;;  %s2826_s6 = inlined_call_operand.vmem [shape: f32[1,32], index: 6, kind: input, shape index: {}]   ;;  %s2827_s7 = inlined_call_operand.hbm [shape: bf16[32,32], index: 7, kind: input, shape index: {}]   ;;  %s2828_s8 = inlined_call_operand.hbm [shape: f32[1,32], index: 8, kind: input, shape index: {}]   ;;  %s2829_s9 = inlined_call_operand.hbm [shape: bf16[32,64], index: 9, kind: input, shape index: {}]   ;;  %s2830_s10 = inlined_call_operand.hbm [shape: f32[1,64], index: 10, kind: input, shape index: {}]   ;;  %s2831_s11 = inlined_call_operand.vmem [shape: bf16[64,32], index: 11, kind: input, shape index: {}]   ;;  %s2832_s12 = inlined_call_operand.vmem [shape: f32[1,32], index: 12, kind: input, shape index: {}]   ;;  %s2833_s13 = inlined_call_operand.vmem [shape: f32[1,32], index: 13, kind: input, shape index: {}]   ;;  %s2834_s14 = inlined_call_operand.vmem [shape: f32[1,32], index: 14, kind: input, shape index: {}]   ;;  %s2835_s15 = inlined_call_operand.vmem [shape: f32[1,32], index: 15, kind: input, shape index: {}]   ;;  %s2836_s16 = inlined_call_operand.vmem [shape: f32[1,32], index: 16, kind: input, shape index: {}]   ;;  %s2837_s17 = inlined_call_operand.vmem [shape: f32[1,32], index: 17, kind: input, shape index: {}]   ;;  %s2838_s18 = inlined_call_operand.vmem [shape: f32[1,32], index: 18, kind: input, shape index: {}]   ;;  %s2839_s19 = inlined_call_operand.hbm [shape: f32[2,8,32], index: 19, kind: output, shape index: {}]  }
   0x1   :  { %2846 = sst [smem:[#allocation23_spill]] %s2820_s0 }
   0x2   :  { %2847 = sst [smem:[#allocation24_spill]] %s2821_s1 }
   0x3   :  { %2848 = sst [smem:[#allocation25_spill]] %s2822_s2 }
   0x4   :  { %2849 = sst [smem:[#allocation26_spill]] %s2823_s3 }
   0x5   :  { %2850 = sst [smem:[#allocation27_spill]] %s2827_s7 }
   0x6   :  { %2851 = sst [smem:[#allocation28_spill]] %s2828_s8 }
   0x7   :  { %2852 = sst [smem:[#allocation29_spill]] %s2829_s9 }
   0x8   :  { %2853 = sst [smem:[#allocation30_spill]] %s2830_s10 }
   0x9   :  { %2854 = sst [smem:[#allocation31_spill]] %s2835_s15 }
   0xa   :  { %2855 = sst [smem:[#allocation32_spill]] %s2836_s16 }
   0xb   :  { %2856 = sst [smem:[#allocation33_spill]] %s2839_s19 }
   0xc   :  { %24 = vsyncpa [#allocation6], 0 }
   0xd   :  { %26 = vsyncpa [#allocation6 + $0x1], 0 }
   0xe   :  { %27 = vsyncpa [#allocation9], 0 }
   0xf   :  { %28 = vsyncpa [#allocation12], 0 }
  0x10   :  { %29 = vsyncpa [#allocation7], 0 }
  0x11   :  { %31 = vsyncpa [#allocation7 + $0x1], 0  ;;  %s2468_s0 = smov 0   ;;  %s2470_s30 = smov 0  }
  0x12   :  { %s2472_s20 = smov 0   ;;  %s2474_s21 = smov 0  }
  0x13   :  { %s2476_s17 = smov 0   ;;  %s2478_s18 = smov 0  }
  0x14 LB: > { %2857 = sst [smem:[#allocation19_spill]] %s2329_s0  ;;  %s2841_s1 = sadd.s32 4294967295, %s2349_s18   ;;  %s2349_s18 = sphi %s2478_s18, %s37_s18   ;;  %s2345_s17 = sphi %s2476_s17, %s2886_s17   ;;  %s2341_s21 = sphi %s2474_s21, %s2885_s21   ;;  %s2337_s20 = sphi %s2472_s20, %s2889_s20   ;;  %s2333_s30 = sphi %s2470_s30, %s2888_s30   ;;  %s2329_s0 = sphi %s2468_s0, %s2887_s0  }
  0x15   : > { %2858 = sst [smem:[#allocation20_spill]] %s2345_s17  ;;  %p1795_p0 = scmp.ge.s32.totalorder %s2349_s18, 1 }
  0x16   : > { %p2502_p1 = scmp.eq.s32.totalorder %s2841_s1, 0  ;;  %p496_p2 = scmp.lt.s32.totalorder %s2349_s18, 3 }
  0x17   : > { %s2351_s23 = smov [#allocation8]   ;;  %s2352_s3 = smov [#allocation11]  }
  0x18   : > { %p2507_p3 = pnand %p1795_p0, %p496_p2  ;;  %s520_s24 = sshll.u32 %s2351_s23, 4  ;;  %s521_s24 = int_to_ptr.vmem [resolvable:$true] %s520_s24 }
  0x19   : > { %s544_s26 = sshll.u32 %s2352_s3, 4  ;;  %s2353_s27 = smov [#allocation10]   ;;  %s545_s26 = int_to_ptr.vmem [resolvable:$true] %s544_s26 }
  0x1a   : > { %p2000_p4 = pneg %p2507_p3  ;;  %s534_s28 = sshll.u32 %s2353_s27, 4  ;;  %s535_s28 = int_to_ptr.vmem [resolvable:$true] %s534_s28 }
  0x1b   : > { %s2140_s29 = scalar_lea.vmem %s521_s24, 256  ;;  %p2148_p11 = scmp.lt.s32.totalorder %s521_s24, %s521_s24 }
  0x1c   : > { %p2516_p6 = pnand %p2000_p4, %p2502_p1  ;;  %p2141_p8 = scmp.ne.s32.totalorder %s521_s24, %s2140_s29 }
  0x1d   : > { %p2149_p12 = scmp.lt.s32.totalorder %s2140_s29, %s2140_s29 }
  0x1e   : > { %p2131_p7 = pneg %p2516_p6 }
  0x1f   : > { %p2150_p13 = por %p2149_p12, %p2148_p11 }
  0x20   : > { %p2143_p9 = pnand %p2141_p8, %p2131_p7 }
  0x22   : > { %p2144_p10 = pneg %p2143_p9 }
  0x24   : > { %p2151_p0 = pnand %p2150_p13, %p2144_p10 }
  0x26   : > { %2154 = shalt.err (!%p2151_p0)
}
  0x27   : > { %s2354_s23 = smov 64   ;;  %s2355_s3 = smov 4  }
  0x28   : > { %s2862_s7 = sld [smem:[#allocation27_spill]]  ;;  %s2166_s19 = scalar_lea.vmem %s545_s26, 256 }
  0x29   : > { %p2167_p2 = scmp.ne.s32.totalorder %s545_s26, %s2166_s19  ;;  %p2174_p9 = scmp.lt.s32.totalorder %s545_s26, %s545_s26 }
  0x2a   : > { %p2175_p5 = scmp.lt.s32.totalorder %s2166_s19, %s2166_s19 }
  0x2b   : > { %p2169_p4 = pnand %p2167_p2, %p2131_p7 }
  0x2c   : > { %p2176_p11 = por %p2175_p5, %p2174_p9 }
  0x2d   : > { %p2170_p8 = pneg %p2169_p4 }
  0x2e   : > { %2003 = dma.hbm_to_vmem [thread:$0]  (!%p2516_p6), %s2862_s7, 256, %s521_s24, [#allocation9], %s2354_s23, %s2354_s23, %s2355_s3  }
  0x2f   : > { %p2177_p10 = pnand %p2176_p11, %p2170_p8 }
  0x31   : > { %2180 = shalt.err (!%p2177_p10)
}
  0x32   : > { %s2863_s9 = sld [smem:[#allocation29_spill]]  ;;  %s2192_s1 = scalar_lea.vmem %s535_s28, 16 }
  0x33   : > { %p2193_p12 = scmp.ne.s32.totalorder %s535_s28, %s2192_s1  ;;  %s2199_s24 = scalar_lea.vmem %s535_s28, 32 }
  0x34   : > { %p2200_p2 = scmp.lt.s32.totalorder %s535_s28, %s535_s28  ;;  %p2201_p4 = scmp.lt.s32.totalorder %s2199_s24, %s2192_s1 }
  0x35   : > { %p2195_p13 = pnand %p2193_p12, %p2131_p7 }
  0x36   : > { %p2202_p5 = por %p2201_p4, %p2200_p2 }
  0x37   : > { %p2196_p0 = pneg %p2195_p13 }
  0x38   : > { %2009 = dma.hbm_to_vmem [thread:$0]  (!%p2516_p6), %s2863_s9, 256, %s545_s26, [#allocation12], %s2354_s23, %s2354_s23, %s2355_s3  }
  0x39   : > { %p2203_p8 = pnand %p2202_p5, %p2196_p0 }
  0x3b   : > { %2206 = shalt.err (!%p2203_p8)
}
  0x3c   : > { %s2864_s8 = sld [smem:[#allocation28_spill]]  ;;  %s2356_s16 = smov [#allocation13]  }
  0x3d   : > { %s558_s26 = sshll.u32 %s2356_s16, 4  ;;  %s559_s26 = int_to_ptr.vmem [resolvable:$true] %s558_s26 }
  0x3e   : > { %s2218_s23 = scalar_lea.vmem %s559_s26, 16  ;;  %s2225_s3 = scalar_lea.vmem %s559_s26, 32 }
  0x3f   : > { %p2219_p9 = scmp.ne.s32.totalorder %s559_s26, %s2218_s23  ;;  %p2226_p12 = scmp.lt.s32.totalorder %s559_s26, %s559_s26 }
  0x40   : > { %p2227_p13 = scmp.lt.s32.totalorder %s2225_s3, %s2218_s23 }
  0x41   : > { %p2221_p11 = pnand %p2219_p9, %p2131_p7 }
  0x42   : > { %2006 = dma.hbm_to_vmem [thread:$0]  (!%p2516_p6), %s2864_s8, 16, %s535_s28, [#allocation9]  }
  0x43   : > { %p2222_p10 = pneg %p2221_p11  ;;  %p2228_p0 = por %p2227_p13, %p2226_p12 }
  0x45   : > { %p2229_p2 = pnand %p2228_p0, %p2222_p10 }
  0x47   : > { %2232 = shalt.err (!%p2229_p2)
}
  0x48   : > { %s2865_s10 = sld [smem:[#allocation30_spill]]  ;;  %s1794_s28 = sadd.s32 4294967294, %s2349_s18  }
  0x49   : > { %s49_s24 = sadd.s32 1, %s2345_s17  ;;  %s82_s25 = sadd.s32 1, %s2337_s20 }
  0x4a   : > { %p51_p7 = scmp.ge.s32.totalorder %s49_s24, 2  ;;  %p89_p4 = scmp.ne.s32.totalorder %s2337_s20, %s2333_s30 }
  0x4b   : > { %p90_p5 = scmp.eq.s32.totalorder %s2349_s18, 0  ;;  %p95_p9 = scmp.ne.s32.totalorder %s2333_s30, %s2329_s0 }
  0x4c   : > { %s2891_s24 = smov (%p51_p7, %s49_s24), 0  ;;  %s2868_s16 = sadd.s32 4294967295, %s2349_s18  }
  0x4d   : > { %2866 = sst [smem:[#allocation21_spill]] %s2891_s24  ;;  %p2562_p8 = por %p90_p5, %p89_p4 }
  0x4e   : > { %2012 = dma.hbm_to_vmem [thread:$0]  (!%p2516_p6), %s2865_s10, 16, %s559_s26, [#allocation12]  }
  0x4f   : > { %s79_s27 = ssub.s32 %s2345_s17, %s2891_s24  ;;  %p483_p6 = scmp.eq.s32.totalorder %s2868_s16, 1 }
  0x50   : > { %p80_p11 = scmp.eq.s32.totalorder %s79_s27, 0  ;;  %p2574_p10 = por %p2502_p1, %p95_p9 }
  0x51   : > { %p2578_p12 = por %p483_p6, %p89_p4  ;;  %p489_p13 = scmp.eq.s32.totalorder %s1794_s28, 1 }
  0x52   : > { %s2583_s3 = scalar_select %p80_p11, %s2337_s20, %s82_s25  }
  0x53   : > { %p2585_p0 = por %p489_p13, %p95_p9  ;;  %p2025_p2 = scmp.lt.s32.totalorder %s2349_s18, 2 }
  0x54   : > { %2871 = sst [smem:[#allocation22_spill]] %s2583_s3  ;;  %s600_s1 = sand.u32 1, %s2337_s20  }
  0x55   : > { %s2872_s29 = scalar_select %p2585_p0, 1, 0 }
  0x56   : > { %s1802_s16 = sshll.u32 %s2345_s17, 6  ;;  %s1801_s27 = sshll.u32 %s600_s1, 2 }
  0x57   : > { %s2873_s9 = sld [smem:[#allocation24_spill]]  ;;  %s604_s24 = scalar_lea.vmem [#allocation5], %s1801_s27 }
  0x58   : > { %s611_s0 = sshll.u32 %s604_s24, 4  ;;  %p2597_p7 = pnand %p2025_p2, %p2562_p8  ;;  %s612_s0 = int_to_ptr.vmem [resolvable:$true] %s611_s0 }
  0x59   : > { %s601_s28 = scalar_lea.sflag [#allocation6], %s600_s1  ;;  %s2246_s25 = scalar_lea.vmem %s612_s0, 64 }
  0x5a   : > { %p2235_p4 = pneg %p2597_p7  ;;  %p2247_p5 = scmp.ne.s32.totalorder %s612_s0, %s2246_s25 }
  0x5b   : > { %s2357_s17 = smov [#allocation5]  }
  0x5c   : > { %p2249_p9 = pnand %p2247_p5, %p2235_p4  ;;  %s2251_s3 = sshll.u32 %s2357_s17, 4  ;;  %s2252_s3 = int_to_ptr.vmem [resolvable:$false] %s2251_s3 }
  0x5d   : > { %s609_s10 = scalar_lea.hbm %s2873_s9, %s1802_s16  ;;  %s2253_s7 = scalar_lea.vmem %s2252_s3, 128 }
  0x5e   : > { %p2250_p6 = pneg %p2249_p9  ;;  %p2254_p11 = scmp.lt.s32.totalorder %s612_s0, %s2252_s3 }
  0x5f   : > { %p2255_p13 = scmp.lt.s32.totalorder %s2253_s7, %s2246_s25 }
  0x61   : > { %p2256_p0 = por %p2255_p13, %p2254_p11 }
  0x63   : > { %p2257_p8 = pnand %p2256_p0, %p2250_p6 }
  0x65   : > { %2260 = shalt.err (!%p2257_p8)
}
  0x66   : > { %2016 = dma.hbm_to_vmem [thread:$0]  (!%p2597_p7), %s609_s10, 64, %s612_s0, %s601_s28  }
  0x67   : > { %626 = sbr.rel (%p2507_p3) target bundleno = 2670 (0xa6e), region = 96  ;;  %s2608_s8 = sand.u32 (!%p2507_p3), 1, %s2333_s30  }
  0x68   : > { %s1804_s9 = sshll.u32 (!%p2507_p3), %s2608_s8, 2  ;;  %s629_s17 = scalar_lea.sflag (!%p2507_p3), [#allocation6], %s2608_s8 }
  0x69   : > { %s632_s24 = scalar_lea.vmem (!%p2507_p3), [#allocation5], %s1804_s9 }
  0x6c   : > { %2312 = dma.done.wait (%p2574_p10), %s629_s17, 64  }
  0x6d   : > { %2314 = vsyncadd (%p2574_p10), %s629_s17, 4294967232 }
  0x6e   : > { %2316 = dma.done.wait (%p2502_p1), [#allocation9], 272  }
  0x6f   : > { %2318 = vsyncadd (%p2502_p1), [#allocation9], 4294967024 }
  0x70   : > { %2320 = dma.done.wait (%p2502_p1), [#allocation12], 272  }
  0x71   : > { %2322 = vsyncadd (%p2502_p1), [#allocation12], 4294967024  ;;  %p710_p3 = scmp.lt.s32.totalorder %s2341_s21, 1  ;;  %v2358_v0 = vmov 0.0   ;;  %vm2359_vm0 = vmmov 0   ;;  %s2875_s2 = sld [smem:[#allocation23_spill]] }
  0x72   : > { %1888 = vmatprep.subr.bf16.mxu1 %v2358_v0  ;;  %1892 = vmatprep.mubr.msk.bf16.mxu1 %vm2359_vm0, %v2358_v0  ;;  %s2876_s1 = sld [smem:[#allocation26_spill]]  ;;  %v723_v4 = vld [vmem:[%s632_s24] sm:$0xf]  ;;  %vm750_vm1 = vcmask 261120   ;;  %v1811_v8 = vld [vmem:[%s2824_s4] ss:$0 sm:$0xff] }
  0x73   : > { %s2629_s10 = scalar_select %p710_p3, %s2341_s21, 1  ;;  %1904 = vmatprep.subr.bf16.mxu0 %v2358_v0  ;;  %1906 = vmatprep.mubr.msk.bf16.mxu0 %vm2359_vm0, %v2358_v0  ;;  %v724_v5 = vunpack.c.l.bf16 %v723_v4  ;;  %vm796_vm2 = vcmask 257024   ;;  %vm892_vm3 = vcmask 64512   ;;  %v2098_v23 = vld [vmem:[%s2825_s5 + $0x8] sm:$0xff]   ;;  %v2099_v24 = vld [vmem:[%s2825_s5] sm:$0xff]   ;;  %vm954_vm4 = vcmask 1043456  }
  0x74   : > { %s2360_s7 = smov 96   ;;  %s2361_s9 = smov 120   ;;  %v1816_v4 = vld [vmem:[%s2826_s6] ss:$0 sm:$0xff]  ;;  %vm1350_vm5 = vcmask 130048   ;;  %vm1352_vm6 = vcmask 195584  }
  0x75   : > { %s1810_s15 = sshll.u32 %s2629_s10, 3  ;;  %s2362_s17 = smov 112   ;;  %vm1561_vm7 = vcmask 523264  }
  0x76   : > { %s2363_s24 = smov 104   ;;  %s2877_s3 = sld [smem:[#allocation25_spill]] }
  0x77   : > { %s713_s19 = scalar_lea.vmem %s2875_s2, %s1810_s15  ;;  %s2364_s28 = smov 8  }
  0x78   : > { %v2094_v1 = vld [vmem:[%s2876_s1 + $0x8] sm:$0xff]   ;;  %v2095_v2 = vld [vmem:[%s2876_s1] sm:$0xff]   ;;  %s2365_s25 = smov 16   ;;  %s2879_s0 = sld [smem:[#allocation32_spill]] }
  0x79   : > { %1889 = vmatpush3.bf16.msra.mxu1 %v2094_v1  ;;  %v2644_v3 = vld [vmem:[%s713_s19] sm:$0xff]  ;;  %s1851_s22 = sshll.u32 %s2341_s21, 7  ;;  %s1637_s27 = scalar_lea.sflag [#allocation7], %s2608_s8 }
  0x7a   : > { %1890 = vmatprep.subr.bf16.mxu1 %v2358_v0  ;;  %v725_v6 = vadd.f32 %v724_v5, %v2644_v3  ;;  %v806_v25 = vpack.c.bf16 %v2644_v3, %v2644_v3 }
  0x7c   : > { %v726_v7 = vpack.c.bf16 %v725_v6, %v725_v6  ;;  %s716_s16 = scalar_lea.vmem %s2877_s3, %s2629_s10 }
  0x7d   : > { %1891 = vmatpush3.bf16.msra.mxu1 %v2095_v2  ;;  %v1820_v35 = vld [vmem:[%s716_s16] ss:$0 sm:$0xff]  ;;  %s2880_s16 = sld [smem:[#allocation33_spill]] }
  0x7e   : > { %1896 = vmatprep.subr.bf16.mxu1 %v2358_v0 }
  0x80   : > { %1893 = vmatmul.mubr.msk.bf16.vlgmr.msra.gmra.mxu1 %vm750_vm1, %v726_v7 }
  0x81   : > { %1900 = vmatprep.mubr.msk.bf16.mxu1 %vm2359_vm0, %v2358_v0  ;;  %1897 = vmatpush3.bf16.msra.mxu1 %v2098_v23 }
  0x82   : > { %1898 = vmatprep.subr.bf16.mxu1 %v2358_v0 }
  0x83   : > { %s1649_s10 = scalar_lea.hbm %s2880_s16, %s1851_s22 }
  0x85   : > { %1899 = vmatpush3.bf16.msra.mxu1 %v2099_v24 }
  0x86   : > { %1910 = vmatprep.subr.bf16.mxu1 %v2358_v0 }
  0x88   : > { %1901 = vmatmul.mubr.msk.bf16.vlgmr.msra.gmra.mxu1 %vm750_vm1, %v806_v25 }
  0x89   : > { %1912 = vmatprep.mubr.msk.bf16.mxu1 %vm2359_vm0, %v2358_v0 }
 0x140   : > { %v788_v9 = vpop.f32.mrf.mxu1 }
 0x141   : > { %v789_v10 = vadd.f32 %v1811_v8, %v788_v9 }
 0x142   : > { %v1894_v11 = vpop.f32.mrf.mxu1 }
 0x143   : > { %v794_v12 = vmul.f32 0.35355338, %v789_v10  ;;  %v1854_v13 = vpack.c.bf16 %v789_v10, %v789_v10 }
 0x144   : > { %v791_v14 = vpop.f32.mrf.mxu1 }
 0x145   : > { %v795_v15 = vpack.c.bf16 %v794_v12, %v794_v12  ;;  %802 = vrot.lane.b32.xlu0 %v1854_v13, %s2360_s7  ;;  %s2366_s7 = smov 24  }
 0x146   : > { %v1895_v16 = vpop.f32.mrf.mxu1 }
 0x147   : > { %797 = vst.msk [vmem:[#allocation2] sm:$0xf] %vm796_vm2, %v795_v15 }
 0x148   : > { %v867_v63 = vpop.f32.mrf.mxu1 }
 0x149   : > { %v868_v5 = vadd.f32 %v1816_v4, %v867_v63  ;;  %v2102_v63 = vld [vmem:[#allocation8] sm:$0xff]  }
 0x14a   : > { %v1902_v1 = vpop.f32.mrf.mxu1 }
 0x14b   : > { %v873_v7 = vpack.c.bf16 %v868_v5, %v868_v5 }
 0x14c   : > { %v870_v2 = vpop.f32.mrf.mxu1 }
 0x14d   : > { %874 = vst.msk [vmem:[#allocation4] sm:$0xf] %vm796_vm2, %v873_v7 }
 0x14e   : > { %v882_v17 = vld [vmem:[#allocation2] sm:$0xf]  ;;  %v1903_v6 = vpop.f32.mrf.mxu1 }
 0x14f   : > { %v1823_v18 = vcombine.low %v882_v17, %v882_v17 }
 0x151   : > { %1001 = vrot.lane.b32.xlu1 %v1823_v18, %s2361_s9 }
 0x154   : > { %v884_v10 = vld [vmem:[#allocation4] sm:$0xf] }
 0x155   : > { %v956_v11 = vsel %vm954_vm4, %v884_v10, 0 }
 0x156   : > { %1911 = vmatpush3.bf16.msra.mxu1 %v956_v11 }
 0x157   : > { %1922 = vmatprep.subr.bf16.mxu1 %v2358_v0 }
 0x1b7   : > { %v803_v19 = vpop.permute.xlu0 %802 }
 0x1b8   : > { %805 = vst.msk [vmem:[#allocation3] sm:$0xf] %vm796_vm2, %v803_v19 }
 0x1bf   : > { %v883_v20 = vld [vmem:[#allocation3] sm:$0xf] }
 0x1c0   : > { %v897_v21 = vsel %vm892_vm3, %v883_v20, 0  ;;  %v1824_v22 = vcombine.low %v883_v20, %v883_v20 }
 0x1c1   : > { %1905 = vmatpush3.bf16.xpose.msra.mxu0 %v897_v21 }
 0x1c2   : > { %1006 = vrot.lane.b32.xlu0 %v1824_v22, %s2361_s9  ;;  %1119 = vrot.lane.b32.xlu1 %v1824_v22, %s2362_s17 }
 0x1c3   : > { %1916 = vmatprep.subr.bf16.mxu0 %v2358_v0  ;;  %v1002_v28 = vpop.permute.xlu1 %1001 }
 0x1c6   : > { %1117 = vrot.lane.b32.xlu0 %v1823_v18, %s2362_s17  ;;  %1229 = vrot.lane.b32.xlu1 %v1824_v22, %s2363_s24  ;;  %v1826_v22 = vcombine.low %v884_v10, %v884_v10 }
 0x1c8   : > { %1907 = vmatmul.mubr.msk.bf16.vlgmr.msra.gmra.mxu0 %vm892_vm3, %v882_v17 }
 0x1c9   : > { %1918 = vmatprep.mubr.msk.bf16.mxu0 %vm2359_vm0, %v2358_v0 }
 0x1ca   : > { %1227 = vrot.lane.b32.xlu0 %v1823_v18, %s2363_s24 }
 0x234   : > { %v1007_v26 = vpop.permute.xlu0 %1006  ;;  %v1120_v29 = vpop.permute.xlu1 %1119 }
 0x235   : > { %v1012_v27 = vsel %vm892_vm3, %v1007_v26, 0  ;;  %v1125_v30 = vsel %vm892_vm3, %v1120_v29, 0 }
 0x236   : > { %1917 = vmatpush3.bf16.xpose.msra.mxu0 %v1012_v27 }
 0x237   : > { %1928 = vmatprep.subr.bf16.mxu0 %v2358_v0 }
 0x238   : > { %v1230_v31 = vpop.permute.xlu1 %1229  ;;  %v1118_v32 = vpop.permute.xlu0 %1117 }
 0x239   : > { %v1235_v33 = vsel %vm892_vm3, %v1230_v31, 0 }
 0x23c   : > { %v1228_v34 = vpop.permute.xlu0 %1227 }
 0x23d   : > { %1919 = vmatmul.mubr.msk.bf16.vlgmr.msra.gmra.mxu0 %vm892_vm3, %v1002_v28 }
 0x23e   : > { %1929 = vmatpush3.bf16.xpose.msra.mxu0 %v1125_v30  ;;  %1930 = vmatprep.mubr.msk.bf16.mxu0 %vm2359_vm0, %v2358_v0 }
 0x23f   : > { %1940 = vmatprep.subr.bf16.mxu0 %v2358_v0 }
 0x245   : > { %1931 = vmatmul.mubr.msk.bf16.vlgmr.msra.gmra.mxu0 %vm892_vm3, %v1118_v32 }
 0x246   : > { %1941 = vmatpush3.bf16.xpose.msra.mxu0 %v1235_v33  ;;  %1942 = vmatprep.mubr.msk.bf16.mxu0 %vm2359_vm0, %v2358_v0 }
 0x247   : > { %1952 = vmatprep.subr.bf16.mxu0 %v2358_v0 }
 0x24d   : > { %1943 = vmatmul.mubr.msk.bf16.vlgmr.msra.gmra.mxu0 %vm892_vm3, %v1228_v34 }
 0x24e   : > { %1956 = vmatprep.mubr.msk.bf16.mxu0 %vm2359_vm0, %v2358_v0 }
 0x288   : > { %v933_v36 = vpop.f32.mrf.mxu0 }
 0x289   : > { %v934_v37 = vadd.f32 %v1820_v35, %v933_v36 }
 0x28a   : > { %v1908_v38 = vpop.f32.mrf.mxu0 }
 0x28b   : > { %v939_v39 = vsel %vm892_vm3, %v934_v37, -inf }
 0x28c   : > { %940 = vmax.xlane.f32.xlu1 %v939_v39  ;;  %v936_v40 = vpop.f32.mrf.mxu0 }
 0x28e   : > { %v1909_v41 = vpop.f32.mrf.mxu0 }
 0x2fd   : > { %v1048_v42 = vpop.f32.mrf.mxu0 }
 0x2fe   : > { %v1049_v43 = vadd.f32 %v1820_v35, %v1048_v42 }
 0x2ff   : > { %v1920_v44 = vpop.f32.mrf.mxu0 }
 0x300   : > { %v1054_v45 = vsel %vm892_vm3, %v1049_v43, -inf }
 0x301   : > { %1055 = vmax.xlane.f32.xlu0 %v1054_v45  ;;  %v1051_v46 = vpop.f32.mrf.mxu0 }
 0x303   : > { %v1921_v47 = vpop.f32.mrf.mxu0 }
 0x305   : > { %v1161_v48 = vpop.f32.mrf.mxu0 }
 0x306   : > { %v1162_v49 = vadd.f32 %v1820_v35, %v1161_v48 }
 0x307   : > { %v1932_v50 = vpop.f32.mrf.mxu0 }
 0x308   : > { %v1167_v51 = vsel %vm892_vm3, %v1162_v49, -inf }
 0x309   : > { %1168 = vmax.xlane.f32.xlu0 %v1167_v51  ;;  %v1164_v52 = vpop.f32.mrf.mxu0 }
 0x30b   : > { %v1933_v53 = vpop.f32.mrf.mxu0 }
 0x30d   : > { %v1271_v54 = vpop.f32.mrf.mxu0 }
 0x30e   : > { %v1272_v55 = vadd.f32 %v1820_v35, %v1271_v54  ;;  %v2101_v54 = vld [vmem:[#allocation8 + $0x8] sm:$0xff]  }
 0x30f   : > { %v1944_v56 = vpop.f32.mrf.mxu0  ;;  %1953 = vmatpush3.bf16.msra.mxu0 %v2101_v54 }
 0x310   : > { %v1277_v57 = vsel %vm892_vm3, %v1272_v55, -inf  ;;  %1954 = vmatprep.subr.bf16.mxu0 %v2358_v0 }
 0x311   : > { %1278 = vmax.xlane.f32.xlu1 %v1277_v57  ;;  %v1274_v58 = vpop.f32.mrf.mxu0 }
 0x313   : > { %v1945_v59 = vpop.f32.mrf.mxu0  ;;  %1955 = vmatpush3.bf16.msra.mxu0 %v2102_v63 }
 0x314   : > { %1968 = vmatprep.subr.bf16.mxu0 %v2358_v0 }
 0x315   : > { %v941_v60 = vpop.xlane.xlu1 %940 }
 0x316   : > { %v942_v61 = vsub.f32 %v934_v37, %v941_v60 }
 0x318   : > { %v943_v62 = vmul.f32 1.442695, %v942_v61 }
 0x31a   : > { %2109 = vpow2.f32 %v943_v62 }
 0x327   : > { %v2110_v8 = vpop.eup %2109 }
 0x328   : > { %v945_v9 = vsel %vm892_vm3, %v2110_v8, 0.0 }
 0x329   : > { %946 = vadd.xlane.f32.xlu0 %v945_v9 }
 0x38a   : > { %v1056_v12 = vpop.xlane.xlu0 %1055 }
 0x38b   : > { %v1057_v13 = vsub.f32 %v1049_v43, %v1056_v12 }
 0x38d   : > { %v1058_v14 = vmul.f32 1.442695, %v1057_v13  ;;  %v1832_v13 = vld [vmem:[#allocation10] ss:$0 sm:$0xff] }
 0x38f   : > { %2111 = vpow2.f32 %v1058_v14 }
 0x392   : > { %v1169_v15 = vpop.xlane.xlu0 %1168 }
 0x393   : > { %v1170_v16 = vsub.f32 %v1162_v49, %v1169_v15 }
 0x395   : > { %v1171_v17 = vmul.f32 1.442695, %v1170_v16 }
 0x397   : > { %2113 = vpow2.f32 %v1171_v17 }
 0x39a   : > { %v1279_v24 = vpop.xlane.xlu1 %1278 }
 0x39b   : > { %v1280_v25 = vsub.f32 %v1272_v55, %v1279_v24 }
 0x39c   : > { %v2112_v18 = vpop.eup %2111 }
 0x39d   : > { %v1060_v19 = vsel %vm892_vm3, %v2112_v18, 0.0  ;;  %v1281_v26 = vmul.f32 1.442695, %v1280_v25 }
 0x39e   : > { %1061 = vadd.xlane.f32.xlu1 %v1060_v19 }
 0x3a4   : > { %v2114_v20 = vpop.eup %2113 }
 0x3a5   : > { %v1173_v21 = vsel %vm892_vm3, %v2114_v20, 0.0 }
 0x3a6   : > { %1174 = vadd.xlane.f32.xlu0 %v1173_v21 }
 0x3af   : > { %1179 = vrot.lane.b32.xlu1 %v1826_v22, %s2362_s17  ;;  %s2878_s17 = sld [smem:[#allocation31_spill]] }
 0x3b2   : > { %v947_v23 = vpop.xlane.xlu0 %946 }
 0x3b3   : > { %2115 = vrcp.f32 %v947_v23 }
 0x3b4   : > { %2117 = vpow2.f32 %v1281_v26  ;;  %v2103_v26 = vld [vmem:[#allocation11 + $0x8] sm:$0xff]  }
 0x3bc   : > { %1069 = vrot.lane.b32.xlu0 %v1826_v22, %s2361_s9 }
 0x3c0   : > { %v2116_v27 = vpop.eup %2115 }
 0x3c1   : > { %v949_v28 = vmul.f32 %v2116_v27, %v2110_v8  ;;  %v2118_v30 = vpop.eup %2117  ;;  %v2104_v27 = vld [vmem:[#allocation11] sm:$0xff]  }
 0x3c2   : > { %v1283_v31 = vsel %vm892_vm3, %v2118_v30, 0.0 }
 0x3c3   : > { %v950_v29 = vpack.c.bf16 %v949_v28, %v949_v28  ;;  %v2106_v28 = vld [vmem:[%s2831_s11 + $0x10] sm:$0xff]  }
 0x3c5   : > { %1913 = vmatmul.mubr.msk.bf16.vlgmr.msra.gmra.mxu1 %vm892_vm3, %v950_v29 }
 0x3c6   : > { %1924 = vmatprep.mubr.msk.bf16.mxu1 %vm2359_vm0, %v2358_v0 }
 0x3d3   : > { %1284 = vadd.xlane.f32.xlu1 %v1283_v31 }
 0x3e4   : > { %1289 = vrot.lane.b32.xlu1 %v1826_v22, %s2363_s24 }
 0x427   : > { %v1062_v32 = vpop.xlane.xlu1 %1061 }
 0x428   : > { %2119 = vrcp.f32 %v1062_v32 }
 0x42b   : > { %v1180_v38 = vpop.permute.xlu1 %1179 }
 0x42c   : > { %v1185_v40 = vsel %vm954_vm4, %v1180_v38, 0 }
 0x42f   : > { %v1175_v33 = vpop.xlane.xlu0 %1174 }
 0x430   : > { %2121 = vrcp.f32 %v1175_v33  ;;  %v1836_v33 = vld [vmem:[%s2833_s13] ss:$0 sm:$0xff] }
 0x433   : > { %v1070_v34 = vpop.permute.xlu0 %1069 }
 0x434   : > { %v1075_v35 = vsel %vm954_vm4, %v1070_v34, 0 }
 0x435   : > { %v2120_v36 = vpop.eup %2119  ;;  %1923 = vmatpush3.bf16.msra.mxu1 %v1075_v35  ;;  %v1837_v35 = vld [vmem:[%s2834_s14] ss:$0 sm:$0xff] }
 0x436   : > { %1934 = vmatprep.subr.bf16.mxu1 %v2358_v0  ;;  %v1064_v37 = vmul.f32 %v2120_v36, %v2112_v18 }
 0x438   : > { %v1065_v39 = vpack.c.bf16 %v1064_v37, %v1064_v37 }
 0x43a   : > { %1925 = vmatmul.mubr.msk.bf16.vlgmr.msra.gmra.mxu1 %vm892_vm3, %v1065_v39  ;;  %v2107_v39 = vld [vmem:[%s2831_s11 + $0x8] sm:$0xff]  }
 0x43b   : > { %1935 = vmatpush3.bf16.msra.mxu1 %v1185_v40  ;;  %1936 = vmatprep.mubr.msk.bf16.mxu1 %vm2359_vm0, %v2358_v0  ;;  %v2108_v40 = vld [vmem:[%s2831_s11] sm:$0xff]  }
 0x43c   : > { %1946 = vmatprep.subr.bf16.mxu1 %v2358_v0 }
 0x43d   : > { %v2122_v41 = vpop.eup %2121 }
 0x43e   : > { %v1177_v42 = vmul.f32 %v2122_v41, %v2114_v20  ;;  %v1838_v41 = vld [vmem:[#allocation13] ss:$0 sm:$0xff] }
 0x440   : > { %v1178_v43 = vpack.c.bf16 %v1177_v42, %v1177_v42 }
 0x442   : > { %1937 = vmatmul.mubr.msk.bf16.vlgmr.msra.gmra.mxu1 %vm892_vm3, %v1178_v43 }
 0x443   : > { %1948 = vmatprep.mubr.msk.bf16.mxu1 %vm2359_vm0, %v2358_v0 }
 0x45c   : > { %v1285_v44 = vpop.xlane.xlu1 %1284 }
 0x45d   : > { %2123 = vrcp.f32 %v1285_v44 }
 0x460   : > { %v1290_v45 = vpop.permute.xlu1 %1289 }
 0x461   : > { %v1295_v46 = vsel %vm954_vm4, %v1290_v45, 0 }
 0x462   : > { %1947 = vmatpush3.bf16.msra.mxu1 %v1295_v46 }
 0x463   : > { %1960 = vmatprep.subr.bf16.mxu1 %v2358_v0 }
 0x46a   : > { %v2124_v47 = vpop.eup %2123 }
 0x46b   : > { %v1287_v48 = vmul.f32 %v2124_v47, %v2118_v30 }
 0x46d   : > { %v1288_v49 = vpack.c.bf16 %v1287_v48, %v1287_v48 }
 0x46f   : > { %1949 = vmatmul.mubr.msk.bf16.vlgmr.msra.gmra.mxu1 %vm892_vm3, %v1288_v49  ;;  %v1842_v49 = vld [vmem:[%s2832_s12] ss:$0 sm:$0xff] }
 0x470   : > { %1964 = vmatprep.mubr.msk.bf16.mxu1 %vm2359_vm0, %v2358_v0  ;;  %1961 = vmatpush3.bf16.msra.mxu1 %v2103_v26 }
 0x471   : > { %1962 = vmatprep.subr.bf16.mxu1 %v2358_v0 }
 0x474   : > { %1963 = vmatpush3.bf16.msra.mxu1 %v2104_v27 }
 0x485   : > { %v992_v50 = vpop.f32.mrf.mxu1 }
 0x487   : > { %v1914_v51 = vpop.f32.mrf.mxu1 }
 0x489   : > { %v995_v52 = vpop.f32.mrf.mxu1 }
 0x48b   : > { %v1915_v53 = vpop.f32.mrf.mxu1 }
 0x4fa   : > { %v1111_v55 = vpop.f32.mrf.mxu1 }
 0x4fb   : > { %1338 = vrot.lane.b32.xlu0 %v1111_v55, %s2364_s28 }
 0x4fc   : > { %v1926_v56 = vpop.f32.mrf.mxu1 }
 0x4fe   : > { %v1114_v57 = vpop.f32.mrf.mxu1 }
 0x500   : > { %v1927_v58 = vpop.f32.mrf.mxu1 }
 0x502   : > { %v1221_v59 = vpop.f32.mrf.mxu1 }
 0x503   : > { %1342 = vrot.lane.b32.xlu1 %v1221_v59, %s2365_s25  ;;  %s1809_s25 = sshll.u32 %s2608_s8, 3 }
 0x504   : > { %v1938_v60 = vpop.f32.mrf.mxu1  ;;  %s709_s2 = scalar_lea.vmem [#allocation14], %s1809_s25 }
 0x505   : > { %s1651_s19 = sshll.u32 %s709_s2, 4  ;;  %s1652_s19 = int_to_ptr.vmem [resolvable:$true] %s1651_s19 }
 0x506   : > { %v1224_v61 = vpop.f32.mrf.mxu1  ;;  %s2261_s28 = scalar_lea.vmem %s1652_s19, 128 }
 0x507   : > { %p2262_p1 = scmp.ne.s32.totalorder %s1652_s19, %s2261_s28 }
 0x508   : > { %v1939_v62 = vpop.f32.mrf.mxu1 }
 0x509   : > { %p2263_p10 = pnand %p2262_p1, %p2578_p12 }
 0x50b   : > { %p2264_p0 = pneg %p2263_p10 }
 0x52f   : > { %v1331_v1 = vpop.f32.mrf.mxu1 }
 0x530   : > { %1346 = vrot.lane.b32.xlu0 %v1331_v1, %s2366_s7  ;;  %s2367_s7 = smov [#allocation14]  }
 0x531   : > { %v1950_v2 = vpop.f32.mrf.mxu1  ;;  %s2265_s9 = sshll.u32 %s2367_s7, 4  ;;  %s2266_s9 = int_to_ptr.vmem [resolvable:$false] %s2265_s9 }
 0x532   : > { %v1848_v2 = vld [vmem:[%s2878_s17] ss:$0 sm:$0xff]  ;;  %s2267_s21 = scalar_lea.vmem %s2266_s9, 256  ;;  %p2268_p2 = scmp.lt.s32.totalorder %s1652_s19, %s2266_s9 }
 0x533   : > { %v1334_v4 = vpop.f32.mrf.mxu1  ;;  %p2269_p7 = scmp.lt.s32.totalorder %s2267_s21, %s2261_s28 }
 0x535   : > { %v1951_v5 = vpop.f32.mrf.mxu1  ;;  %p2270_p4 = por %p2269_p7, %p2268_p2 }
 0x536   : > { %v1849_v5 = vld [vmem:[%s2879_s0] ss:$0 sm:$0xff] }
 0x537   : > { %p2271_p5 = pnand %p2270_p4, %p2264_p0 }
 0x56d   : > { %v1339_v6 = vpop.permute.xlu0 %1338 }
 0x56e   : > { %v1349_v8 = vsel %vm892_vm3, %v992_v50, %v1339_v6 }
 0x575   : > { %v1343_v7 = vpop.permute.xlu1 %1342 }
 0x576   : > { %v1351_v9 = vsel %vm1350_vm5, %v1349_v8, %v1343_v7 }
 0x5a2   : > { %v1347_v10 = vpop.permute.xlu0 %1346 }
 0x5a3   : > { %v1353_v11 = vsel %vm1352_vm6, %v1351_v9, %v1347_v10 }
 0x5a4   : > { %v1354_v12 = vpack.c.bf16 %v1353_v11, %v1353_v11 }
 0x5a6   : > { %1957 = vmatmul.mubr.msk.bf16.vlgmr.msra.gmra.mxu0 %vm750_vm1, %v1354_v12 }
 0x5a7   : > { %1976 = vmatprep.mubr.msk.bf16.mxu0 %vm2359_vm0, %v2358_v0 }
 0x666   : > { %v1416_v14 = vpop.f32.mrf.mxu0 }
 0x667   : > { %v1417_v15 = vadd.f32 %v1832_v13, %v1416_v14 }
 0x668   : > { %v1958_v16 = vpop.f32.mrf.mxu0 }
 0x669   : > { %v1422_v17 = vadd.f32 %v1417_v15, %v2644_v3  ;;  %v2105_v3 = vld [vmem:[%s2831_s11 + $0x18] sm:$0xff]  }
 0x66a   : > { %v1419_v18 = vpop.f32.mrf.mxu0  ;;  %1969 = vmatpush3.bf16.msra.mxu0 %v2105_v3 }
 0x66b   : > { %v1425_v19 = vsel %vm750_vm1, %v1422_v17, 0.0  ;;  %1970 = vmatprep.subr.bf16.mxu0 %v2358_v0 }
 0x66c   : > { %1426 = vadd.xlane.f32.xlu1 %v1425_v19  ;;  %v1959_v20 = vpop.f32.mrf.mxu0 }
 0x66e   : > { %1971 = vmatpush3.bf16.msra.mxu0 %v2106_v28 }
 0x66f   : > { %1972 = vmatprep.subr.bf16.mxu0 %v2358_v0 }
 0x672   : > { %1973 = vmatpush3.bf16.msra.mxu0 %v2107_v39 }
 0x673   : > { %1974 = vmatprep.subr.bf16.mxu0 %v2358_v0 }
 0x676   : > { %1975 = vmatpush3.bf16.msra.mxu0 %v2108_v40 }
 0x6f5   : > { %v1427_v21 = vpop.xlane.xlu1 %1426 }
 0x6f6   : > { %v1429_v22 = vmul.f32 0.03125, %v1427_v21 }
 0x6f8   : > { %v1430_v23 = vsub.f32 %v1422_v17, %v1429_v22 }
 0x6fa   : > { %v1431_v24 = vmul.f32 %v1430_v23, %v1430_v23 }
 0x6fc   : > { %v1432_v25 = vsel %vm750_vm1, %v1431_v24, 0.0 }
 0x6fd   : > { %1433 = vadd.xlane.f32.xlu0 %v1432_v25 }
 0x786   : > { %v1434_v29 = vpop.xlane.xlu0 %1433 }
 0x787   : > { %v1435_v30 = vmul.f32 0.03125, %v1434_v29 }
 0x789   : > { %v1436_v31 = vadd.f32 1e-05, %v1435_v30 }
 0x78b   : > { %2125 = vrsqrt.f32 %v1436_v31 }
 0x798   : > { %v2126_v32 = vpop.eup %2125 }
 0x799   : > { %v1438_v34 = vmul.f32 %v2126_v32, %v1430_v23 }
 0x79b   : > { %v1445_v36 = vmul.f32 %v1836_v33, %v1438_v34 }
 0x79d   : > { %v1452_v37 = vadd.f32 %v1837_v35, %v1445_v36 }
 0x79f   : > { %v1453_v38 = vpack.c.bf16 %v1452_v37, %v1452_v37 }
 0x7a1   : > { %1965 = vmatmul.mubr.msk.bf16.vlgmr.msra.gmra.mxu1 %vm750_vm1, %v1453_v38 }
 0x861   : > { %v1514_v42 = vpop.f32.mrf.mxu1 }
 0x862   : > { %v1515_v43 = vadd.f32 %v1838_v41, %v1514_v42 }
 0x863   : > { %v1966_v44 = vpop.f32.mrf.mxu1 }
 0x864   : > { %v1520_v45 = vmax.f32 %v1515_v43, 0.0 }
 0x865   : > { %v1517_v46 = vpop.f32.mrf.mxu1 }
 0x866   : > { %v1521_v47 = vpack.c.bf16 %v1520_v45, %v1520_v45 }
 0x867   : > { %v1967_v48 = vpop.f32.mrf.mxu1 }
 0x868   : > { %1977 = vmatmul.mubr.msk.bf16.vlgmr.msra.gmra.mxu0 %vm1561_vm7, %v1521_v47 }
 0x928   : > { %v1599_v0 = vpop.f32.mrf.mxu0 }
 0x929   : > { %v1600_v50 = vadd.f32 %v1842_v49, %v1599_v0 }
 0x92a   : > { %v1978_v51 = vpop.f32.mrf.mxu0 }
 0x92b   : > { %v1605_v52 = vadd.f32 %v1600_v50, %v1452_v37 }
 0x92c   : > { %v1602_v53 = vpop.f32.mrf.mxu0 }
 0x92d   : > { %v1608_v54 = vsel %vm750_vm1, %v1605_v52, 0.0 }
 0x92e   : > { %1609 = vadd.xlane.f32.xlu0 %v1608_v54  ;;  %v1979_v55 = vpop.f32.mrf.mxu0 }
 0x9b7   : > { %v1610_v56 = vpop.xlane.xlu0 %1609 }
 0x9b8   : > { %v1611_v57 = vmul.f32 0.03125, %v1610_v56 }
 0x9ba   : > { %v1612_v58 = vsub.f32 %v1605_v52, %v1611_v57 }
 0x9bc   : > { %v1613_v59 = vmul.f32 %v1612_v58, %v1612_v58 }
 0x9be   : > { %v1614_v60 = vsel %vm750_vm1, %v1613_v59, 0.0 }
 0x9bf   : > { %1615 = vadd.xlane.f32.xlu1 %v1614_v60 }
 0xa48   : > { %v1616_v61 = vpop.xlane.xlu1 %1615 }
 0xa49   : > { %v1617_v62 = vmul.f32 0.03125, %v1616_v61 }
 0xa4b   : > { %v1618_v63 = vadd.f32 1e-05, %v1617_v62 }
 0xa4d   : > { %2127 = vrsqrt.f32 %v1618_v63 }
 0xa5a   : > { %v2128_v1 = vpop.eup %2127 }
 0xa5b   : > { %v1620_v4 = vmul.f32 %v2128_v1, %v1612_v58 }
 0xa5d   : > { %v1627_v6 = vmul.f32 %v1848_v2, %v1620_v4 }
 0xa5f   : > { %v1634_v7 = vadd.f32 %v1849_v5, %v1627_v6 }
 0xa61   : > { %1635 = vst.msk [vmem:[%s709_s2] sm:$0xff] %vm750_vm1, %v1634_v7 }
 0xa62   : > { %2274 = shalt.err (!%p2271_p5)
}
 0xa63   : > { %s2275_s25 = scalar_lea.hbm %s1649_s10, 128  ;;  %s2279_s24 = scalar_lea.hbm %s2880_s16, 256 }
 0xa64   : > { %p2276_p9 = scmp.ne.s32.totalorder %s1649_s10, %s2275_s25  ;;  %p2280_p13 = scmp.lt.s32.totalorder %s1649_s10, %s2880_s16 }
 0xa65   : > { %p2281_p8 = scmp.lt.s32.totalorder %s2279_s24, %s2275_s25 }
 0xa66   : > { %p2277_p6 = pnand %p2276_p9, %p2578_p12 }
 0xa67   : > { %p2282_p3 = por %p2281_p8, %p2280_p13 }
 0xa68   : > { %p2278_p11 = pneg %p2277_p6 }
 0xa6a   : > { %p2283_p1 = pnand %p2282_p3, %p2278_p11 }
 0xa6c   : > { %2286 = shalt.err (!%p2283_p1)
}
 0xa6d   : > { %1998 = dma.vmem_to_hbm [thread:$0]  (%p2578_p12), %s1652_s19, 128, %s1649_s10, %s1637_s27  }
 0xa6e PF: > { %s2881_s22 = sld [smem:[#allocation19_spill]]  ;;  %p2882_p10 = scmp.ne.s32.totalorder %s2872_s29, 0 }
 0xa6f   : > { %p2883_p0 = scmp.ge.s32.totalorder %s2349_s18, 2 }
 0xa71   : > { %p2018_p2 = pnand %p2883_p0, %p2882_p10 }
 0xa73   : > { %p2019_p7 = pneg %p2018_p2 }
 0xa74   : > { %s1663_s2 = sand.u32 1, %s2881_s22  }
 0xa75   : > { %s1664_s26 = scalar_lea.sflag [#allocation7], %s1663_s2 }
 0xa76   : > { %2324 = dma.done.wait (%p2019_p7), %s1664_s26, 128  }
 0xa77   : > { %2326 = vsyncadd (%p2019_p7), %s1664_s26, 4294967168  ;;  %s37_s18 = sadd.s32 1, %s2349_s18   ;;  %s2884_s3 = sld [smem:[#allocation22_spill]] }
 0xa78   : > { %p34_p4 = scmp.ge.s32.totalorder %s37_s18, 4   ;;  %s2885_s21 = sld [smem:[#allocation20_spill]] }
 0xa79   : > { %s2886_s17 = sld [smem:[#allocation21_spill]]  ;;  %s2887_s0 = smov %s2333_s30 }
 0xa7a   : > { %s2888_s30 = smov %s2337_s20  ;;  %36 = sbr.rel (!%p34_p4) target bundleno = 20 (0x14), region = 169 }
 0xa7d   : > { %s2889_s20 = smov %s2884_s3 }
 0xa7f   :  { %1669 = vsyncpa [#allocation6], 1 }
 0xa80   :  { %1671 = vsyncpa [#allocation6 + $0x1], 1 }
 0xa81   :  { %1672 = vsyncpa [#allocation9], 1 }
 0xa82   :  { %1673 = vsyncpa [#allocation12], 1 }
 0xa83   :  { %1674 = vsyncpa [#allocation7], 1 }
 0xa84   :  { %1676 = vsyncpa [#allocation7 + $0x1], 1 }

// kernel: tpu_custom_call.1
= control target key start
LH: loop header
LB: loop body
LE: loop exit
PB: predicated region body
PF: predicated region fallthrough
CT: control target
= control target key end

     0   :  { %s2820_s0 = inlined_call_operand.vmem [shape: f32[2,8,32], index: 0, kind: input, shape index: {}]   ;;  %s2821_s1 = inlined_call_operand.hbm [shape: bf16[2,8,32], index: 1, kind: input, shape index: {}]   ;;  %s2822_s2 = inlined_call_operand.vmem [shape: f32[2,1,8], index: 2, kind: input, shape index: {}]   ;;  %s2823_s3 = inlined_call_operand.vmem [shape: bf16[32,64], index: 3, kind: input, shape index: {}]   ;;  %s2824_s4 = inlined_call_operand.vmem [shape: f32[1,64], index: 4, kind: input, shape index: {}]   ;;  %s2825_s5 = inlined_call_operand.vmem [shape: bf16[32,32], index: 5, kind: input, shape index: {}]   ;;  %s2826_s6 = inlined_call_operand.vmem [shape: f32[1,32], index: 6, kind: input, shape index: {}]   ;;  %s2827_s7 = inlined_call_operand.hbm [shape: bf16[32,32], index: 7, kind: input, shape index: {}]   ;;  %s2828_s8 = inlined_call_operand.hbm [shape: f32[1,32], index: 8, kind: input, shape index: {}]   ;;  %s2829_s9 = inlined_call_operand.hbm [shape: bf16[32,64], index: 9, kind: input, shape index: {}]   ;;  %s2830_s10 = inlined_call_operand.hbm [shape: f32[1,64], index: 10, kind: input, shape index: {}]   ;;  %s2831_s11 = inlined_call_operand.vmem [shape: bf16[64,32], index: 11, kind: input, shape index: {}]   ;;  %s2832_s12 = inlined_call_operand.vmem [shape: f32[1,32], index: 12, kind: input, shape index: {}]   ;;  %s2833_s13 = inlined_call_operand.vmem [shape: f32[1,32], index: 13, kind: input, shape index: {}]   ;;  %s2834_s14 = inlined_call_operand.vmem [shape: f32[1,32], index: 14, kind: input, shape index: {}]   ;;  %s2835_s15 = inlined_call_operand.vmem [shape: f32[1,32], index: 15, kind: input, shape index: {}]   ;;  %s2836_s16 = inlined_call_operand.vmem [shape: f32[1,32], index: 16, kind: input, shape index: {}]   ;;  %s2837_s17 = inlined_call_operand.vmem [shape: f32[1,32], index: 17, kind: input, shape index: {}]   ;;  %s2838_s18 = inlined_call_operand.vmem [shape: f32[1,32], index: 18, kind: input, shape index: {}]   ;;  %s2839_s19 = inlined_call_operand.hbm [shape: f32[2,8,32], index: 19, kind: output, shape index: {}]  }
   0x1   :  { %2846 = sst [smem:[#allocation23_spill]] %s2820_s0 }
   0x2   :  { %2847 = sst [smem:[#allocation24_spill]] %s2821_s1 }
   0x3   :  { %2848 = sst [smem:[#allocation25_spill]] %s2822_s2 }
   0x4   :  { %2849 = sst [smem:[#allocation26_spill]] %s2823_s3 }
   0x5   :  { %2850 = sst [smem:[#allocation27_spill]] %s2827_s7 }
   0x6   :  { %2851 = sst [smem:[#allocation28_spill]] %s2828_s8 }
   0x7   :  { %2852 = sst [smem:[#allocation29_spill]] %s2829_s9 }
   0x8   :  { %2853 = sst [smem:[#allocation30_spill]] %s2830_s10 }
   0x9   :  { %2854 = sst [smem:[#allocation31_spill]] %s2835_s15 }
   0xa   :  { %2855 = sst [smem:[#allocation32_spill]] %s2836_s16 }
   0xb   :  { %2856 = sst [smem:[#allocation33_spill]] %s2839_s19 }
   0xc   :  { %24 = vsyncpa [#allocation6], 0 }
   0xd   :  { %26 = vsyncpa [#allocation6 + $0x1], 0 }
   0xe   :  { %27 = vsyncpa [#allocation9], 0 }
   0xf   :  { %28 = vsyncpa [#allocation12], 0 }
  0x10   :  { %29 = vsyncpa [#allocation7], 0 }
  0x11   :  { %31 = vsyncpa [#allocation7 + $0x1], 0  ;;  %s2468_s0 = smov 0   ;;  %s2470_s30 = smov 0  }
  0x12   :  { %s2472_s20 = smov 0   ;;  %s2474_s21 = smov 0  }
  0x13   :  { %s2476_s17 = smov 0   ;;  %s2478_s18 = smov 0  }
  0x14 LB: > { %2857 = sst [smem:[#allocation19_spill]] %s2329_s0  ;;  %s2841_s1 = sadd.s32 4294967295, %s2349_s18   ;;  %s2349_s18 = sphi %s2478_s18, %s37_s18   ;;  %s2345_s17 = sphi %s2476_s17, %s2886_s17   ;;  %s2341_s21 = sphi %s2474_s21, %s2885_s21   ;;  %s2337_s20 = sphi %s2472_s20, %s2889_s20   ;;  %s2333_s30 = sphi %s2470_s30, %s2888_s30   ;;  %s2329_s0 = sphi %s2468_s0, %s2887_s0  }
  0x15   : > { %2858 = sst [smem:[#allocation20_spill]] %s2345_s17  ;;  %p1795_p0 = scmp.ge.s32.totalorder %s2349_s18, 1 }
  0x16   : > { %p2502_p1 = scmp.eq.s32.totalorder %s2841_s1, 0  ;;  %p496_p2 = scmp.lt.s32.totalorder %s2349_s18, 3 }
  0x17   : > { %s2351_s23 = smov [#allocation8]   ;;  %s2352_s3 = smov [#allocation11]  }
  0x18   : > { %p2507_p3 = pnand %p1795_p0, %p496_p2  ;;  %s520_s24 = sshll.u32 %s2351_s23, 4  ;;  %s521_s24 = int_to_ptr.vmem [resolvable:$true] %s520_s24 }
  0x19   : > { %s544_s26 = sshll.u32 %s2352_s3, 4  ;;  %s2353_s27 = smov [#allocation10]   ;;  %s545_s26 = int_to_ptr.vmem [resolvable:$true] %s544_s26 }
  0x1a   : > { %p2000_p4 = pneg %p2507_p3  ;;  %s534_s28 = sshll.u32 %s2353_s27, 4  ;;  %s535_s28 = int_to_ptr.vmem [resolvable:$true] %s534_s28 }
  0x1b   : > { %s2140_s29 = scalar_lea.vmem %s521_s24, 256  ;;  %p2148_p11 = scmp.lt.s32.totalorder %s521_s24, %s521_s24 }
  0x1c   : > { %p2516_p6 = pnand %p2000_p4, %p2502_p1  ;;  %p2141_p8 = scmp.ne.s32.totalorder %s521_s24, %s2140_s29 }
  0x1d   : > { %p2149_p12 = scmp.lt.s32.totalorder %s2140_s29, %s2140_s29 }
  0x1e   : > { %p2131_p7 = pneg %p2516_p6 }
  0x1f   : > { %p2150_p13 = por %p2149_p12, %p2148_p11 }
  0x20   : > { %p2143_p9 = pnand %p2141_p8, %p2131_p7 }
  0x22   : > { %p2144_p10 = pneg %p2143_p9 }
  0x24   : > { %p2151_p0 = pnand %p2150_p13, %p2144_p10 }
  0x26   : > { %2154 = shalt.err (!%p2151_p0)
}
  0x27   : > { %s2354_s23 = smov 64   ;;  %s2355_s3 = smov 4  }
  0x28   : > { %s2862_s7 = sld [smem:[#allocation27_spill]]  ;;  %s2166_s19 = scalar_lea.vmem %s545_s26, 256 }
  0x29   : > { %p2167_p2 = scmp.ne.s32.totalorder %s545_s26, %s2166_s19  ;;  %p2174_p9 = scmp.lt.s32.totalorder %s545_s26, %s545_s26 }
  0x2a   : > { %p2175_p5 = scmp.lt.s32.totalorder %s2166_s19, %s2166_s19 }
  0x2b   : > { %p2169_p4 = pnand %p2167_p2, %p2131_p7 }
  0x2c   : > { %p2176_p11 = por %p2175_p5, %p2174_p9 }
  0x2d   : > { %p2170_p8 = pneg %p2169_p4 }
  0x2e   : > { %2003 = dma.hbm_to_vmem [thread:$0]  (!%p2516_p6), %s2862_s7, 256, %s521_s24, [#allocation9], %s2354_s23, %s2354_s23, %s2355_s3  }
  0x2f   : > { %p2177_p10 = pnand %p2176_p11, %p2170_p8 }
  0x31   : > { %2180 = shalt.err (!%p2177_p10)
}
  0x32   : > { %s2863_s9 = sld [smem:[#allocation29_spill]]  ;;  %s2192_s1 = scalar_lea.vmem %s535_s28, 16 }
  0x33   : > { %p2193_p12 = scmp.ne.s32.totalorder %s535_s28, %s2192_s1  ;;  %s2199_s24 = scalar_lea.vmem %s535_s28, 32 }
  0x34   : > { %p2200_p2 = scmp.lt.s32.totalorder %s535_s28, %s535_s28  ;;  %p2201_p4 = scmp.lt.s32.totalorder %s2199_s24, %s2192_s1 }
  0x35   : > { %p2195_p13 = pnand %p2193_p12, %p2131_p7 }
  0x36   : > { %p2202_p5 = por %p2201_p4, %p2200_p2 }
  0x37   : > { %p2196_p0 = pneg %p2195_p13 }
  0x38   : > { %2009 = dma.hbm_to_vmem [thread:$0]  (!%p2516_p6), %s2863_s9, 256, %s545_s26, [#allocation12], %s2354_s23, %s2354_s23, %s2355_s3  }
  0x39   : > { %p2203_p8 = pnand %p2202_p5, %p2196_p0 }
  0x3b   : > { %2206 = shalt.err (!%p2203_p8)
}
  0x3c   : > { %s2864_s8 = sld [smem:[#allocation28_spill]]  ;;  %s2356_s16 = smov [#allocation13]  }
  0x3d   : > { %s558_s26 = sshll.u32 %s2356_s16, 4  ;;  %s559_s26 = int_to_ptr.vmem [resolvable:$true] %s558_s26 }
  0x3e   : > { %s2218_s23 = scalar_lea.vmem %s559_s26, 16  ;;  %s2225_s3 = scalar_lea.vmem %s559_s26, 32 }
  0x3f   : > { %p2219_p9 = scmp.ne.s32.totalorder %s559_s26, %s2218_s23  ;;  %p2226_p12 = scmp.lt.s32.totalorder %s559_s26, %s559_s26 }
  0x40   : > { %p2227_p13 = scmp.lt.s32.totalorder %s2225_s3, %s2218_s23 }
  0x41   : > { %p2221_p11 = pnand %p2219_p9, %p2131_p7 }
  0x42   : > { %2006 = dma.hbm_to_vmem [thread:$0]  (!%p2516_p6), %s2864_s8, 16, %s535_s28, [#allocation9]  }
  0x43   : > { %p2222_p10 = pneg %p2221_p11  ;;  %p2228_p0 = por %p2227_p13, %p2226_p12 }
  0x45   : > { %p2229_p2 = pnand %p2228_p0, %p2222_p10 }
  0x47   : > { %2232 = shalt.err (!%p2229_p2)
}
  0x48   : > { %s2865_s10 = sld [smem:[#allocation30_spill]]  ;;  %s1794_s28 = sadd.s32 4294967294, %s2349_s18  }
  0x49   : > { %s49_s24 = sadd.s32 1, %s2345_s17  ;;  %s82_s25 = sadd.s32 1, %s2337_s20 }
  0x4a   : > { %p51_p7 = scmp.ge.s32.totalorder %s49_s24, 2  ;;  %p89_p4 = scmp.ne.s32.totalorder %s2337_s20, %s2333_s30 }
  0x4b   : > { %p90_p5 = scmp.eq.s32.totalorder %s2349_s18, 0  ;;  %p95_p9 = scmp.ne.s32.totalorder %s2333_s30, %s2329_s0 }
  0x4c   : > { %s2891_s24 = smov (%p51_p7, %s49_s24), 0  ;;  %s2868_s16 = sadd.s32 4294967295, %s2349_s18  }
  0x4d   : > { %2866 = sst [smem:[#allocation21_spill]] %s2891_s24  ;;  %p2562_p8 = por %p90_p5, %p89_p4 }
  0x4e   : > { %2012 = dma.hbm_to_vmem [thread:$0]  (!%p2516_p6), %s2865_s10, 16, %s559_s26, [#allocation12]  }
  0x4f   : > { %s79_s27 = ssub.s32 %s2345_s17, %s2891_s24  ;;  %p483_p6 = scmp.eq.s32.totalorder %s2868_s16, 1 }
  0x50   : > { %p80_p11 = scmp.eq.s32.totalorder %s79_s27, 0  ;;  %p2574_p10 = por %p2502_p1, %p95_p9 }
  0x51   : > { %p2578_p12 = por %p483_p6, %p89_p4  ;;  %p489_p13 = scmp.eq.s32.totalorder %s1794_s28, 1 }
  0x52   : > { %s2583_s3 = scalar_select %p80_p11, %s2337_s20, %s82_s25  }
  0x53   : > { %p2585_p0 = por %p489_p13, %p95_p9  ;;  %p2025_p2 = scmp.lt.s32.totalorder %s2349_s18, 2 }
  0x54   : > { %2871 = sst [smem:[#allocation22_spill]] %s2583_s3  ;;  %s600_s1 = sand.u32 1, %s2337_s20  }
  0x55   : > { %s2872_s29 = scalar_select %p2585_p0, 1, 0 }
  0x56   : > { %s1802_s16 = sshll.u32 %s2345_s17, 6  ;;  %s1801_s27 = sshll.u32 %s600_s1, 2 }
  0x57   : > { %s2873_s9 = sld [smem:[#allocation24_spill]]  ;;  %s604_s24 = scalar_lea.vmem [#allocation5], %s1801_s27 }
  0x58   : > { %s611_s0 = sshll.u32 %s604_s24, 4  ;;  %p2597_p7 = pnand %p2025_p2, %p2562_p8  ;;  %s612_s0 = int_to_ptr.vmem [resolvable:$true] %s611_s0 }
  0x59   : > { %s601_s28 = scalar_lea.sflag [#allocation6], %s600_s1  ;;  %s2246_s25 = scalar_lea.vmem %s612_s0, 64 }
  0x5a   : > { %p2235_p4 = pneg %p2597_p7  ;;  %p2247_p5 = scmp.ne.s32.totalorder %s612_s0, %s2246_s25 }
  0x5b   : > { %s2357_s17 = smov [#allocation5]  }
  0x5c   : > { %p2249_p9 = pnand %p2247_p5, %p2235_p4  ;;  %s2251_s3 = sshll.u32 %s2357_s17, 4  ;;  %s2252_s3 = int_to_ptr.vmem [resolvable:$false] %s2251_s3 }
  0x5d   : > { %s609_s10 = scalar_lea.hbm %s2873_s9, %s1802_s16  ;;  %s2253_s7 = scalar_lea.vmem %s2252_s3, 128 }
  0x5e   : > { %p2250_p6 = pneg %p2249_p9  ;;  %p2254_p11 = scmp.lt.s32.totalorder %s612_s0, %s2252_s3 }
  0x5f   : > { %p2255_p13 = scmp.lt.s32.totalorder %s2253_s7, %s2246_s25 }
  0x61   : > { %p2256_p0 = por %p2255_p13, %p2254_p11 }
  0x63   : > { %p2257_p8 = pnand %p2256_p0, %p2250_p6 }
  0x65   : > { %2260 = shalt.err (!%p2257_p8)
}
  0x66   : > { %2016 = dma.hbm_to_vmem [thread:$0]  (!%p2597_p7), %s609_s10, 64, %s612_s0, %s601_s28  }
  0x67   : > { %626 = sbr.rel (%p2507_p3) target bundleno = 2670 (0xa6e), region = 96  ;;  %s2608_s8 = sand.u32 (!%p2507_p3), 1, %s2333_s30  }
  0x68   : > { %s1804_s9 = sshll.u32 (!%p2507_p3), %s2608_s8, 2  ;;  %s629_s17 = scalar_lea.sflag (!%p2507_p3), [#allocation6], %s2608_s8 }
  0x69   : > { %s632_s24 = scalar_lea.vmem (!%p2507_p3), [#allocation5], %s1804_s9 }
  0x6c   : > { %2312 = dma.done.wait (%p2574_p10), %s629_s17, 64  }
  0x6d   : > { %2314 = vsyncadd (%p2574_p10), %s629_s17, 4294967232 }
  0x6e   : > { %2316 = dma.done.wait (%p2502_p1), [#allocation9], 272  }
  0x6f   : > { %2318 = vsyncadd (%p2502_p1), [#allocation9], 4294967024 }
  0x70   : > { %2320 = dma.done.wait (%p2502_p1), [#allocation12], 272  }
  0x71   : > { %2322 = vsyncadd (%p2502_p1), [#allocation12], 4294967024  ;;  %p710_p3 = scmp.lt.s32.totalorder %s2341_s21, 1  ;;  %v2358_v0 = vmov 0.0   ;;  %vm2359_vm0 = vmmov 0   ;;  %s2875_s2 = sld [smem:[#allocation23_spill]] }
  0x72   : > { %1888 = vmatprep.subr.bf16.mxu1 %v2358_v0  ;;  %1892 = vmatprep.mubr.msk.bf16.mxu1 %vm2359_vm0, %v2358_v0  ;;  %s2876_s1 = sld [smem:[#allocation26_spill]]  ;;  %v723_v4 = vld [vmem:[%s632_s24] sm:$0xf]  ;;  %vm750_vm1 = vcmask 261120   ;;  %v1811_v8 = vld [vmem:[%s2824_s4] ss:$0 sm:$0xff] }
  0x73   : > { %s2629_s10 = scalar_select %p710_p3, %s2341_s21, 1  ;;  %1904 = vmatprep.subr.bf16.mxu0 %v2358_v0  ;;  %1906 = vmatprep.mubr.msk.bf16.mxu0 %vm2359_vm0, %v2358_v0  ;;  %v724_v5 = vunpack.c.l.bf16 %v723_v4  ;;  %vm796_vm2 = vcmask 257024   ;;  %vm892_vm3 = vcmask 64512   ;;  %v2098_v23 = vld [vmem:[%s2825_s5 + $0x8] sm:$0xff]   ;;  %v2099_v24 = vld [vmem:[%s2825_s5] sm:$0xff]   ;;  %vm954_vm4 = vcmask 1043456  }
  0x74   : > { %s2360_s7 = smov 96   ;;  %s2361_s9 = smov 120   ;;  %v1816_v4 = vld [vmem:[%s2826_s6] ss:$0 sm:$0xff]  ;;  %vm1350_vm5 = vcmask 130048   ;;  %vm1352_vm6 = vcmask 195584  }
  0x75   : > { %s1810_s15 = sshll.u32 %s2629_s10, 3  ;;  %s2362_s17 = smov 112   ;;  %vm1561_vm7 = vcmask 523264  }
  0x76   : > { %s2363_s24 = smov 104   ;;  %s2877_s3 = sld [smem:[#allocation25_spill]] }
  0x77   : > { %s713_s19 = scalar_lea.vmem %s2875_s2, %s1810_s15  ;;  %s2364_s28 = smov 8  }
  0x78   : > { %v2094_v1 = vld [vmem:[%s2876_s1 + $0x8] sm:$0xff]   ;;  %v2095_v2 = vld [vmem:[%s2876_s1] sm:$0xff]   ;;  %s2365_s25 = smov 16   ;;  %s2879_s0 = sld [smem:[#allocation32_spill]] }
  0x79   : > { %1889 = vmatpush3.bf16.msra.mxu1 %v2094_v1  ;;  %v2644_v3 = vld [vmem:[%s713_s19] sm:$0xff]  ;;  %s1851_s22 = sshll.u32 %s2341_s21, 7  ;;  %s1637_s27 = scalar_lea.sflag [#allocation7], %s2608_s8 }
  0x7a   : > { %1890 = vmatprep.subr.bf16.mxu1 %v2358_v0  ;;  %v725_v6 = vadd.f32 %v724_v5, %v2644_v3  ;;  %v806_v25 = vpack.c.bf16 %v2644_v3, %v2644_v3 }
  0x7c   : > { %v726_v7 = vpack.c.bf16 %v725_v6, %v725_v6  ;;  %s716_s16 = scalar_lea.vmem %s2877_s3, %s2629_s10 }
  0x7d   : > { %1891 = vmatpush3.bf16.msra.mxu1 %v2095_v2  ;;  %v1820_v35 = vld [vmem:[%s716_s16] ss:$0 sm:$0xff]  ;;  %s2880_s16 = sld [smem:[#allocation33_spill]] }
  0x7e   : > { %1896 = vmatprep.subr.bf16.mxu1 %v2358_v0 }
  0x80   : > { %1893 = vmatmul.mubr.msk.bf16.vlgmr.msra.gmra.mxu1 %vm750_vm1, %v726_v7 }
  0x81   : > { %1900 = vmatprep.mubr.msk.bf16.mxu1 %vm2359_vm0, %v2358_v0  ;;  %1897 = vmatpush3.bf16.msra.mxu1 %v2098_v23 }
  0x82   : > { %1898 = vmatprep.subr.bf16.mxu1 %v2358_v0 }
  0x83   : > { %s1649_s10 = scalar_lea.hbm %s2880_s16, %s1851_s22 }
  0x85   : > { %1899 = vmatpush3.bf16.msra.mxu1 %v2099_v24 }
  0x86   : > { %1910 = vmatprep.subr.bf16.mxu1 %v2358_v0 }
  0x88   : > { %1901 = vmatmul.mubr.msk.bf16.vlgmr.msra.gmra.mxu1 %vm750_vm1, %v806_v25 }
  0x89   : > { %1912 = vmatprep.mubr.msk.bf16.mxu1 %vm2359_vm0, %v2358_v0 }
 0x140   : > { %v788_v9 = vpop.f32.mrf.mxu1 }
 0x141   : > { %v789_v10 = vadd.f32 %v1811_v8, %v788_v9 }
 0x142   : > { %v1894_v11 = vpop.f32.mrf.mxu1 }
 0x143   : > { %v794_v12 = vmul.f32 0.35355338, %v789_v10  ;;  %v1854_v13 = vpack.c.bf16 %v789_v10, %v789_v10 }
 0x144   : > { %v791_v14 = vpop.f32.mrf.mxu1 }
 0x145   : > { %v795_v15 = vpack.c.bf16 %v794_v12, %v794_v12  ;;  %802 = vrot.lane.b32.xlu0 %v1854_v13, %s2360_s7  ;;  %s2366_s7 = smov 24  }
 0x146   : > { %v1895_v16 = vpop.f32.mrf.mxu1 }
 0x147   : > { %797 = vst.msk [vmem:[#allocation2] sm:$0xf] %vm796_vm2, %v795_v15 }
 0x148   : > { %v867_v63 = vpop.f32.mrf.mxu1 }
 0x149   : > { %v868_v5 = vadd.f32 %v1816_v4, %v867_v63  ;;  %v2102_v63 = vld [vmem:[#allocation8] sm:$0xff]  }
 0x14a   : > { %v1902_v1 = vpop.f32.mrf.mxu1 }
 0x14b   : > { %v873_v7 = vpack.c.bf16 %v868_v5, %v868_v5 }
 0x14c   : > { %v870_v2 = vpop.f32.mrf.mxu1 }
 0x14d   : > { %874 = vst.msk [vmem:[#allocation4] sm:$0xf] %vm796_vm2, %v873_v7 }
 0x14e   : > { %v882_v17 = vld [vmem:[#allocation2] sm:$0xf]  ;;  %v1903_v6 = vpop.f32.mrf.mxu1 }
 0x14f   : > { %v1823_v18 = vcombine.low %v882_v17, %v882_v17 }
 0x151   : > { %1001 = vrot.lane.b32.xlu1 %v1823_v18, %s2361_s9 }
 0x154   : > { %v884_v10 = vld [vmem:[#allocation4] sm:$0xf] }
 0x155   : > { %v956_v11 = vsel %vm954_vm4, %v884_v10, 0 }
 0x156   : > { %1911 = vmatpush3.bf16.msra.mxu1 %v956_v11 }
 0x157   : > { %1922 = vmatprep.subr.bf16.mxu1 %v2358_v0 }
 0x1b7   : > { %v803_v19 = vpop.permute.xlu0 %802 }
 0x1b8   : > { %805 = vst.msk [vmem:[#allocation3] sm:$0xf] %vm796_vm2, %v803_v19 }
 0x1bf   : > { %v883_v20 = vld [vmem:[#allocation3] sm:$0xf] }
 0x1c0   : > { %v897_v21 = vsel %vm892_vm3, %v883_v20, 0  ;;  %v1824_v22 = vcombine.low %v883_v20, %v883_v20 }
 0x1c1   : > { %1905 = vmatpush3.bf16.xpose.msra.mxu0 %v897_v21 }
 0x1c2   : > { %1006 = vrot.lane.b32.xlu0 %v1824_v22, %s2361_s9  ;;  %1119 = vrot.lane.b32.xlu1 %v1824_v22, %s2362_s17 }
 0x1c3   : > { %1916 = vmatprep.subr.bf16.mxu0 %v2358_v0  ;;  %v1002_v28 = vpop.permute.xlu1 %1001 }
 0x1c6   : > { %1117 = vrot.lane.b32.xlu0 %v1823_v18, %s2362_s17  ;;  %1229 = vrot.lane.b32.xlu1 %v1824_v22, %s2363_s24  ;;  %v1826_v22 = vcombine.low %v884_v10, %v884_v10 }
 0x1c8   : > { %1907 = vmatmul.mubr.msk.bf16.vlgmr.msra.gmra.mxu0 %vm892_vm3, %v882_v17 }
 0x1c9   : > { %1918 = vmatprep.mubr.msk.bf16.mxu0 %vm2359_vm0, %v2358_v0 }
 0x1ca   : > { %1227 = vrot.lane.b32.xlu0 %v1823_v18, %s2363_s24 }
 0x234   : > { %v1007_v26 = vpop.permute.xlu0 %1006  ;;  %v1120_v29 = vpop.permute.xlu1 %1119 }
 0x235   : > { %v1012_v27 = vsel %vm892_vm3, %v1007_v26, 0  ;;  %v1125_v30 = vsel %vm892_vm3, %v1120_v29, 0 }
 0x236   : > { %1917 = vmatpush3.bf16.xpose.msra.mxu0 %v1012_v27 }
 0x237   : > { %1928 = vmatprep.subr.bf16.mxu0 %v2358_v0 }
 0x238   : > { %v1230_v31 = vpop.permute.xlu1 %1229  ;;  %v1118_v32 = vpop.permute.xlu0 %1117 }
 0x239   : > { %v1235_v33 = vsel %vm892_vm3, %v1230_v31, 0 }
 0x23c   : > { %v1228_v34 = vpop.permute.xlu0 %1227 }
 0x23d   : > { %1919 = vmatmul.mubr.msk.bf16.vlgmr.msra.gmra.mxu0 %vm892_vm3, %v1002_v28 }
 0x23e   : > { %1929 = vmatpush3.bf16.xpose.msra.mxu0 %v1125_v30  ;;  %1930 = vmatprep.mubr.msk.bf16.mxu0 %vm2359_vm0, %v2358_v0 }
 0x23f   : > { %1940 = vmatprep.subr.bf16.mxu0 %v2358_v0 }
 0x245   : > { %1931 = vmatmul.mubr.msk.bf16.vlgmr.msra.gmra.mxu0 %vm892_vm3, %v1118_v32 }
 0x246   : > { %1941 = vmatpush3.bf16.xpose.msra.mxu0 %v1235_v33  ;;  %1942 = vmatprep.mubr.msk.bf16.mxu0 %vm2359_vm0, %v2358_v0 }
 0x247   : > { %1952 = vmatprep.subr.bf16.mxu0 %v2358_v0 }
 0x24d   : > { %1943 = vmatmul.mubr.msk.bf16.vlgmr.msra.gmra.mxu0 %vm892_vm3, %v1228_v34 }
 0x24e   : > { %1956 = vmatprep.mubr.msk.bf16.mxu0 %vm2359_vm0, %v2358_v0 }
 0x288   : > { %v933_v36 = vpop.f32.mrf.mxu0 }
 0x289   : > { %v934_v37 = vadd.f32 %v1820_v35, %v933_v36 }
 0x28a   : > { %v1908_v38 = vpop.f32.mrf.mxu0 }
 0x28b   : > { %v939_v39 = vsel %vm892_vm3, %v934_v37, -inf }
 0x28c   : > { %940 = vmax.xlane.f32.xlu1 %v939_v39  ;;  %v936_v40 = vpop.f32.mrf.mxu0 }
 0x28e   : > { %v1909_v41 = vpop.f32.mrf.mxu0 }
 0x2fd   : > { %v1048_v42 = vpop.f32.mrf.mxu0 }
 0x2fe   : > { %v1049_v43 = vadd.f32 %v1820_v35, %v1048_v42 }
 0x2ff   : > { %v1920_v44 = vpop.f32.mrf.mxu0 }
 0x300   : > { %v1054_v45 = vsel %vm892_vm3, %v1049_v43, -inf }
 0x301   : > { %1055 = vmax.xlane.f32.xlu0 %v1054_v45  ;;  %v1051_v46 = vpop.f32.mrf.mxu0 }
 0x303   : > { %v1921_v47 = vpop.f32.mrf.mxu0 }
 0x305   : > { %v1161_v48 = vpop.f32.mrf.mxu0 }
 0x306   : > { %v1162_v49 = vadd.f32 %v1820_v35, %v1161_v48 }
 0x307   : > { %v1932_v50 = vpop.f32.mrf.mxu0 }
 0x308   : > { %v1167_v51 = vsel %vm892_vm3, %v1162_v49, -inf }
 0x309   : > { %1168 = vmax.xlane.f32.xlu0 %v1167_v51  ;;  %v1164_v52 = vpop.f32.mrf.mxu0 }
 0x30b   : > { %v1933_v53 = vpop.f32.mrf.mxu0 }
 0x30d   : > { %v1271_v54 = vpop.f32.mrf.mxu0 }
 0x30e   : > { %v1272_v55 = vadd.f32 %v1820_v35, %v1271_v54  ;;  %v2101_v54 = vld [vmem:[#allocation8 + $0x8] sm:$0xff]  }
 0x30f   : > { %v1944_v56 = vpop.f32.mrf.mxu0  ;;  %1953 = vmatpush3.bf16.msra.mxu0 %v2101_v54 }
 0x310   : > { %v1277_v57 = vsel %vm892_vm3, %v1272_v55, -inf  ;;  %1954 = vmatprep.subr.bf16.mxu0 %v2358_v0 }
 0x311   : > { %1278 = vmax.xlane.f32.xlu1 %v1277_v57  ;;  %v1274_v58 = vpop.f32.mrf.mxu0 }
 0x313   : > { %v1945_v59 = vpop.f32.mrf.mxu0  ;;  %1955 = vmatpush3.bf16.msra.mxu0 %v2102_v63 }
 0x314   : > { %1968 = vmatprep.subr.bf16.mxu0 %v2358_v0 }
 0x315   : > { %v941_v60 = vpop.xlane.xlu1 %940 }
 0x316   : > { %v942_v61 = vsub.f32 %v934_v37, %v941_v60 }
 0x318   : > { %v943_v62 = vmul.f32 1.442695, %v942_v61 }
 0x31a   : > { %2109 = vpow2.f32 %v943_v62 }
 0x327   : > { %v2110_v8 = vpop.eup %2109 }
 0x328   : > { %v945_v9 = vsel %vm892_vm3, %v2110_v8, 0.0 }
 0x329   : > { %946 = vadd.xlane.f32.xlu0 %v945_v9 }
 0x38a   : > { %v1056_v12 = vpop.xlane.xlu0 %1055 }
 0x38b   : > { %v1057_v13 = vsub.f32 %v1049_v43, %v1056_v12 }
 0x38d   : > { %v1058_v14 = vmul.f32 1.442695, %v1057_v13  ;;  %v1832_v13 = vld [vmem:[#allocation10] ss:$0 sm:$0xff] }
 0x38f   : > { %2111 = vpow2.f32 %v1058_v14 }
 0x392   : > { %v1169_v15 = vpop.xlane.xlu0 %1168 }
 0x393   : > { %v1170_v16 = vsub.f32 %v1162_v49, %v1169_v15 }
 0x395   : > { %v1171_v17 = vmul.f32 1.442695, %v1170_v16 }
 0x397   : > { %2113 = vpow2.f32 %v1171_v17 }
 0x39a   : > { %v1279_v24 = vpop.xlane.xlu1 %1278 }
 0x39b   : > { %v1280_v25 = vsub.f32 %v1272_v55, %v1279_v24 }
 0x39c   : > { %v2112_v18 = vpop.eup %2111 }
 0x39d   : > { %v1060_v19 = vsel %vm892_vm3, %v2112_v18, 0.0  ;;  %v1281_v26 = vmul.f32 1.442695, %v1280_v25 }
 0x39e   : > { %1061 = vadd.xlane.f32.xlu1 %v1060_v19 }
 0x3a4   : > { %v2114_v20 = vpop.eup %2113 }
 0x3a5   : > { %v1173_v21 = vsel %vm892_vm3, %v2114_v20, 0.0 }
 0x3a6   : > { %1174 = vadd.xlane.f32.xlu0 %v1173_v21 }
 0x3af   : > { %1179 = vrot.lane.b32.xlu1 %v1826_v22, %s2362_s17  ;;  %s2878_s17 = sld [smem:[#allocation31_spill]] }
 0x3b2   : > { %v947_v23 = vpop.xlane.xlu0 %946 }
 0x3b3   : > { %2115 = vrcp.f32 %v947_v23 }
 0x3b4   : > { %2117 = vpow2.f32 %v1281_v26  ;;  %v2103_v26 = vld [vmem:[#allocation11 + $0x8] sm:$0xff]  }
 0x3bc   : > { %1069 = vrot.lane.b32.xlu0 %v1826_v22, %s2361_s9 }
 0x3c0   : > { %v2116_v27 = vpop.eup %2115 }
 0x3c1   : > { %v949_v28 = vmul.f32 %v2116_v27, %v2110_v8  ;;  %v2118_v30 = vpop.eup %2117  ;;  %v2104_v27 = vld [vmem:[#allocation11] sm:$0xff]  }
 0x3c2   : > { %v1283_v31 = vsel %vm892_vm3, %v2118_v30, 0.0 }
 0x3c3   : > { %v950_v29 = vpack.c.bf16 %v949_v28, %v949_v28  ;;  %v2106_v28 = vld [vmem:[%s2831_s11 + $0x10] sm:$0xff]  }
 0x3c5   : > { %1913 = vmatmul.mubr.msk.bf16.vlgmr.msra.gmra.mxu1 %vm892_vm3, %v950_v29 }
 0x3c6   : > { %1924 = vmatprep.mubr.msk.bf16.mxu1 %vm2359_vm0, %v2358_v0 }
 0x3d3   : > { %1284 = vadd.xlane.f32.xlu1 %v1283_v31 }
 0x3e4   : > { %1289 = vrot.lane.b32.xlu1 %v1826_v22, %s2363_s24 }
 0x427   : > { %v1062_v32 = vpop.xlane.xlu1 %1061 }
 0x428   : > { %2119 = vrcp.f32 %v1062_v32 }
 0x42b   : > { %v1180_v38 = vpop.permute.xlu1 %1179 }
 0x42c   : > { %v1185_v40 = vsel %vm954_vm4, %v1180_v38, 0 }
 0x42f   : > { %v1175_v33 = vpop.xlane.xlu0 %1174 }
 0x430   : > { %2121 = vrcp.f32 %v1175_v33  ;;  %v1836_v33 = vld [vmem:[%s2833_s13] ss:$0 sm:$0xff] }
 0x433   : > { %v1070_v34 = vpop.permute.xlu0 %1069 }
 0x434   : > { %v1075_v35 = vsel %vm954_vm4, %v1070_v34, 0 }
 0x435   : > { %v2120_v36 = vpop.eup %2119  ;;  %1923 = vmatpush3.bf16.msra.mxu1 %v1075_v35  ;;  %v1837_v35 = vld [vmem:[%s2834_s14] ss:$0 sm:$0xff] }
 0x436   : > { %1934 = vmatprep.subr.bf16.mxu1 %v2358_v0  ;;  %v1064_v37 = vmul.f32 %v2120_v36, %v2112_v18 }
 0x438   : > { %v1065_v39 = vpack.c.bf16 %v1064_v37, %v1064_v37 }
 0x43a   : > { %1925 = vmatmul.mubr.msk.bf16.vlgmr.msra.gmra.mxu1 %vm892_vm3, %v1065_v39  ;;  %v2107_v39 = vld [vmem:[%s2831_s11 + $0x8] sm:$0xff]  }
 0x43b   : > { %1935 = vmatpush3.bf16.msra.mxu1 %v1185_v40  ;;  %1936 = vmatprep.mubr.msk.bf16.mxu1 %vm2359_vm0, %v2358_v0  ;;  %v2108_v40 = vld [vmem:[%s2831_s11] sm:$0xff]  }
 0x43c   : > { %1946 = vmatprep.subr.bf16.mxu1 %v2358_v0 }
 0x43d   : > { %v2122_v41 = vpop.eup %2121 }
 0x43e   : > { %v1177_v42 = vmul.f32 %v2122_v41, %v2114_v20  ;;  %v1838_v41 = vld [vmem:[#allocation13] ss:$0 sm:$0xff] }
 0x440   : > { %v1178_v43 = vpack.c.bf16 %v1177_v42, %v1177_v42 }
 0x442   : > { %1937 = vmatmul.mubr.msk.bf16.vlgmr.msra.gmra.mxu1 %vm892_vm3, %v1178_v43 }
 0x443   : > { %1948 = vmatprep.mubr.msk.bf16.mxu1 %vm2359_vm0, %v2358_v0 }
 0x45c   : > { %v1285_v44 = vpop.xlane.xlu1 %1284 }
 0x45d   : > { %2123 = vrcp.f32 %v1285_v44 }
 0x460   : > { %v1290_v45 = vpop.permute.xlu1 %1289 }
 0x461   : > { %v1295_v46 = vsel %vm954_vm4, %v1290_v45, 0 }
 0x462   : > { %1947 = vmatpush3.bf16.msra.mxu1 %v1295_v46 }
 0x463   : > { %1960 = vmatprep.subr.bf16.mxu1 %v2358_v0 }
 0x46a   : > { %v2124_v47 = vpop.eup %2123 }
 0x46b   : > { %v1287_v48 = vmul.f32 %v2124_v47, %v2118_v30 }
 0x46d   : > { %v1288_v49 = vpack.c.bf16 %v1287_v48, %v1287_v48 }
 0x46f   : > { %1949 = vmatmul.mubr.msk.bf16.vlgmr.msra.gmra.mxu1 %vm892_vm3, %v1288_v49  ;;  %v1842_v49 = vld [vmem:[%s2832_s12] ss:$0 sm:$0xff] }
 0x470   : > { %1964 = vmatprep.mubr.msk.bf16.mxu1 %vm2359_vm0, %v2358_v0  ;;  %1961 = vmatpush3.bf16.msra.mxu1 %v2103_v26 }
 0x471   : > { %1962 = vmatprep.subr.bf16.mxu1 %v2358_v0 }
 0x474   : > { %1963 = vmatpush3.bf16.msra.mxu1 %v2104_v27 }
 0x485   : > { %v992_v50 = vpop.f32.mrf.mxu1 }
 0x487   : > { %v1914_v51 = vpop.f32.mrf.mxu1 }
 0x489   : > { %v995_v52 = vpop.f32.mrf.mxu1 }
 0x48b   : > { %v1915_v53 = vpop.f32.mrf.mxu1 }
 0x4fa   : > { %v1111_v55 = vpop.f32.mrf.mxu1 }
 0x4fb   : > { %1338 = vrot.lane.b32.xlu0 %v1111_v55, %s2364_s28 }
 0x4fc   : > { %v1926_v56 = vpop.f32.mrf.mxu1 }
 0x4fe   : > { %v1114_v57 = vpop.f32.mrf.mxu1 }
 0x500   : > { %v1927_v58 = vpop.f32.mrf.mxu1 }
 0x502   : > { %v1221_v59 = vpop.f32.mrf.mxu1 }
 0x503   : > { %1342 = vrot.lane.b32.xlu1 %v1221_v59, %s2365_s25  ;;  %s1809_s25 = sshll.u32 %s2608_s8, 3 }
 0x504   : > { %v1938_v60 = vpop.f32.mrf.mxu1  ;;  %s709_s2 = scalar_lea.vmem [#allocation14], %s1809_s25 }
 0x505   : > { %s1651_s19 = sshll.u32 %s709_s2, 4  ;;  %s1652_s19 = int_to_ptr.vmem [resolvable:$true] %s1651_s19 }
 0x506   : > { %v1224_v61 = vpop.f32.mrf.mxu1  ;;  %s2261_s28 = scalar_lea.vmem %s1652_s19, 128 }
 0x507   : > { %p2262_p1 = scmp.ne.s32.totalorder %s1652_s19, %s2261_s28 }
 0x508   : > { %v1939_v62 = vpop.f32.mrf.mxu1 }
 0x509   : > { %p2263_p10 = pnand %p2262_p1, %p2578_p12 }
 0x50b   : > { %p2264_p0 = pneg %p2263_p10 }
 0x52f   : > { %v1331_v1 = vpop.f32.mrf.mxu1 }
 0x530   : > { %1346 = vrot.lane.b32.xlu0 %v1331_v1, %s2366_s7  ;;  %s2367_s7 = smov [#allocation14]  }
 0x531   : > { %v1950_v2 = vpop.f32.mrf.mxu1  ;;  %s2265_s9 = sshll.u32 %s2367_s7, 4  ;;  %s2266_s9 = int_to_ptr.vmem [resolvable:$false] %s2265_s9 }
 0x532   : > { %v1848_v2 = vld [vmem:[%s2878_s17] ss:$0 sm:$0xff]  ;;  %s2267_s21 = scalar_lea.vmem %s2266_s9, 256  ;;  %p2268_p2 = scmp.lt.s32.totalorder %s1652_s19, %s2266_s9 }
 0x533   : > { %v1334_v4 = vpop.f32.mrf.mxu1  ;;  %p2269_p7 = scmp.lt.s32.totalorder %s2267_s21, %s2261_s28 }
 0x535   : > { %v1951_v5 = vpop.f32.mrf.mxu1  ;;  %p2270_p4 = por %p2269_p7, %p2268_p2 }
 0x536   : > { %v1849_v5 = vld [vmem:[%s2879_s0] ss:$0 sm:$0xff] }
 0x537   : > { %p2271_p5 = pnand %p2270_p4, %p2264_p0 }
 0x56d   : > { %v1339_v6 = vpop.permute.xlu0 %1338 }
 0x56e   : > { %v1349_v8 = vsel %vm892_vm3, %v992_v50, %v1339_v6 }
 0x575   : > { %v1343_v7 = vpop.permute.xlu1 %1342 }
 0x576   : > { %v1351_v9 = vsel %vm1350_vm5, %v1349_v8, %v1343_v7 }
 0x5a2   : > { %v1347_v10 = vpop.permute.xlu0 %1346 }
 0x5a3   : > { %v1353_v11 = vsel %vm1352_vm6, %v1351_v9, %v1347_v10 }
 0x5a4   : > { %v1354_v12 = vpack.c.bf16 %v1353_v11, %v1353_v11 }
 0x5a6   : > { %1957 = vmatmul.mubr.msk.bf16.vlgmr.msra.gmra.mxu0 %vm750_vm1, %v1354_v12 }
 0x5a7   : > { %1976 = vmatprep.mubr.msk.bf16.mxu0 %vm2359_vm0, %v2358_v0 }
 0x666   : > { %v1416_v14 = vpop.f32.mrf.mxu0 }
 0x667   : > { %v1417_v15 = vadd.f32 %v1832_v13, %v1416_v14 }
 0x668   : > { %v1958_v16 = vpop.f32.mrf.mxu0 }
 0x669   : > { %v1422_v17 = vadd.f32 %v1417_v15, %v2644_v3  ;;  %v2105_v3 = vld [vmem:[%s2831_s11 + $0x18] sm:$0xff]  }
 0x66a   : > { %v1419_v18 = vpop.f32.mrf.mxu0  ;;  %1969 = vmatpush3.bf16.msra.mxu0 %v2105_v3 }
 0x66b   : > { %v1425_v19 = vsel %vm750_vm1, %v1422_v17, 0.0  ;;  %1970 = vmatprep.subr.bf16.mxu0 %v2358_v0 }
 0x66c   : > { %1426 = vadd.xlane.f32.xlu1 %v1425_v19  ;;  %v1959_v20 = vpop.f32.mrf.mxu0 }
 0x66e   : > { %1971 = vmatpush3.bf16.msra.mxu0 %v2106_v28 }
 0x66f   : > { %1972 = vmatprep.subr.bf16.mxu0 %v2358_v0 }
 0x672   : > { %1973 = vmatpush3.bf16.msra.mxu0 %v2107_v39 }
 0x673   : > { %1974 = vmatprep.subr.bf16.mxu0 %v2358_v0 }
 0x676   : > { %1975 = vmatpush3.bf16.msra.mxu0 %v2108_v40 }
 0x6f5   : > { %v1427_v21 = vpop.xlane.xlu1 %1426 }
 0x6f6   : > { %v1429_v22 = vmul.f32 0.03125, %v1427_v21 }
 0x6f8   : > { %v1430_v23 = vsub.f32 %v1422_v17, %v1429_v22 }
 0x6fa   : > { %v1431_v24 = vmul.f32 %v1430_v23, %v1430_v23 }
 0x6fc   : > { %v1432_v25 = vsel %vm750_vm1, %v1431_v24, 0.0 }
 0x6fd   : > { %1433 = vadd.xlane.f32.xlu0 %v1432_v25 }
 0x786   : > { %v1434_v29 = vpop.xlane.xlu0 %1433 }
 0x787   : > { %v1435_v30 = vmul.f32 0.03125, %v1434_v29 }
 0x789   : > { %v1436_v31 = vadd.f32 1e-05, %v1435_v30 }
 0x78b   : > { %2125 = vrsqrt.f32 %v1436_v31 }
 0x798   : > { %v2126_v32 = vpop.eup %2125 }
 0x799   : > { %v1438_v34 = vmul.f32 %v2126_v32, %v1430_v23 }
 0x79b   : > { %v1445_v36 = vmul.f32 %v1836_v33, %v1438_v34 }
 0x79d   : > { %v1452_v37 = vadd.f32 %v1837_v35, %v1445_v36 }
 0x79f   : > { %v1453_v38 = vpack.c.bf16 %v1452_v37, %v1452_v37 }
 0x7a1   : > { %1965 = vmatmul.mubr.msk.bf16.vlgmr.msra.gmra.mxu1 %vm750_vm1, %v1453_v38 }
 0x861   : > { %v1514_v42 = vpop.f32.mrf.mxu1 }
 0x862   : > { %v1515_v43 = vadd.f32 %v1838_v41, %v1514_v42 }
 0x863   : > { %v1966_v44 = vpop.f32.mrf.mxu1 }
 0x864   : > { %v1520_v45 = vmax.f32 %v1515_v43, 0.0 }
 0x865   : > { %v1517_v46 = vpop.f32.mrf.mxu1 }
 0x866   : > { %v1521_v47 = vpack.c.bf16 %v1520_v45, %v1520_v45 }
 0x867   : > { %v1967_v48 = vpop.f32.mrf.mxu1 }
 0x868   : > { %1977 = vmatmul.mubr.msk.bf16.vlgmr.msra.gmra.mxu0 %vm1561_vm7, %v1521_v47 }
 0x928   : > { %v1599_v0 = vpop.f32.mrf.mxu0 }
 0x929   : > { %v1600_v50 = vadd.f32 %v1842_v49, %v1599_v0 }
 0x92a   : > { %v1978_v51 = vpop.f32.mrf.mxu0 }
 0x92b   : > { %v1605_v52 = vadd.f32 %v1600_v50, %v1452_v37 }
 0x92c   : > { %v1602_v53 = vpop.f32.mrf.mxu0 }
 0x92d   : > { %v1608_v54 = vsel %vm750_vm1, %v1605_v52, 0.0 }
 0x92e   : > { %1609 = vadd.xlane.f32.xlu0 %v1608_v54  ;;  %v1979_v55 = vpop.f32.mrf.mxu0 }
 0x9b7   : > { %v1610_v56 = vpop.xlane.xlu0 %1609 }
 0x9b8   : > { %v1611_v57 = vmul.f32 0.03125, %v1610_v56 }
 0x9ba   : > { %v1612_v58 = vsub.f32 %v1605_v52, %v1611_v57 }
 0x9bc   : > { %v1613_v59 = vmul.f32 %v1612_v58, %v1612_v58 }
 0x9be   : > { %v1614_v60 = vsel %vm750_vm1, %v1613_v59, 0.0 }
 0x9bf   : > { %1615 = vadd.xlane.f32.xlu1 %v1614_v60 }
 0xa48   : > { %v1616_v61 = vpop.xlane.xlu1 %1615 }
 0xa49   : > { %v1617_v62 = vmul.f32 0.03125, %v1616_v61 }
 0xa4b   : > { %v1618_v63 = vadd.f32 1e-05, %v1617_v62 }
 0xa4d   : > { %2127 = vrsqrt.f32 %v1618_v63 }
 0xa5a   : > { %v2128_v1 = vpop.eup %2127 }
 0xa5b   : > { %v1620_v4 = vmul.f32 %v2128_v1, %v1612_v58 }
 0xa5d   : > { %v1627_v6 = vmul.f32 %v1848_v2, %v1620_v4 }
 0xa5f   : > { %v1634_v7 = vadd.f32 %v1849_v5, %v1627_v6 }
 0xa61   : > { %1635 = vst.msk [vmem:[%s709_s2] sm:$0xff] %vm750_vm1, %v1634_v7 }
 0xa62   : > { %2274 = shalt.err (!%p2271_p5)
}
 0xa63   : > { %s2275_s25 = scalar_lea.hbm %s1649_s10, 128  ;;  %s2279_s24 = scalar_lea.hbm %s2880_s16, 256 }
 0xa64   : > { %p2276_p9 = scmp.ne.s32.totalorder %s1649_s10, %s2275_s25  ;;  %p2280_p13 = scmp.lt.s32.totalorder %s1649_s10, %s2880_s16 }
 0xa65   : > { %p2281_p8 = scmp.lt.s32.totalorder %s2279_s24, %s2275_s25 }
 0xa66   : > { %p2277_p6 = pnand %p2276_p9, %p2578_p12 }
 0xa67   : > { %p2282_p3 = por %p2281_p8, %p2280_p13 }
 0xa68   : > { %p2278_p11 = pneg %p2277_p6 }
 0xa6a   : > { %p2283_p1 = pnand %p2282_p3, %p2278_p11 }
 0xa6c   : > { %2286 = shalt.err (!%p2283_p1)
}
 0xa6d   : > { %1998 = dma.vmem_to_hbm [thread:$0]  (%p2578_p12), %s1652_s19, 128, %s1649_s10, %s1637_s27  }
 0xa6e PF: > { %s2881_s22 = sld [smem:[#allocation19_spill]]  ;;  %p2882_p10 = scmp.ne.s32.totalorder %s2872_s29, 0 }
 0xa6f   : > { %p2883_p0 = scmp.ge.s32.totalorder %s2349_s18, 2 }
 0xa71   : > { %p2018_p2 = pnand %p2883_p0, %p2882_p10 }
 0xa73   : > { %p2019_p7 = pneg %p2018_p2 }
 0xa74   : > { %s1663_s2 = sand.u32 1, %s2881_s22  }
 0xa75   : > { %s1664_s26 = scalar_lea.sflag [#allocation7], %s1663_s2 }
 0xa76   : > { %2324 = dma.done.wait (%p2019_p7), %s1664_s26, 128  }
 0xa77   : > { %2326 = vsyncadd (%p2019_p7), %s1664_s26, 4294967168  ;;  %s37_s18 = sadd.s32 1, %s2349_s18   ;;  %s2884_s3 = sld [smem:[#allocation22_spill]] }
 0xa78   : > { %p34_p4 = scmp.ge.s32.totalorder %s37_s18, 4   ;;  %s2885_s21 = sld [smem:[#allocation20_spill]] }
 0xa79   : > { %s2886_s17 = sld [smem:[#allocation21_spill]]  ;;  %s2887_s0 = smov %s2333_s30 }
 0xa7a   : > { %s2888_s30 = smov %s2337_s20  ;;  %36 = sbr.rel (!%p34_p4) target bundleno = 20 (0x14), region = 169 }
 0xa7d   : > { %s2889_s20 = smov %s2884_s3 }
 0xa7f   :  { %1669 = vsyncpa [#allocation6], 1 }
 0xa80   :  { %1671 = vsyncpa [#allocation6 + $0x1], 1 }
 0xa81   :  { %1672 = vsyncpa [#allocation9], 1 }
 0xa82   :  { %1673 = vsyncpa [#allocation12], 1 }
 0xa83   :  { %1674 = vsyncpa [#allocation7], 1 }
 0xa84   :  { %1676 = vsyncpa [#allocation7 + $0x1], 1 }

</bundles_post_ra>
